<compile_context>
chip_gen: v6e
topology: v6e:2x2x1
jax: 0.10.0
libtpu: 0.0.40
codegen_flags: <defaults>
</compile_context>

<pallas_src>
import functools
import math

import jax
import jax.numpy as jnp
from jax import lax
from jax.experimental import pallas as pl
from jax.experimental.pallas import tpu as pltpu

LN_EPS = 1e-12          # BERT layer-norm epsilon
NEG_INF = -1e30         # finite "-inf" for online softmax init


@functools.lru_cache(maxsize=None)
def _vmem_limit():
    """Generation-aware VMEM budget: ~70% of physical, capped at 96 MiB.

    v5e/v6e (128 MiB phys) -> ~89 MiB; v7x (64 MiB phys) -> ~44 MiB.
    """
    try:
        cap = int(pltpu.get_tpu_info().vmem_capacity_bytes)
    except Exception:                                    # emulator / old jax
        cap = 64 * 1024 * 1024
    return max(32 * 1024 * 1024, min(cap * 7 // 10, 96 * 1024 * 1024))


def _tile(dim, target, align):
    """Largest `align`-aligned divisor of `dim` that is <= target.

    Never returns a tile larger than `dim`; only falls back to the full dim
    when no aligned divisor exists (full-dim blocks are always legal).
    """
    if dim <= target:
        return dim
    t = (min(target, dim) // align) * align
    while t >= align:
        if dim % t == 0:
            return t
        t -= align
    # TODO(synk): pad + mask instead of full-dim fallback for pathological dims.
    return dim


# --------------------------- tiled dense kernels --------------------------- #

def _dense_kernel(x_ref, w_ref, b_ref, o_ref, acc_ref, *, activation):
    k = pl.program_id(2)

    @pl.when(k == 0)
    def _():
        acc_ref[...] = jnp.zeros_like(acc_ref)

    acc_ref[...] += jnp.dot(x_ref[...], w_ref[...],
                            preferred_element_type=jnp.float32)

    @pl.when(k == pl.num_programs(2) - 1)
    def _():
        y = acc_ref[...] + b_ref[...]
        if activation == "gelu":
            # TODO(synk): HF BERT default hidden_act='gelu' is the exact erf
            # form; tanh-approx (diff < 1e-3) is used since it lowers to EUP.
            y = jax.nn.gelu(y, approximate=True)
        o_ref[...] = y.astype(o_ref.dtype)


def dense(x, w, b, activation=None, tm=512, tn=1536, tk=1024):
    """Tiled (M,K)@(K,N)+b (+optional GELU), bf16 in/out, f32 accumulate."""
    M, K = x.shape
    _, N = w.shape
    tm, tn, tk = _tile(M, tm, 8), _tile(N, tn, 128), _tile(K, tk, 128)
    kernel = functools.partial(_dense_kernel, activation=activation)
    cost = pl.CostEstimate(
        flops=2 * M * N * K,
        transcendentals=M * N if activation == "gelu" else 0,
        bytes_accessed=2 * (M * K + K * N + M * N))
    return pl.pallas_call(
        kernel,
        out_shape=jax.ShapeDtypeStruct((M, N), jnp.bfloat16),
        grid=(M // tm, N // tn, K // tk),
        in_specs=[
            pl.BlockSpec((tm, tk), lambda i, j, k: (i, k)),
            pl.BlockSpec((tk, tn), lambda i, j, k: (k, j)),
            pl.BlockSpec((1, tn), lambda i, j, k: (0, j)),
        ],
        out_specs=pl.BlockSpec((tm, tn), lambda i, j, k: (i, j)),
        scratch_shapes=[pltpu.VMEM((tm, tn), jnp.float32)],
        compiler_params=pltpu.CompilerParams(
            dimension_semantics=("parallel", "parallel", "arbitrary"),
            vmem_limit_bytes=_vmem_limit()),
        cost_estimate=cost,
    )(x, w, b.reshape(1, N))


def _dense_qkv_kernel(x_ref, w_ref, b_ref, o_ref, acc_ref):
    k = pl.program_id(1)

    @pl.when(k == 0)
    def _():
        acc_ref[...] = jnp.zeros_like(acc_ref)

    x = x_ref[...]                       # loaded ONCE, reused for q/k/v
    for s in range(3):
        acc_ref[s] += jnp.dot(x, w_ref[s], preferred_element_type=jnp.float32)

    @pl.when(k == pl.num_programs(1) - 1)
    def _():
        for s in range(3):
            o_ref[s] = (acc_ref[s] + b_ref[s]).astype(o_ref.dtype)


def dense_qkv(x, w_qkv, b_qkv, tm=512, tk=1024):
    """Fused Q/K/V projection: x:(M,K) @ stacked (3,K,H) -> (3,M,H) bf16.

    2-D grid (M, K): the activation tile is DMA'd once per (i,k) step and
    multiplied against all three stacked weights (no re-read per q/k/v).
    """
    M, K = x.shape
    _, _, H = w_qkv.shape
    tm, tk = _tile(M, tm, 8), _tile(K, tk, 128)
    cost = pl.CostEstimate(
        flops=2 * M * 3 * H * K, transcendentals=0,
        bytes_accessed=2 * (M * K + 3 * K * H + 3 * M * H))
    return pl.pallas_call(
        _dense_qkv_kernel,
        out_shape=jax.ShapeDtypeStruct((3, M, H), jnp.bfloat16),
        grid=(M // tm, K // tk),
        in_specs=[
            pl.BlockSpec((tm, tk), lambda i, k: (i, k)),
            pl.BlockSpec((3, tk, H), lambda i, k: (0, k, 0)),
            pl.BlockSpec((3, 1, H), lambda i, k: (0, 0, 0)),
        ],
        out_specs=pl.BlockSpec((3, tm, H), lambda i, k: (0, i, 0)),
        scratch_shapes=[pltpu.VMEM((3, tm, H), jnp.float32)],
        compiler_params=pltpu.CompilerParams(
            dimension_semantics=("parallel", "arbitrary"),
            vmem_limit_bytes=_vmem_limit()),
        cost_estimate=cost,
    )(x, w_qkv, b_qkv)


def _dense_res_ln_kernel(x_ref, w_ref, b_ref, r_ref, g_ref, bb_ref,
                         o_ref, acc_ref):
    k = pl.program_id(1)

    @pl.when(k == 0)
    def _():
        acc_ref[...] = jnp.zeros_like(acc_ref)

    acc_ref[...] += jnp.dot(x_ref[...], w_ref[...],
                            preferred_element_type=jnp.float32)

    @pl.when(k == pl.num_programs(1) - 1)
    def _():
        h = acc_ref[...] + b_ref[...] + r_ref[...].astype(jnp.float32)
        mu = jnp.mean(h, axis=-1, keepdims=True)
        var = jnp.mean(jnp.square(h - mu), axis=-1, keepdims=True)
        nh = (h - mu) * lax.rsqrt(var + LN_EPS)
        o_ref[...] = (nh * g_ref[...] + bb_ref[...]).astype(o_ref.dtype)


def dense_residual_ln(x, w, b, residual, gamma, beta, tm=512, tk=1024):
    """LayerNorm(x @ w + b + residual): matmul with fused add+LN epilogue.

    Output N-tile spans the full hidden dim so LN statistics are exact.  The
    residual/gamma/beta block indices do not depend on k, so Pallas fetches
    them once per M tile (no re-DMA across the reduction axis).
    """
    M, K = x.shape
    _, H = w.shape
    tm, tk = _tile(M, tm, 8), _tile(K, tk, 128)
    cost = pl.CostEstimate(
        flops=2 * M * H * K + 10 * M * H, transcendentals=0,
        bytes_accessed=2 * (M * K + K * H + 2 * M * H))
    return pl.pallas_call(
        _dense_res_ln_kernel,
        out_shape=jax.ShapeDtypeStruct((M, H), jnp.bfloat16),
        grid=(M // tm, K // tk),
        in_specs=[
            pl.BlockSpec((tm, tk), lambda i, k: (i, k)),
            pl.BlockSpec((tk, H), lambda i, k: (k, 0)),
            pl.BlockSpec((1, H), lambda i, k: (0, 0)),
            pl.BlockSpec((tm, H), lambda i, k: (i, 0)),
            pl.BlockSpec((1, H), lambda i, k: (0, 0)),
            pl.BlockSpec((1, H), lambda i, k: (0, 0)),
        ],
        out_specs=pl.BlockSpec((tm, H), lambda i, k: (i, 0)),
        scratch_shapes=[pltpu.VMEM((tm, H), jnp.float32)],
        compiler_params=pltpu.CompilerParams(
            dimension_semantics=("parallel", "arbitrary"),
            vmem_limit_bytes=_vmem_limit()),
        cost_estimate=cost,
    )(x, w, b.reshape(1, H), residual, gamma.reshape(1, H), beta.reshape(1, H))


# ------------------------- embedding layer-norm ---------------------------- #

def _ln_kernel(x_ref, g_ref, b_ref, o_ref):
    h = x_ref[...].astype(jnp.float32)
    mu = jnp.mean(h, axis=-1, keepdims=True)
    var = jnp.mean(jnp.square(h - mu), axis=-1, keepdims=True)
    nh = (h - mu) * lax.rsqrt(var + LN_EPS)
    o_ref[...] = (nh * g_ref[...] + b_ref[...]).astype(o_ref.dtype)


def layernorm(x, gamma, beta, tm=512):
    M, H = x.shape
    tm = _tile(M, tm, 8)
    return pl.pallas_call(
        _ln_kernel,
        out_shape=jax.ShapeDtypeStruct((M, H), jnp.bfloat16),
        grid=(M // tm,),
        in_specs=[
            pl.BlockSpec((tm, H), lambda i: (i, 0)),
            pl.BlockSpec((1, H), lambda i: (0, 0)),
            pl.BlockSpec((1, H), lambda i: (0, 0)),
        ],
        out_specs=pl.BlockSpec((tm, H), lambda i: (i, 0)),
        compiler_params=pltpu.CompilerParams(
            dimension_semantics=("parallel",),
            vmem_limit_bytes=_vmem_limit()),
    )(x, gamma.reshape(1, H), beta.reshape(1, H))


# ----------------------- flash-style self-attention ------------------------ #

def _flash_attn_kernel(q_ref, k_ref, v_ref, bias_ref, o_ref,
                       m_sc, l_sc, acc_sc, *, n_heads, scale):
    ki = pl.program_id(2)

    @pl.when(ki == 0)
    def _():
        m_sc[...] = jnp.full(m_sc.shape, NEG_INF, jnp.float32)
        l_sc[...] = jnp.zeros_like(l_sc)
        acc_sc[...] = jnp.zeros_like(acc_sc)

    H = q_ref.shape[-1]
    dh = H // n_heads
    bias = bias_ref[0]                              # (1, tkv), f32

    # Softmax scale folded into Q once per grid step (tq*H multiplies instead
    # of n_heads*tq*tkv per kv tile); per-head split via static lane slices.
    q_all = (q_ref[0, 0].astype(jnp.float32) * scale).astype(jnp.bfloat16)
    k_all = k_ref[0, 0]
    v_all = v_ref[0, 0]

    nt_dims = (((1,), (1,)), ((), ()))              # NT: contract last dims
    for h in range(n_heads):
        sl = slice(h * dh, (h + 1) * dh)
        # q @ k^T without materializing a transpose of k.
        s = lax.dot_general(q_all[:, sl], k_all[:, sl], nt_dims,
                            preferred_element_type=jnp.float32)
        s = s + bias                                # (tq, tkv), f32

        m_prev = m_sc[h]                            # (tq, 1)
        m_new = jnp.maximum(m_prev, s.max(axis=-1, keepdims=True))
        alpha = jnp.exp(m_prev - m_new)
        p = jnp.exp(s - m_new)
        l_sc[h] = alpha * l_sc[h] + p.sum(axis=-1, keepdims=True)
        acc_sc[h] = alpha * acc_sc[h] + jnp.dot(
            p.astype(jnp.bfloat16), v_all[:, sl],
            preferred_element_type=jnp.float32)
        m_sc[h] = m_new

    @pl.when(ki == pl.num_programs(2) - 1)
    def _():
        # Write each head's normalized output directly into its lane slice of
        # the output tile (no concatenate epilogue / extra relayout).
        for h in range(n_heads):
            o_ref[0, :, h * dh:(h + 1) * dh] = (
                acc_sc[h] * pl.reciprocal(l_sc[h], approx=True)
            ).astype(o_ref.dtype)


def flash_attention(qkv, attn_bias, n_heads, tq=256, tkv=512):
    """qkv: (3, B, S, H) stacked projections; returns (B, S, H) bf16 context."""
    _, B, S, H = qkv.shape
    dh = H // n_heads
    tq, tkv = _tile(S, tq, 8), _tile(S, tkv, 128)
    kernel = functools.partial(_flash_attn_kernel, n_heads=n_heads,
                               scale=1.0 / math.sqrt(dh))
    cost = pl.CostEstimate(
        flops=4 * B * S * S * H,
        transcendentals=B * n_heads * S * S,
        bytes_accessed=2 * 4 * B * S * H)
    return pl.pallas_call(
        kernel,
        out_shape=jax.ShapeDtypeStruct((B, S, H), jnp.bfloat16),
        grid=(B, S // tq, S // tkv),
        in_specs=[
            pl.BlockSpec((1, 1, tq, H), lambda b, qi, ki: (0, b, qi, 0)),
            pl.BlockSpec((1, 1, tkv, H), lambda b, qi, ki: (1, b, ki, 0)),
            pl.BlockSpec((1, 1, tkv, H), lambda b, qi, ki: (2, b, ki, 0)),
            pl.BlockSpec((1, 1, tkv), lambda b, qi, ki: (b, 0, ki)),
        ],
        out_specs=pl.BlockSpec((1, tq, H), lambda b, qi, ki: (b, qi, 0)),
        scratch_shapes=[
            pltpu.VMEM((n_heads, tq, 1), jnp.float32),   # running max
            pltpu.VMEM((n_heads, tq, 1), jnp.float32),   # running sum
            pltpu.VMEM((n_heads, tq, dh), jnp.float32),  # running output
        ],
        compiler_params=pltpu.CompilerParams(
            dimension_semantics=("parallel", "parallel", "arbitrary"),
            vmem_limit_bytes=_vmem_limit()),
        cost_estimate=cost,
    )(qkv, qkv, qkv, attn_bias)


# ---------------- additional_linear (H -> 1) as a VPU reduction ------------ #

def _cls_score_kernel(x_ref, w_ref, b_ref, o_ref):
    x = x_ref[...].astype(jnp.float32)
    w = w_ref[...].astype(jnp.float32)
    o_ref[...] = (jnp.sum(x * w, axis=-1, keepdims=True)
                  + b_ref[...]).astype(o_ref.dtype)


def cls_score(cls, w, b):
    B, H = cls.shape
    return pl.pallas_call(
        _cls_score_kernel,
        out_shape=jax.ShapeDtypeStruct((B, 1), jnp.float32),
        grid=(1,),
        in_specs=[
            pl.BlockSpec((B, H), lambda i: (0, 0)),
            pl.BlockSpec((1, H), lambda i: (0, 0)),
            pl.BlockSpec((1, 1), lambda i: (0, 0)),
        ],
        out_specs=pl.BlockSpec((B, 1), lambda i: (0, 0)),
        compiler_params=pltpu.CompilerParams(vmem_limit_bytes=_vmem_limit()),
    )(cls, w, b)


# ------------------------- deterministic parameters ------------------------ #

def init_params(key, vocab, max_pos, hidden, n_layers, intermediate, out_dim):
    def norm(k, shape):
        return 0.02 * jax.random.normal(k, shape, dtype=jnp.float32)

    keys = jax.random.split(key, 4 + n_layers)
    params = {
        "word_emb": norm(keys[0], (vocab, hidden)),
        "pos_emb": norm(keys[1], (max_pos, hidden)),
        "type_emb": norm(keys[2], (2, hidden)),
        "emb_ln_g": jnp.ones((hidden,), jnp.float32),
        "emb_ln_b": jnp.zeros((hidden,), jnp.float32),
        # additional_linear (add_linear=True, out_dim=1), stored lane-dense.
        "add_lin_w": norm(keys[3], (out_dim, hidden)).astype(jnp.bfloat16),
        "add_lin_b": jnp.zeros((1, out_dim), jnp.float32),
        "layers": [],
    }
    for l in range(n_layers):
        lk = jax.random.split(keys[4 + l], 6)
        wq = norm(lk[0], (hidden, hidden))
        wk = norm(lk[1], (hidden, hidden))
        wv = norm(lk[2], (hidden, hidden))
        params["layers"].append({
            "w_qkv": jnp.stack([wq, wk, wv]).astype(jnp.bfloat16),  # (3,H,H)
            "b_qkv": jnp.zeros((3, 1, hidden), jnp.float32),
            "wo": norm(lk[3], (hidden, hidden)).astype(jnp.bfloat16),
            "bo": jnp.zeros((hidden,), jnp.float32),
            "attn_ln_g": jnp.ones((hidden,), jnp.float32),
            "attn_ln_b": jnp.zeros((hidden,), jnp.float32),
            "w1": norm(lk[4], (hidden, intermediate)).astype(jnp.bfloat16),
            "b1": jnp.zeros((intermediate,), jnp.float32),
            "w2": norm(lk[5], (intermediate, hidden)).astype(jnp.bfloat16),
            "b2": jnp.zeros((hidden,), jnp.float32),
            "ffn_ln_g": jnp.ones((hidden,), jnp.float32),
            "ffn_ln_b": jnp.zeros((hidden,), jnp.float32),
        })
    return params


# ------------------------------ forward pass ------------------------------- #

@functools.partial(jax.jit, static_argnames=("n_heads",))
def cross_encoder_forward(params, token_idx, segment_idx, mask, n_heads):
    """CrossEncoderModule.forward(token_idx_ctxt, segment_idx_ctxt, mask_ctxt)."""
    B, S = token_idx.shape
    H = params["word_emb"].shape[1]
    M = B * S

    # BERT embeddings (gather is XLA glue); fused LayerNorm in Pallas.
    emb = (jnp.take(params["word_emb"], token_idx, axis=0)
           + params["pos_emb"][None, :S, :]
           + jnp.take(params["type_emb"], segment_idx, axis=0))
    x = layernorm(emb.reshape(M, H), params["emb_ln_g"], params["emb_ln_b"])

    # extended attention mask, as in HF BERT: (1 - mask) * -10000 (f32; the
    # flash kernel keeps all softmax statistics in f32).
    attn_bias = ((1.0 - mask.astype(jnp.float32)) * -10000.0).reshape(B, 1, S)

    n_layers = len(params["layers"])
    cls = None
    for li, layer in enumerate(params["layers"]):
        # --- self attention: fused QKV matmul -> flash attention ---
        qkv = dense_qkv(x, layer["w_qkv"], layer["b_qkv"])        # (3, M, H)
        ctx = flash_attention(qkv.reshape(3, B, S, H), attn_bias, n_heads)

        last = li == n_layers - 1
        if last:
            # Only the [CLS] rows feed the score head: run the final output
            # projection + FFN on the B CLS rows only (identical values,
            # rows of the fused add+LN are independent).
            ctx_rows = ctx[:, 0, :]                               # (B, H)
            res_rows = x.reshape(B, S, H)[:, 0, :]                # (B, H)
        else:
            ctx_rows = ctx.reshape(M, H)
            res_rows = x

        # output projection with fused residual-add + LayerNorm epilogue
        y = dense_residual_ln(ctx_rows, layer["wo"], layer["bo"],
                              res_rows, layer["attn_ln_g"], layer["attn_ln_b"])
        # --- feed forward ---
        h1 = dense(y, layer["w1"], layer["b1"], activation="gelu")
        y = dense_residual_ln(h1, layer["w2"], layer["b2"],
                              y, layer["ffn_ln_g"], layer["ffn_ln_b"])
        if last:
            cls = y                                               # (B, H)
        else:
            x = y

    # layer_pulled = last layer, [CLS] token; dropout(p=0.1) is identity at
    # inference time.
    # TODO(synk): extra_features=None path only; feature concatenation and
    #             out_dim>1 before the additional linear are not exercised.
    logits = cls_score(cls, params["add_lin_w"], params["add_lin_b"])  # (B,1)
    return logits[:, 0]                                   # .squeeze(-1) -> (B,)


# ---------------------------------- main ----------------------------------- #

if __name__ == "__main__":
    B, S, H, N_HEADS, N_LAYERS, INTER, VOCAB, OUT_DIM = 2, 8, 32, 4, 2, 64, 100, 1

    key = jax.random.PRNGKey(0)
    pkey, tkey, skey = jax.random.split(key, 3)

    params = init_params(pkey, VOCAB, S, H, N_LAYERS, INTER, OUT_DIM)

    token_idx_ctxt = jax.random.randint(tkey, (B, S), 0, VOCAB, dtype=jnp.int32)
    segment_idx_ctxt = jax.random.randint(skey, (B, S), 0, 2, dtype=jnp.int32)
    mask_ctxt = jnp.ones((B, S), dtype=jnp.int32).at[:, -2:].set(0)  # padding

    scores = cross_encoder_forward(params, token_idx_ctxt, segment_idx_ctxt,
                                   mask_ctxt, n_heads=N_HEADS)
    scores = jax.block_until_ready(scores)
    assert scores.shape == (B,) and scores.dtype == jnp.float32
    print("KERNEL_OK")
</pallas_src>

<mosaic_0001>
module attributes {stable_mosaic.version = 11 : i64} {
  func.func @_ln_kernel(%arg0: i32, %arg1: memref<16x32xf32, #tpu.memory_space<vmem>>, %arg2: memref<1x32xf32, #tpu.memory_space<vmem>>, %arg3: memref<1x32xf32, #tpu.memory_space<vmem>>, %arg4: memref<16x32xbf16, #tpu.memory_space<vmem>>) attributes {dimension_semantics = [#tpu.dimension_semantics<parallel>], iteration_bounds = array<i64: 1>, scalar_prefetch = 0 : i64, scratch_operands = 0 : i64, tpu.core_type = #tpu.core_type<tc>, window_params = [{transform_indices = @transform_0, window_bounds = array<i64: 16, 32>}, {pipeline_mode = #tpu.pipeline_mode<synchronous>, transform_indices = @transform_1, window_bounds = array<i64: 1, 32>}, {pipeline_mode = #tpu.pipeline_mode<synchronous>, transform_indices = @transform_2, window_bounds = array<i64: 1, 32>}, {transform_indices = @transform_3, window_bounds = array<i64: 16, 32>}]} {
    %c0 = arith.constant 0 : index
    %c0_0 = arith.constant 0 : index
    %0 = vector.load %arg1[%c0, %c0_0] : memref<16x32xf32, #tpu.memory_space<vmem>>, vector<16x32xf32>
    %cst = arith.constant dense<0.000000e+00> : vector<16xf32>
    %1 = vector.multi_reduction <add>, %0, %cst [1] : vector<16x32xf32> to vector<16xf32>
    %2 = vector.shape_cast %1 : vector<16xf32> to vector<16x1xf32>
    %cst_1 = arith.constant 3.200000e+01 : f32
    %3 = vector.broadcast %cst_1 : f32 to vector<16x1xf32>
    %4 = arith.divf %2, %3 : vector<16x1xf32>
    %5 = vector.broadcast %4 : vector<16x1xf32> to vector<16x32xf32>
    %6 = arith.subf %0, %5 : vector<16x32xf32>
    %7 = arith.mulf %6, %6 : vector<16x32xf32>
    %cst_2 = arith.constant dense<0.000000e+00> : vector<16xf32>
    %8 = vector.multi_reduction <add>, %7, %cst_2 [1] : vector<16x32xf32> to vector<16xf32>
    %9 = vector.shape_cast %8 : vector<16xf32> to vector<16x1xf32>
    %cst_3 = arith.constant 3.200000e+01 : f32
    %10 = vector.broadcast %cst_3 : f32 to vector<16x1xf32>
    %11 = arith.divf %9, %10 : vector<16x1xf32>
    %12 = vector.broadcast %4 : vector<16x1xf32> to vector<16x32xf32>
    %13 = arith.subf %0, %12 : vector<16x32xf32>
    %cst_4 = arith.constant 9.99999996E-13 : f32
    %14 = vector.broadcast %cst_4 : f32 to vector<16x1xf32>
    %15 = arith.addf %11, %14 : vector<16x1xf32>
    %16 = math.rsqrt %15 : vector<16x1xf32>
    %17 = vector.broadcast %16 : vector<16x1xf32> to vector<16x32xf32>
    %18 = arith.mulf %13, %17 : vector<16x32xf32>
    %c0_5 = arith.constant 0 : index
    %c0_6 = arith.constant 0 : index
    %19 = vector.load %arg2[%c0_5, %c0_6] : memref<1x32xf32, #tpu.memory_space<vmem>>, vector<1x32xf32>
    %20 = vector.broadcast %19 : vector<1x32xf32> to vector<16x32xf32>
    %21 = arith.mulf %18, %20 : vector<16x32xf32>
    %c0_7 = arith.constant 0 : index
    %c0_8 = arith.constant 0 : index
    %22 = vector.load %arg3[%c0_7, %c0_8] : memref<1x32xf32, #tpu.memory_space<vmem>>, vector<1x32xf32>
    %23 = vector.broadcast %22 : vector<1x32xf32> to vector<16x32xf32>
    %24 = arith.addf %21, %23 : vector<16x32xf32>
    %25 = arith.truncf %24 : vector<16x32xf32> to vector<16x32xbf16>
    %c0_9 = arith.constant 0 : index
    %c0_10 = arith.constant 0 : index
    %26 = vector.load %arg4[%c0_9, %c0_10] : memref<16x32xbf16, #tpu.memory_space<vmem>>, vector<16x32xbf16>
    tpu.vector_store %arg4[%c0_9, %c0_10], %25 {strides = array<i32>} : memref<16x32xbf16, #tpu.memory_space<vmem>>, vector<16x32xbf16>,
    return
  }
  func.func @transform_0(%arg0: i32) -> (i32, i32) {
    %c0_i32 = arith.constant 0 : i32
    %c0_i32_0 = arith.constant 0 : i32
    return %arg0, %c0_i32 : i32, i32
  }
  func.func @transform_1(%arg0: i32) -> (i32, i32) {
    %c0_i32 = arith.constant 0 : i32
    %c0_i32_0 = arith.constant 0 : i32
    %c0_i32_1 = arith.constant 0 : i32
    return %c0_i32, %c0_i32_0 : i32, i32
  }
  func.func @transform_2(%arg0: i32) -> (i32, i32) {
    %c0_i32 = arith.constant 0 : i32
    %c0_i32_0 = arith.constant 0 : i32
    %c0_i32_1 = arith.constant 0 : i32
    return %c0_i32, %c0_i32_0 : i32, i32
  }
  func.func @transform_3(%arg0: i32) -> (i32, i32) {
    %c0_i32 = arith.constant 0 : i32
    %c0_i32_0 = arith.constant 0 : i32
    return %arg0, %c0_i32 : i32, i32
  }
}

module attributes {stable_mosaic.version = 11 : i64} {
  func.func @_dense_res_ln_kernel(%arg0: i32, %arg1: i32, %arg2: memref<16x32xbf16, #tpu.memory_space<vmem>>, %arg3: memref<32x32xbf16, #tpu.memory_space<vmem>>, %arg4: memref<1x32xf32, #tpu.memory_space<vmem>>, %arg5: memref<16x32xbf16, #tpu.memory_space<vmem>>, %arg6: memref<1x32xf32, #tpu.memory_space<vmem>>, %arg7: memref<1x32xf32, #tpu.memory_space<vmem>>, %arg8: memref<16x32xbf16, #tpu.memory_space<vmem>>, %arg9: memref<16x32xf32, #tpu.memory_space<vmem>>) attributes {dimension_semantics = [#tpu.dimension_semantics<parallel>, #tpu.dimension_semantics<arbitrary>], iteration_bounds = array<i64: 1, 1>, scalar_prefetch = 0 : i64, scratch_operands = 1 : i64, tpu.core_type = #tpu.core_type<tc>, window_params = [{transform_indices = @transform_0, window_bounds = array<i64: 16, 32>}, {transform_indices = @transform_1, window_bounds = array<i64: 32, 32>}, {pipeline_mode = #tpu.pipeline_mode<synchronous>, transform_indices = @transform_2, window_bounds = array<i64: 1, 32>}, {transform_indices = @transform_3, window_bounds = array<i64: 16, 32>}, {pipeline_mode = #tpu.pipeline_mode<synchronous>, transform_indices = @transform_4, window_bounds = array<i64: 1, 32>}, {pipeline_mode = #tpu.pipeline_mode<synchronous>, transform_indices = @transform_5, window_bounds = array<i64: 1, 32>}, {transform_indices = @transform_6, window_bounds = array<i64: 16, 32>}]} {
    %c0_i32 = arith.constant 0 : i32
    %0 = arith.cmpi eq, %arg1, %c0_i32 : i32
    %1 = arith.extui %0 : i1 to i32
    %c0_i32_0 = arith.constant 0 : i32
    %2 = arith.cmpi ne, %1, %c0_i32_0 : i32
    scf.if %2 {
      %cst_10 = arith.constant 0.000000e+00 : f32
      %12 = vector.broadcast %cst_10 : f32 to vector<16x32xf32>
      %c0_11 = arith.constant 0 : index
      %c0_12 = arith.constant 0 : index
      %13 = vector.load %arg9[%c0_11, %c0_12] : memref<16x32xf32, #tpu.memory_space<vmem>>, vector<16x32xf32>
      tpu.vector_store %arg9[%c0_11, %c0_12], %12 {strides = array<i32>} : memref<16x32xf32, #tpu.memory_space<vmem>>, vector<16x32xf32>,
    } else {
    }
    %c0 = arith.constant 0 : index
    %c0_1 = arith.constant 0 : index
    %3 = vector.load %arg9[%c0, %c0_1] : memref<16x32xf32, #tpu.memory_space<vmem>>, vector<16x32xf32>
    %c0_2 = arith.constant 0 : index
    %c0_3 = arith.constant 0 : index
    %4 = vector.load %arg2[%c0_2, %c0_3] : memref<16x32xbf16, #tpu.memory_space<vmem>>, vector<16x32xbf16>
    %c0_4 = arith.constant 0 : index
    %c0_5 = arith.constant 0 : index
    %5 = vector.load %arg3[%c0_4, %c0_5] : memref<32x32xbf16, #tpu.memory_space<vmem>>, vector<32x32xbf16>
    %cst = arith.constant dense<0.000000e+00> : vector<16x32xf32>
    %6 = tpu.matmul %4, %5, %cst {dimension_numbers = #tpu.dot_dimension_numbers<[1], [0], [0], [1], [0, 0, 1, 1], [], []>} : vector<16x32xbf16>, vector<32x32xbf16>, vector<16x32xf32> -> vector<16x32xf32>
    %7 = arith.addf %3, %6 : vector<16x32xf32>
    %c0_6 = arith.constant 0 : index
    %c0_7 = arith.constant 0 : index
    %8 = vector.load %arg9[%c0_6, %c0_7] : memref<16x32xf32, #tpu.memory_space<vmem>>, vector<16x32xf32>
    tpu.vector_store %arg9[%c0_6, %c0_7], %7 {strides = array<i32>} : memref<16x32xf32, #tpu.memory_space<vmem>>, vector<16x32xf32>,
    %c0_i32_8 = arith.constant 0 : i32
    %9 = arith.cmpi eq, %arg1, %c0_i32_8 : i32
    %10 = arith.extui %9 : i1 to i32
    %c0_i32_9 = arith.constant 0 : i32
    %11 = arith.cmpi ne, %10, %c0_i32_9 : i32
    scf.if %11 {
      %c0_10 = arith.constant 0 : index
      %c0_11 = arith.constant 0 : index
      %12 = vector.load %arg9[%c0_10, %c0_11] : memref<16x32xf32, #tpu.memory_space<vmem>>, vector<16x32xf32>
      %c0_12 = arith.constant 0 : index
      %c0_13 = arith.constant 0 : index
      %13 = vector.load %arg4[%c0_12, %c0_13] : memref<1x32xf32, #tpu.memory_space<vmem>>, vector<1x32xf32>
      %14 = vector.broadcast %13 : vector<1x32xf32> to vector<16x32xf32>
      %15 = arith.addf %12, %14 : vector<16x32xf32>
      %c0_14 = arith.constant 0 : index
      %c0_15 = arith.constant 0 : index
      %16 = vector.load %arg5[%c0_14, %c0_15] : memref<16x32xbf16, #tpu.memory_space<vmem>>, vector<16x32xbf16>
      %17 = arith.extf %16 : vector<16x32xbf16> to vector<16x32xf32>
      %18 = arith.addf %15, %17 : vector<16x32xf32>
      %cst_16 = arith.constant dense<0.000000e+00> : vector<16xf32>
      %19 = vector.multi_reduction <add>, %18, %cst_16 [1] : vector<16x32xf32> to vector<16xf32>
      %20 = vector.shape_cast %19 : vector<16xf32> to vector<16x1xf32>
      %cst_17 = arith.constant 3.200000e+01 : f32
      %21 = vector.broadcast %cst_17 : f32 to vector<16x1xf32>
      %22 = arith.divf %20, %21 : vector<16x1xf32>
      %23 = vector.broadcast %22 : vector<16x1xf32> to vector<16x32xf32>
      %24 = arith.subf %18, %23 : vector<16x32xf32>
      %25 = arith.mulf %24, %24 : vector<16x32xf32>
      %cst_18 = arith.constant dense<0.000000e+00> : vector<16xf32>
      %26 = vector.multi_reduction <add>, %25, %cst_18 [1] : vector<16x32xf32> to vector<16xf32>
      %27 = vector.shape_cast %26 : vector<16xf32> to vector<16x1xf32>
      %cst_19 = arith.constant 3.200000e+01 : f32
      %28 = vector.broadcast %cst_19 : f32 to vector<16x1xf32>
      %29 = arith.divf %27, %28 : vector<16x1xf32>
      %30 = vector.broadcast %22 : vector<16x1xf32> to vector<16x32xf32>
      %31 = arith.subf %18, %30 : vector<16x32xf32>
      %cst_20 = arith.constant 9.99999996E-13 : f32
      %32 = vector.broadcast %cst_20 : f32 to vector<16x1xf32>
      %33 = arith.addf %29, %32 : vector<16x1xf32>
      %34 = math.rsqrt %33 : vector<16x1xf32>
      %35 = vector.broadcast %34 : vector<16x1xf32> to vector<16x32xf32>
      %36 = arith.mulf %31, %35 : vector<16x32xf32>
      %c0_21 = arith.constant 0 : index
      %c0_22 = arith.constant 0 : index
      %37 = vector.load %arg6[%c0_21, %c0_22] : memref<1x32xf32, #tpu.memory_space<vmem>>, vector<1x32xf32>
      %38 = vector.broadcast %37 : vector<1x32xf32> to vector<16x32xf32>
      %39 = arith.mulf %36, %38 : vector<16x32xf32>
      %c0_23 = arith.constant 0 : index
      %c0_24 = arith.constant 0 : index
      %40 = vector.load %arg7[%c0_23, %c0_24] : memref<1x32xf32, #tpu.memory_space<vmem>>, vector<1x32xf32>
      %41 = vector.broadcast %40 : vector<1x32xf32> to vector<16x32xf32>
      %42 = arith.addf %39, %41 : vector<16x32xf32>
      %43 = arith.truncf %42 : vector<16x32xf32> to vector<16x32xbf16>
      %c0_25 = arith.constant 0 : index
      %c0_26 = arith.constant 0 : index
      %44 = vector.load %arg8[%c0_25, %c0_26] : memref<16x32xbf16, #tpu.memory_space<vmem>>, vector<16x32xbf16>
      tpu.vector_store %arg8[%c0_25, %c0_26], %43 {strides = array<i32>} : memref<16x32xbf16, #tpu.memory_space<vmem>>, vector<16x32xbf16>,
    } else {
    }
    return
  }
  func.func @transform_0(%arg0: i32, %arg1: i32) -> (i32, i32) {
    %c0_i32 = arith.constant 0 : i32
    return %arg0, %arg1 : i32, i32
  }
  func.func @transform_1(%arg0: i32, %arg1: i32) -> (i32, i32) {
    %c0_i32 = arith.constant 0 : i32
    %c0_i32_0 = arith.constant 0 : i32
    return %arg1, %c0_i32 : i32, i32
  }
  func.func @transform_2(%arg0: i32, %arg1: i32) -> (i32, i32) {
    %c0_i32 = arith.constant 0 : i32
    %c0_i32_0 = arith.constant 0 : i32
    %c0_i32_1 = arith.constant 0 : i32
    return %c0_i32, %c0_i32_0 : i32, i32
  }
  func.func @transform_3(%arg0: i32, %arg1: i32) -> (i32, i32) {
    %c0_i32 = arith.constant 0 : i32
    %c0_i32_0 = arith.constant 0 : i32
    return %arg0, %c0_i32 : i32, i32
  }
  func.func @transform_4(%arg0: i32, %arg1: i32) -> (i32, i32) {
    %c0_i32 = arith.constant 0 : i32
    %c0_i32_0 = arith.constant 0 : i32
    %c0_i32_1 = arith.constant 0 : i32
    return %c0_i32, %c0_i32_0 : i32, i32
  }
  func.func @transform_5(%arg0: i32, %arg1: i32) -> (i32, i32) {
    %c0_i32 = arith.constant 0 : i32
    %c0_i32_0 = arith.constant 0 : i32
    %c0_i32_1 = arith.constant 0 : i32
    return %c0_i32, %c0_i32_0 : i32, i32
  }
  func.func @transform_6(%arg0: i32, %arg1: i32) -> (i32, i32) {
    %c0_i32 = arith.constant 0 : i32
    %c0_i32_0 = arith.constant 0 : i32
    return %arg0, %c0_i32 : i32, i32
  }
}

module attributes {stable_mosaic.version = 11 : i64} {
  func.func @_dense_qkv_kernel(%arg0: i32, %arg1: i32, %arg2: memref<16x32xbf16, #tpu.memory_space<vmem>>, %arg3: memref<3x32x32xbf16, #tpu.memory_space<vmem>>, %arg4: memref<3x1x32xf32, #tpu.memory_space<vmem>>, %arg5: memref<3x16x32xbf16, #tpu.memory_space<vmem>>, %arg6: memref<3x16x32xf32, #tpu.memory_space<vmem>>) attributes {dimension_semantics = [#tpu.dimension_semantics<parallel>, #tpu.dimension_semantics<arbitrary>], iteration_bounds = array<i64: 1, 1>, scalar_prefetch = 0 : i64, scratch_operands = 1 : i64, tpu.core_type = #tpu.core_type<tc>, window_params = [{transform_indices = @transform_0, window_bounds = array<i64: 16, 32>}, {transform_indices = @transform_1, window_bounds = array<i64: 3, 32, 32>}, {pipeline_mode = #tpu.pipeline_mode<synchronous>, transform_indices = @transform_2, window_bounds = array<i64: 3, 1, 32>}, {transform_indices = @transform_3, window_bounds = array<i64: 3, 16, 32>}]} {
    %c0_i32 = arith.constant 0 : i32
    %0 = arith.cmpi eq, %arg1, %c0_i32 : i32
    %1 = arith.extui %0 : i1 to i32
    %c0_i32_0 = arith.constant 0 : i32
    %2 = arith.cmpi ne, %1, %c0_i32_0 : i32
    scf.if %2 {
      %cst_31 = arith.constant 0.000000e+00 : f32
      %34 = vector.broadcast %cst_31 : f32 to vector<3x16x32xf32>
      %c0_32 = arith.constant 0 : index
      %c0_33 = arith.constant 0 : index
      %c0_34 = arith.constant 0 : index
      %35 = vector.load %arg6[%c0_32, %c0_33, %c0_34] : memref<3x16x32xf32, #tpu.memory_space<vmem>>, vector<3x16x32xf32>
      tpu.vector_store %arg6[%c0_32, %c0_33, %c0_34], %34 {strides = array<i32>} : memref<3x16x32xf32, #tpu.memory_space<vmem>>, vector<3x16x32xf32>,
    } else {
    }
    %c0 = arith.constant 0 : index
    %c0_1 = arith.constant 0 : index
    %3 = vector.load %arg2[%c0, %c0_1] : memref<16x32xbf16, #tpu.memory_space<vmem>>, vector<16x32xbf16>
    %c0_2 = arith.constant 0 : index
    %c0_3 = arith.constant 0 : index
    %c0_4 = arith.constant 0 : index
    %4 = vector.load %arg6[%c0_2, %c0_3, %c0_4] : memref<3x16x32xf32, #tpu.memory_space<vmem>>, vector<1x16x32xf32>
    %5 = vector.shape_cast %4 : vector<1x16x32xf32> to vector<16x32xf32>
    %c0_5 = arith.constant 0 : index
    %c0_6 = arith.constant 0 : index
    %c0_7 = arith.constant 0 : index
    %6 = vector.load %arg3[%c0_5, %c0_6, %c0_7] : memref<3x32x32xbf16, #tpu.memory_space<vmem>>, vector<1x32x32xbf16>
    %7 = vector.shape_cast %6 : vector<1x32x32xbf16> to vector<32x32xbf16>
    %cst = arith.constant dense<0.000000e+00> : vector<16x32xf32>
    %8 = tpu.matmul %3, %7, %cst {dimension_numbers = #tpu.dot_dimension_numbers<[1], [0], [0], [1], [0, 0, 1, 1], [], []>} : vector<16x32xbf16>, vector<32x32xbf16>, vector<16x32xf32> -> vector<16x32xf32>
    %9 = arith.addf %5, %8 : vector<16x32xf32>
    %c0_8 = arith.constant 0 : index
    %c0_9 = arith.constant 0 : index
    %c0_10 = arith.constant 0 : index
    %10 = vector.load %arg6[%c0_8, %c0_9, %c0_10] : memref<3x16x32xf32, #tpu.memory_space<vmem>>, vector<1x16x32xf32>
    %11 = vector.shape_cast %10 : vector<1x16x32xf32> to vector<16x32xf32>
    %12 = vector.shape_cast %9 : vector<16x32xf32> to vector<1x16x32xf32>
    tpu.vector_store %arg6[%c0_8, %c0_9, %c0_10], %12 {strides = array<i32>} : memref<3x16x32xf32, #tpu.memory_space<vmem>>, vector<1x16x32xf32>,
    %c1 = arith.constant 1 : index
    %c0_11 = arith.constant 0 : index
    %c0_12 = arith.constant 0 : index
    %13 = vector.load %arg6[%c1, %c0_11, %c0_12] : memref<3x16x32xf32, #tpu.memory_space<vmem>>, vector<1x16x32xf32>
    %14 = vector.shape_cast %13 : vector<1x16x32xf32> to vector<16x32xf32>
    %c1_13 = arith.constant 1 : index
    %c0_14 = arith.constant 0 : index
    %c0_15 = arith.constant 0 : index
    %15 = vector.load %arg3[%c1_13, %c0_14, %c0_15] : memref<3x32x32xbf16, #tpu.memory_space<vmem>>, vector<1x32x32xbf16>
    %16 = vector.shape_cast %15 : vector<1x32x32xbf16> to vector<32x32xbf16>
    %cst_16 = arith.constant dense<0.000000e+00> : vector<16x32xf32>
    %17 = tpu.matmul %3, %16, %cst_16 {dimension_numbers = #tpu.dot_dimension_numbers<[1], [0], [0], [1], [0, 0, 1, 1], [], []>} : vector<16x32xbf16>, vector<32x32xbf16>, vector<16x32xf32> -> vector<16x32xf32>
    %18 = arith.addf %14, %17 : vector<16x32xf32>
    %c1_17 = arith.constant 1 : index
    %c0_18 = arith.constant 0 : index
    %c0_19 = arith.constant 0 : index
    %19 = vector.load %arg6[%c1_17, %c0_18, %c0_19] : memref<3x16x32xf32, #tpu.memory_space<vmem>>, vector<1x16x32xf32>
    %20 = vector.shape_cast %19 : vector<1x16x32xf32> to vector<16x32xf32>
    %21 = vector.shape_cast %18 : vector<16x32xf32> to vector<1x16x32xf32>
    tpu.vector_store %arg6[%c1_17, %c0_18, %c0_19], %21 {strides = array<i32>} : memref<3x16x32xf32, #tpu.memory_space<vmem>>, vector<1x16x32xf32>,
    %c2 = arith.constant 2 : index
    %c0_20 = arith.constant 0 : index
    %c0_21 = arith.constant 0 : index
    %22 = vector.load %arg6[%c2, %c0_20, %c0_21] : memref<3x16x32xf32, #tpu.memory_space<vmem>>, vector<1x16x32xf32>
    %23 = vector.shape_cast %22 : vector<1x16x32xf32> to vector<16x32xf32>
    %c2_22 = arith.constant 2 : index
    %c0_23 = arith.constant 0 : index
    %c0_24 = arith.constant 0 : index
    %24 = vector.load %arg3[%c2_22, %c0_23, %c0_24] : memref<3x32x32xbf16, #tpu.memory_space<vmem>>, vector<1x32x32xbf16>
    %25 = vector.shape_cast %24 : vector<1x32x32xbf16> to vector<32x32xbf16>
    %cst_25 = arith.constant dense<0.000000e+00> : vector<16x32xf32>
    %26 = tpu.matmul %3, %25, %cst_25 {dimension_numbers = #tpu.dot_dimension_numbers<[1], [0], [0], [1], [0, 0, 1, 1], [], []>} : vector<16x32xbf16>, vector<32x32xbf16>, vector<16x32xf32> -> vector<16x32xf32>
    %27 = arith.addf %23, %26 : vector<16x32xf32>
    %c2_26 = arith.constant 2 : index
    %c0_27 = arith.constant 0 : index
    %c0_28 = arith.constant 0 : index
    %28 = vector.load %arg6[%c2_26, %c0_27, %c0_28] : memref<3x16x32xf32, #tpu.memory_space<vmem>>, vector<1x16x32xf32>
    %29 = vector.shape_cast %28 : vector<1x16x32xf32> to vector<16x32xf32>
    %30 = vector.shape_cast %27 : vector<16x32xf32> to vector<1x16x32xf32>
    tpu.vector_store %arg6[%c2_26, %c0_27, %c0_28], %30 {strides = array<i32>} : memref<3x16x32xf32, #tpu.memory_space<vmem>>, vector<1x16x32xf32>,
    %c0_i32_29 = arith.constant 0 : i32
    %31 = arith.cmpi eq, %arg1, %c0_i32_29 : i32
    %32 = arith.extui %31 : i1 to i32
    %c0_i32_30 = arith.constant 0 : i32
    %33 = arith.cmpi ne, %32, %c0_i32_30 : i32
    scf.if %33 {
      %c0_31 = arith.constant 0 : index
      %c0_32 = arith.constant 0 : index
      %c0_33 = arith.constant 0 : index
      %34 = vector.load %arg6[%c0_31, %c0_32, %c0_33] : memref<3x16x32xf32, #tpu.memory_space<vmem>>, vector<1x16x32xf32>
      %35 = vector.shape_cast %34 : vector<1x16x32xf32> to vector<16x32xf32>
      %c0_34 = arith.constant 0 : index
      %c0_35 = arith.constant 0 : index
      %c0_36 = arith.constant 0 : index
      %36 = vector.load %arg4[%c0_34, %c0_35, %c0_36] : memref<3x1x32xf32, #tpu.memory_space<vmem>>, vector<1x1x32xf32>
      %37 = vector.shape_cast %36 : vector<1x1x32xf32> to vector<1x32xf32>
      %38 = vector.broadcast %37 : vector<1x32xf32> to vector<16x32xf32>
      %39 = arith.addf %35, %38 : vector<16x32xf32>
      %40 = arith.truncf %39 : vector<16x32xf32> to vector<16x32xbf16>
      %c0_37 = arith.constant 0 : index
      %c0_38 = arith.constant 0 : index
      %c0_39 = arith.constant 0 : index
      %41 = vector.load %arg5[%c0_37, %c0_38, %c0_39] : memref<3x16x32xbf16, #tpu.memory_space<vmem>>, vector<1x16x32xbf16>
      %42 = vector.shape_cast %41 : vector<1x16x32xbf16> to vector<16x32xbf16>
      %43 = vector.shape_cast %40 : vector<16x32xbf16> to vector<1x16x32xbf16>
      tpu.vector_store %arg5[%c0_37, %c0_38, %c0_39], %43 {strides = array<i32>} : memref<3x16x32xbf16, #tpu.memory_space<vmem>>, vector<1x16x32xbf16>,
      %c1_40 = arith.constant 1 : index
      %c0_41 = arith.constant 0 : index
      %c0_42 = arith.constant 0 : index
      %44 = vector.load %arg6[%c1_40, %c0_41, %c0_42] : memref<3x16x32xf32, #tpu.memory_space<vmem>>, vector<1x16x32xf32>
      %45 = vector.shape_cast %44 : vector<1x16x32xf32> to vector<16x32xf32>
      %c1_43 = arith.constant 1 : index
      %c0_44 = arith.constant 0 : index
      %c0_45 = arith.constant 0 : index
      %46 = vector.load %arg4[%c1_43, %c0_44, %c0_45] : memref<3x1x32xf32, #tpu.memory_space<vmem>>, vector<1x1x32xf32>
      %47 = vector.shape_cast %46 : vector<1x1x32xf32> to vector<1x32xf32>
      %48 = vector.broadcast %47 : vector<1x32xf32> to vector<16x32xf32>
      %49 = arith.addf %45, %48 : vector<16x32xf32>
      %50 = arith.truncf %49 : vector<16x32xf32> to vector<16x32xbf16>
      %c1_46 = arith.constant 1 : index
      %c0_47 = arith.constant 0 : index
      %c0_48 = arith.constant 0 : index
      %51 = vector.load %arg5[%c1_46, %c0_47, %c0_48] : memref<3x16x32xbf16, #tpu.memory_space<vmem>>, vector<1x16x32xbf16>
      %52 = vector.shape_cast %51 : vector<1x16x32xbf16> to vector<16x32xbf16>
      %53 = vector.shape_cast %50 : vector<16x32xbf16> to vector<1x16x32xbf16>
      tpu.vector_store %arg5[%c1_46, %c0_47, %c0_48], %53 {strides = array<i32>} : memref<3x16x32xbf16, #tpu.memory_space<vmem>>, vector<1x16x32xbf16>,
      %c2_49 = arith.constant 2 : index
      %c0_50 = arith.constant 0 : index
      %c0_51 = arith.constant 0 : index
      %54 = vector.load %arg6[%c2_49, %c0_50, %c0_51] : memref<3x16x32xf32, #tpu.memory_space<vmem>>, vector<1x16x32xf32>
      %55 = vector.shape_cast %54 : vector<1x16x32xf32> to vector<16x32xf32>
      %c2_52 = arith.constant 2 : index
      %c0_53 = arith.constant 0 : index
      %c0_54 = arith.constant 0 : index
      %56 = vector.load %arg4[%c2_52, %c0_53, %c0_54] : memref<3x1x32xf32, #tpu.memory_space<vmem>>, vector<1x1x32xf32>
      %57 = vector.shape_cast %56 : vector<1x1x32xf32> to vector<1x32xf32>
      %58 = vector.broadcast %57 : vector<1x32xf32> to vector<16x32xf32>
      %59 = arith.addf %55, %58 : vector<16x32xf32>
      %60 = arith.truncf %59 : vector<16x32xf32> to vector<16x32xbf16>
      %c2_55 = arith.constant 2 : index
      %c0_56 = arith.constant 0 : index
      %c0_57 = arith.constant 0 : index
      %61 = vector.load %arg5[%c2_55, %c0_56, %c0_57] : memref<3x16x32xbf16, #tpu.memory_space<vmem>>, vector<1x16x32xbf16>
      %62 = vector.shape_cast %61 : vector<1x16x32xbf16> to vector<16x32xbf16>
      %63 = vector.shape_cast %60 : vector<16x32xbf16> to vector<1x16x32xbf16>
      tpu.vector_store %arg5[%c2_55, %c0_56, %c0_57], %63 {strides = array<i32>} : memref<3x16x32xbf16, #tpu.memory_space<vmem>>, vector<1x16x32xbf16>,
    } else {
    }
    return
  }
  func.func @transform_0(%arg0: i32, %arg1: i32) -> (i32, i32) {
    %c0_i32 = arith.constant 0 : i32
    return %arg0, %arg1 : i32, i32
  }
  func.func @transform_1(%arg0: i32, %arg1: i32) -> (i32, i32, i32) {
    %c0_i32 = arith.constant 0 : i32
    %c0_i32_0 = arith.constant 0 : i32
    %c0_i32_1 = arith.constant 0 : i32
    return %c0_i32, %arg1, %c0_i32_0 : i32, i32, i32
  }
  func.func @transform_2(%arg0: i32, %arg1: i32) -> (i32, i32, i32) {
    %c0_i32 = arith.constant 0 : i32
    %c0_i32_0 = arith.constant 0 : i32
    %c0_i32_1 = arith.constant 0 : i32
    %c0_i32_2 = arith.constant 0 : i32
    return %c0_i32, %c0_i32_0, %c0_i32_1 : i32, i32, i32
  }
  func.func @transform_3(%arg0: i32, %arg1: i32) -> (i32, i32, i32) {
    %c0_i32 = arith.constant 0 : i32
    %c0_i32_0 = arith.constant 0 : i32
    %c0_i32_1 = arith.constant 0 : i32
    return %c0_i32, %arg0, %c0_i32_0 : i32, i32, i32
  }
}

module attributes {stable_mosaic.version = 11 : i64} {
  func.func @_flash_attn_kernel(%arg0: i32, %arg1: i32, %arg2: i32, %arg3: memref<1x1x8x32xbf16, #tpu.memory_space<vmem>>, %arg4: memref<1x1x8x32xbf16, #tpu.memory_space<vmem>>, %arg5: memref<1x1x8x32xbf16, #tpu.memory_space<vmem>>, %arg6: memref<1x1x8xf32, #tpu.memory_space<vmem>>, %arg7: memref<1x8x32xbf16, #tpu.memory_space<vmem>>, %arg8: memref<4x8x1xf32, #tpu.memory_space<vmem>>, %arg9: memref<4x8x1xf32, #tpu.memory_space<vmem>>, %arg10: memref<4x8x8xf32, #tpu.memory_space<vmem>>) attributes {dimension_semantics = [#tpu.dimension_semantics<parallel>, #tpu.dimension_semantics<parallel>, #tpu.dimension_semantics<arbitrary>], iteration_bounds = array<i64: 2, 1, 1>, scalar_prefetch = 0 : i64, scratch_operands = 3 : i64, tpu.core_type = #tpu.core_type<tc>, window_params = [{transform_indices = @transform_0, window_bounds = array<i64: 1, 1, 8, 32>}, {transform_indices = @transform_1, window_bounds = array<i64: 1, 1, 8, 32>}, {transform_indices = @transform_2, window_bounds = array<i64: 1, 1, 8, 32>}, {transform_indices = @transform_3, window_bounds = array<i64: 1, 1, 8>}, {transform_indices = @transform_4, window_bounds = array<i64: 1, 8, 32>}]} {
    %c0_i32 = arith.constant 0 : i32
    %0 = arith.cmpi eq, %arg2, %c0_i32 : i32
    %1 = arith.extui %0 : i1 to i32
    %c0_i32_0 = arith.constant 0 : i32
    %2 = arith.cmpi ne, %1, %c0_i32_0 : i32
    scf.if %2 {
      %cst_102 = arith.constant -1.000000e+30 : f32
      %170 = vector.broadcast %cst_102 : f32 to vector<4x8x1xf32>
      %c0_103 = arith.constant 0 : index
      %c0_104 = arith.constant 0 : index
      %c0_105 = arith.constant 0 : index
      %171 = vector.load %arg8[%c0_103, %c0_104, %c0_105] : memref<4x8x1xf32, #tpu.memory_space<vmem>>, vector<4x8x1xf32>
      tpu.vector_store %arg8[%c0_103, %c0_104, %c0_105], %170 {strides = array<i32>} : memref<4x8x1xf32, #tpu.memory_space<vmem>>, vector<4x8x1xf32>,
      %cst_106 = arith.constant 0.000000e+00 : f32
      %172 = vector.broadcast %cst_106 : f32 to vector<4x8x1xf32>
      %c0_107 = arith.constant 0 : index
      %c0_108 = arith.constant 0 : index
      %c0_109 = arith.constant 0 : index
      %173 = vector.load %arg9[%c0_107, %c0_108, %c0_109] : memref<4x8x1xf32, #tpu.memory_space<vmem>>, vector<4x8x1xf32>
      tpu.vector_store %arg9[%c0_107, %c0_108, %c0_109], %172 {strides = array<i32>} : memref<4x8x1xf32, #tpu.memory_space<vmem>>, vector<4x8x1xf32>,
      %cst_110 = arith.constant 0.000000e+00 : f32
      %174 = vector.broadcast %cst_110 : f32 to vector<4x8x8xf32>
      %c0_111 = arith.constant 0 : index
      %c0_112 = arith.constant 0 : index
      %c0_113 = arith.constant 0 : index
      %175 = vector.load %arg10[%c0_111, %c0_112, %c0_113] : memref<4x8x8xf32, #tpu.memory_space<vmem>>, vector<4x8x8xf32>
      tpu.vector_store %arg10[%c0_111, %c0_112, %c0_113], %174 {strides = array<i32>} : memref<4x8x8xf32, #tpu.memory_space<vmem>>, vector<4x8x8xf32>,
    } else {
    }
    %c0 = arith.constant 0 : index
    %c0_1 = arith.constant 0 : index
    %c0_2 = arith.constant 0 : index
    %3 = vector.load %arg6[%c0, %c0_1, %c0_2] : memref<1x1x8xf32, #tpu.memory_space<vmem>>, vector<1x1x8xf32>
    %4 = vector.shape_cast %3 : vector<1x1x8xf32> to vector<1x8xf32>
    %c0_3 = arith.constant 0 : index
    %c0_4 = arith.constant 0 : index
    %c0_5 = arith.constant 0 : index
    %c0_6 = arith.constant 0 : index
    %5 = vector.load %arg3[%c0_3, %c0_4, %c0_5, %c0_6] : memref<1x1x8x32xbf16, #tpu.memory_space<vmem>>, vector<1x1x8x32xbf16>
    %6 = vector.shape_cast %5 : vector<1x1x8x32xbf16> to vector<8x32xbf16>
    %7 = arith.extf %6 : vector<8x32xbf16> to vector<8x32xf32>
    %cst = arith.constant 0.353553385 : f32
    %8 = vector.broadcast %cst : f32 to vector<8x32xf32>
    %9 = arith.mulf %7, %8 : vector<8x32xf32>
    %10 = arith.truncf %9 : vector<8x32xf32> to vector<8x32xbf16>
    %c0_7 = arith.constant 0 : index
    %c0_8 = arith.constant 0 : index
    %c0_9 = arith.constant 0 : index
    %c0_10 = arith.constant 0 : index
    %11 = vector.load %arg4[%c0_7, %c0_8, %c0_9, %c0_10] : memref<1x1x8x32xbf16, #tpu.memory_space<vmem>>, vector<1x1x8x32xbf16>
    %12 = vector.shape_cast %11 : vector<1x1x8x32xbf16> to vector<8x32xbf16>
    %c0_11 = arith.constant 0 : index
    %c0_12 = arith.constant 0 : index
    %c0_13 = arith.constant 0 : index
    %c0_14 = arith.constant 0 : index
    %13 = vector.load %arg5[%c0_11, %c0_12, %c0_13, %c0_14] : memref<1x1x8x32xbf16, #tpu.memory_space<vmem>>, vector<1x1x8x32xbf16>
    %14 = vector.shape_cast %13 : vector<1x1x8x32xbf16> to vector<8x32xbf16>
    %15 = vector.extract_strided_slice %10 {offsets = [0, 0], sizes = [8, 8], strides = [1, 1]} : vector<8x32xbf16> to vector<8x8xbf16>
    %16 = vector.extract_strided_slice %12 {offsets = [0, 0], sizes = [8, 8], strides = [1, 1]} : vector<8x32xbf16> to vector<8x8xbf16>
    %cst_15 = arith.constant dense<0.000000e+00> : vector<8x8xf32>
    %17 = tpu.matmul %15, %16, %cst_15 {dimension_numbers = #tpu.dot_dimension_numbers<[1], [1], [0], [0], [0, 0, 1, 0], [], []>} : vector<8x8xbf16>, vector<8x8xbf16>, vector<8x8xf32> -> vector<8x8xf32>
    %18 = vector.broadcast %4 : vector<1x8xf32> to vector<8x8xf32>
    %19 = arith.addf %17, %18 : vector<8x8xf32>
    %c0_16 = arith.constant 0 : index
    %c0_17 = arith.constant 0 : index
    %c0_18 = arith.constant 0 : index
    %20 = vector.load %arg8[%c0_16, %c0_17, %c0_18] : memref<4x8x1xf32, #tpu.memory_space<vmem>>, vector<1x8x1xf32>
    %21 = vector.shape_cast %20 : vector<1x8x1xf32> to vector<8x1xf32>
    %cst_19 = arith.constant dense<0xFF800000> : vector<8xf32>
    %22 = vector.multi_reduction <maximumf>, %19, %cst_19 [1] : vector<8x8xf32> to vector<8xf32>
    %23 = vector.shape_cast %22 : vector<8xf32> to vector<8x1xf32>
    %24 = arith.maximumf %21, %23 : vector<8x1xf32>
    %25 = arith.subf %21, %24 : vector<8x1xf32>
    %26 = math.exp %25 : vector<8x1xf32>
    %27 = vector.broadcast %24 : vector<8x1xf32> to vector<8x8xf32>
    %28 = arith.subf %19, %27 : vector<8x8xf32>
    %29 = math.exp %28 : vector<8x8xf32>
    %c0_20 = arith.constant 0 : index
    %c0_21 = arith.constant 0 : index
    %c0_22 = arith.constant 0 : index
    %30 = vector.load %arg9[%c0_20, %c0_21, %c0_22] : memref<4x8x1xf32, #tpu.memory_space<vmem>>, vector<1x8x1xf32>
    %31 = vector.shape_cast %30 : vector<1x8x1xf32> to vector<8x1xf32>
    %32 = arith.mulf %26, %31 : vector<8x1xf32>
    %cst_23 = arith.constant dense<0.000000e+00> : vector<8xf32>
    %33 = vector.multi_reduction <add>, %29, %cst_23 [1] : vector<8x8xf32> to vector<8xf32>
    %34 = vector.shape_cast %33 : vector<8xf32> to vector<8x1xf32>
    %35 = arith.addf %32, %34 : vector<8x1xf32>
    %c0_24 = arith.constant 0 : index
    %c0_25 = arith.constant 0 : index
    %c0_26 = arith.constant 0 : index
    %36 = vector.load %arg9[%c0_24, %c0_25, %c0_26] : memref<4x8x1xf32, #tpu.memory_space<vmem>>, vector<1x8x1xf32>
    %37 = vector.shape_cast %36 : vector<1x8x1xf32> to vector<8x1xf32>
    %38 = vector.shape_cast %35 : vector<8x1xf32> to vector<1x8x1xf32>
    tpu.vector_store %arg9[%c0_24, %c0_25, %c0_26], %38 {strides = array<i32>} : memref<4x8x1xf32, #tpu.memory_space<vmem>>, vector<1x8x1xf32>,
    %c0_27 = arith.constant 0 : index
    %c0_28 = arith.constant 0 : index
    %c0_29 = arith.constant 0 : index
    %39 = vector.load %arg10[%c0_27, %c0_28, %c0_29] : memref<4x8x8xf32, #tpu.memory_space<vmem>>, vector<1x8x8xf32>
    %40 = vector.shape_cast %39 : vector<1x8x8xf32> to vector<8x8xf32>
    %41 = vector.broadcast %26 : vector<8x1xf32> to vector<8x8xf32>
    %42 = arith.mulf %41, %40 : vector<8x8xf32>
    %43 = arith.truncf %29 : vector<8x8xf32> to vector<8x8xbf16>
    %44 = vector.extract_strided_slice %14 {offsets = [0, 0], sizes = [8, 8], strides = [1, 1]} : vector<8x32xbf16> to vector<8x8xbf16>
    %cst_30 = arith.constant dense<0.000000e+00> : vector<8x8xf32>
    %45 = tpu.matmul %43, %44, %cst_30 {dimension_numbers = #tpu.dot_dimension_numbers<[1], [0], [0], [1], [0, 0, 1, 1], [], []>} : vector<8x8xbf16>, vector<8x8xbf16>, vector<8x8xf32> -> vector<8x8xf32>
    %46 = arith.addf %42, %45 : vector<8x8xf32>
    %c0_31 = arith.constant 0 : index
    %c0_32 = arith.constant 0 : index
    %c0_33 = arith.constant 0 : index
    %47 = vector.load %arg10[%c0_31, %c0_32, %c0_33] : memref<4x8x8xf32, #tpu.memory_space<vmem>>, vector<1x8x8xf32>
    %48 = vector.shape_cast %47 : vector<1x8x8xf32> to vector<8x8xf32>
    %49 = vector.shape_cast %46 : vector<8x8xf32> to vector<1x8x8xf32>
    tpu.vector_store %arg10[%c0_31, %c0_32, %c0_33], %49 {strides = array<i32>} : memref<4x8x8xf32, #tpu.memory_space<vmem>>, vector<1x8x8xf32>,
    %c0_34 = arith.constant 0 : index
    %c0_35 = arith.constant 0 : index
    %c0_36 = arith.constant 0 : index
    %50 = vector.load %arg8[%c0_34, %c0_35, %c0_36] : memref<4x8x1xf32, #tpu.memory_space<vmem>>, vector<1x8x1xf32>
    %51 = vector.shape_cast %50 : vector<1x8x1xf32> to vector<8x1xf32>
    %52 = vector.shape_cast %24 : vector<8x1xf32> to vector<1x8x1xf32>
    tpu.vector_store %arg8[%c0_34, %c0_35, %c0_36], %52 {strides = array<i32>} : memref<4x8x1xf32, #tpu.memory_space<vmem>>, vector<1x8x1xf32>,
    %53 = vector.extract_strided_slice %10 {offsets = [0, 8], sizes = [8, 8], strides = [1, 1]} : vector<8x32xbf16> to vector<8x8xbf16>
    %54 = vector.extract_strided_slice %12 {offsets = [0, 8], sizes = [8, 8], strides = [1, 1]} : vector<8x32xbf16> to vector<8x8xbf16>
    %cst_37 = arith.constant dense<0.000000e+00> : vector<8x8xf32>
    %55 = tpu.matmul %53, %54, %cst_37 {dimension_numbers = #tpu.dot_dimension_numbers<[1], [1], [0], [0], [0, 0, 1, 0], [], []>} : vector<8x8xbf16>, vector<8x8xbf16>, vector<8x8xf32> -> vector<8x8xf32>
    %56 = vector.broadcast %4 : vector<1x8xf32> to vector<8x8xf32>
    %57 = arith.addf %55, %56 : vector<8x8xf32>
    %c1 = arith.constant 1 : index
    %c0_38 = arith.constant 0 : index
    %c0_39 = arith.constant 0 : index
    %58 = vector.load %arg8[%c1, %c0_38, %c0_39] : memref<4x8x1xf32, #tpu.memory_space<vmem>>, vector<1x8x1xf32>
    %59 = vector.shape_cast %58 : vector<1x8x1xf32> to vector<8x1xf32>
    %cst_40 = arith.constant dense<0xFF800000> : vector<8xf32>
    %60 = vector.multi_reduction <maximumf>, %57, %cst_40 [1] : vector<8x8xf32> to vector<8xf32>
    %61 = vector.shape_cast %60 : vector<8xf32> to vector<8x1xf32>
    %62 = arith.maximumf %59, %61 : vector<8x1xf32>
    %63 = arith.subf %59, %62 : vector<8x1xf32>
    %64 = math.exp %63 : vector<8x1xf32>
    %65 = vector.broadcast %62 : vector<8x1xf32> to vector<8x8xf32>
    %66 = arith.subf %57, %65 : vector<8x8xf32>
    %67 = math.exp %66 : vector<8x8xf32>
    %c1_41 = arith.constant 1 : index
    %c0_42 = arith.constant 0 : index
    %c0_43 = arith.constant 0 : index
    %68 = vector.load %arg9[%c1_41, %c0_42, %c0_43] : memref<4x8x1xf32, #tpu.memory_space<vmem>>, vector<1x8x1xf32>
    %69 = vector.shape_cast %68 : vector<1x8x1xf32> to vector<8x1xf32>
    %70 = arith.mulf %64, %69 : vector<8x1xf32>
    %cst_44 = arith.constant dense<0.000000e+00> : vector<8xf32>
    %71 = vector.multi_reduction <add>, %67, %cst_44 [1] : vector<8x8xf32> to vector<8xf32>
    %72 = vector.shape_cast %71 : vector<8xf32> to vector<8x1xf32>
    %73 = arith.addf %70, %72 : vector<8x1xf32>
    %c1_45 = arith.constant 1 : index
    %c0_46 = arith.constant 0 : index
    %c0_47 = arith.constant 0 : index
    %74 = vector.load %arg9[%c1_45, %c0_46, %c0_47] : memref<4x8x1xf32, #tpu.memory_space<vmem>>, vector<1x8x1xf32>
    %75 = vector.shape_cast %74 : vector<1x8x1xf32> to vector<8x1xf32>
    %76 = vector.shape_cast %73 : vector<8x1xf32> to vector<1x8x1xf32>
    tpu.vector_store %arg9[%c1_45, %c0_46, %c0_47], %76 {strides = array<i32>} : memref<4x8x1xf32, #tpu.memory_space<vmem>>, vector<1x8x1xf32>,
    %c1_48 = arith.constant 1 : index
    %c0_49 = arith.constant 0 : index
    %c0_50 = arith.constant 0 : index
    %77 = vector.load %arg10[%c1_48, %c0_49, %c0_50] : memref<4x8x8xf32, #tpu.memory_space<vmem>>, vector<1x8x8xf32>
    %78 = vector.shape_cast %77 : vector<1x8x8xf32> to vector<8x8xf32>
    %79 = vector.broadcast %64 : vector<8x1xf32> to vector<8x8xf32>
    %80 = arith.mulf %79, %78 : vector<8x8xf32>
    %81 = arith.truncf %67 : vector<8x8xf32> to vector<8x8xbf16>
    %82 = vector.extract_strided_slice %14 {offsets = [0, 8], sizes = [8, 8], strides = [1, 1]} : vector<8x32xbf16> to vector<8x8xbf16>
    %cst_51 = arith.constant dense<0.000000e+00> : vector<8x8xf32>
    %83 = tpu.matmul %81, %82, %cst_51 {dimension_numbers = #tpu.dot_dimension_numbers<[1], [0], [0], [1], [0, 0, 1, 1], [], []>} : vector<8x8xbf16>, vector<8x8xbf16>, vector<8x8xf32> -> vector<8x8xf32>
    %84 = arith.addf %80, %83 : vector<8x8xf32>
    %c1_52 = arith.constant 1 : index
    %c0_53 = arith.constant 0 : index
    %c0_54 = arith.constant 0 : index
    %85 = vector.load %arg10[%c1_52, %c0_53, %c0_54] : memref<4x8x8xf32, #tpu.memory_space<vmem>>, vector<1x8x8xf32>
    %86 = vector.shape_cast %85 : vector<1x8x8xf32> to vector<8x8xf32>
    %87 = vector.shape_cast %84 : vector<8x8xf32> to vector<1x8x8xf32>
    tpu.vector_store %arg10[%c1_52, %c0_53, %c0_54], %87 {strides = array<i32>} : memref<4x8x8xf32, #tpu.memory_space<vmem>>, vector<1x8x8xf32>,
    %c1_55 = arith.constant 1 : index
    %c0_56 = arith.constant 0 : index
    %c0_57 = arith.constant 0 : index
    %88 = vector.load %arg8[%c1_55, %c0_56, %c0_57] : memref<4x8x1xf32, #tpu.memory_space<vmem>>, vector<1x8x1xf32>
    %89 = vector.shape_cast %88 : vector<1x8x1xf32> to vector<8x1xf32>
    %90 = vector.shape_cast %62 : vector<8x1xf32> to vector<1x8x1xf32>
    tpu.vector_store %arg8[%c1_55, %c0_56, %c0_57], %90 {strides = array<i32>} : memref<4x8x1xf32, #tpu.memory_space<vmem>>, vector<1x8x1xf32>,
    %91 = vector.extract_strided_slice %10 {offsets = [0, 16], sizes = [8, 8], strides = [1, 1]} : vector<8x32xbf16> to vector<8x8xbf16>
    %92 = vector.extract_strided_slice %12 {offsets = [0, 16], sizes = [8, 8], strides = [1, 1]} : vector<8x32xbf16> to vector<8x8xbf16>
    %cst_58 = arith.constant dense<0.000000e+00> : vector<8x8xf32>
    %93 = tpu.matmul %91, %92, %cst_58 {dimension_numbers = #tpu.dot_dimension_numbers<[1], [1], [0], [0], [0, 0, 1, 0], [], []>} : vector<8x8xbf16>, vector<8x8xbf16>, vector<8x8xf32> -> vector<8x8xf32>
    %94 = vector.broadcast %4 : vector<1x8xf32> to vector<8x8xf32>
    %95 = arith.addf %93, %94 : vector<8x8xf32>
    %c2 = arith.constant 2 : index
    %c0_59 = arith.constant 0 : index
    %c0_60 = arith.constant 0 : index
    %96 = vector.load %arg8[%c2, %c0_59, %c0_60] : memref<4x8x1xf32, #tpu.memory_space<vmem>>, vector<1x8x1xf32>
    %97 = vector.shape_cast %96 : vector<1x8x1xf32> to vector<8x1xf32>
    %cst_61 = arith.constant dense<0xFF800000> : vector<8xf32>
    %98 = vector.multi_reduction <maximumf>, %95, %cst_61 [1] : vector<8x8xf32> to vector<8xf32>
    %99 = vector.shape_cast %98 : vector<8xf32> to vector<8x1xf32>
    %100 = arith.maximumf %97, %99 : vector<8x1xf32>
    %101 = arith.subf %97, %100 : vector<8x1xf32>
    %102 = math.exp %101 : vector<8x1xf32>
    %103 = vector.broadcast %100 : vector<8x1xf32> to vector<8x8xf32>
    %104 = arith.subf %95, %103 : vector<8x8xf32>
    %105 = math.exp %104 : vector<8x8xf32>
    %c2_62 = arith.constant 2 : index
    %c0_63 = arith.constant 0 : index
    %c0_64 = arith.constant 0 : index
    %106 = vector.load %arg9[%c2_62, %c0_63, %c0_64] : memref<4x8x1xf32, #tpu.memory_space<vmem>>, vector<1x8x1xf32>
    %107 = vector.shape_cast %106 : vector<1x8x1xf32> to vector<8x1xf32>
    %108 = arith.mulf %102, %107 : vector<8x1xf32>
    %cst_65 = arith.constant dense<0.000000e+00> : vector<8xf32>
    %109 = vector.multi_reduction <add>, %105, %cst_65 [1] : vector<8x8xf32> to vector<8xf32>
    %110 = vector.shape_cast %109 : vector<8xf32> to vector<8x1xf32>
    %111 = arith.addf %108, %110 : vector<8x1xf32>
    %c2_66 = arith.constant 2 : index
    %c0_67 = arith.constant 0 : index
    %c0_68 = arith.constant 0 : index
    %112 = vector.load %arg9[%c2_66, %c0_67, %c0_68] : memref<4x8x1xf32, #tpu.memory_space<vmem>>, vector<1x8x1xf32>
    %113 = vector.shape_cast %112 : vector<1x8x1xf32> to vector<8x1xf32>
    %114 = vector.shape_cast %111 : vector<8x1xf32> to vector<1x8x1xf32>
    tpu.vector_store %arg9[%c2_66, %c0_67, %c0_68], %114 {strides = array<i32>} : memref<4x8x1xf32, #tpu.memory_space<vmem>>, vector<1x8x1xf32>,
    %c2_69 = arith.constant 2 : index
    %c0_70 = arith.constant 0 : index
    %c0_71 = arith.constant 0 : index
    %115 = vector.load %arg10[%c2_69, %c0_70, %c0_71] : memref<4x8x8xf32, #tpu.memory_space<vmem>>, vector<1x8x8xf32>
    %116 = vector.shape_cast %115 : vector<1x8x8xf32> to vector<8x8xf32>
    %117 = vector.broadcast %102 : vector<8x1xf32> to vector<8x8xf32>
    %118 = arith.mulf %117, %116 : vector<8x8xf32>
    %119 = arith.truncf %105 : vector<8x8xf32> to vector<8x8xbf16>
    %120 = vector.extract_strided_slice %14 {offsets = [0, 16], sizes = [8, 8], strides = [1, 1]} : vector<8x32xbf16> to vector<8x8xbf16>
    %cst_72 = arith.constant dense<0.000000e+00> : vector<8x8xf32>
    %121 = tpu.matmul %119, %120, %cst_72 {dimension_numbers = #tpu.dot_dimension_numbers<[1], [0], [0], [1], [0, 0, 1, 1], [], []>} : vector<8x8xbf16>, vector<8x8xbf16>, vector<8x8xf32> -> vector<8x8xf32>
    %122 = arith.addf %118, %121 : vector<8x8xf32>
    %c2_73 = arith.constant 2 : index
    %c0_74 = arith.constant 0 : index
    %c0_75 = arith.constant 0 : index
    %123 = vector.load %arg10[%c2_73, %c0_74, %c0_75] : memref<4x8x8xf32, #tpu.memory_space<vmem>>, vector<1x8x8xf32>
    %124 = vector.shape_cast %123 : vector<1x8x8xf32> to vector<8x8xf32>
    %125 = vector.shape_cast %122 : vector<8x8xf32> to vector<1x8x8xf32>
    tpu.vector_store %arg10[%c2_73, %c0_74, %c0_75], %125 {strides = array<i32>} : memref<4x8x8xf32, #tpu.memory_space<vmem>>, vector<1x8x8xf32>,
    %c2_76 = arith.constant 2 : index
    %c0_77 = arith.constant 0 : index
    %c0_78 = arith.constant 0 : index
    %126 = vector.load %arg8[%c2_76, %c0_77, %c0_78] : memref<4x8x1xf32, #tpu.memory_space<vmem>>, vector<1x8x1xf32>
    %127 = vector.shape_cast %126 : vector<1x8x1xf32> to vector<8x1xf32>
    %128 = vector.shape_cast %100 : vector<8x1xf32> to vector<1x8x1xf32>
    tpu.vector_store %arg8[%c2_76, %c0_77, %c0_78], %128 {strides = array<i32>} : memref<4x8x1xf32, #tpu.memory_space<vmem>>, vector<1x8x1xf32>,
    %129 = vector.extract_strided_slice %10 {offsets = [0, 24], sizes = [8, 8], strides = [1, 1]} : vector<8x32xbf16> to vector<8x8xbf16>
    %130 = vector.extract_strided_slice %12 {offsets = [0, 24], sizes = [8, 8], strides = [1, 1]} : vector<8x32xbf16> to vector<8x8xbf16>
    %cst_79 = arith.constant dense<0.000000e+00> : vector<8x8xf32>
    %131 = tpu.matmul %129, %130, %cst_79 {dimension_numbers = #tpu.dot_dimension_numbers<[1], [1], [0], [0], [0, 0, 1, 0], [], []>} : vector<8x8xbf16>, vector<8x8xbf16>, vector<8x8xf32> -> vector<8x8xf32>
    %132 = vector.broadcast %4 : vector<1x8xf32> to vector<8x8xf32>
    %133 = arith.addf %131, %132 : vector<8x8xf32>
    %c3 = arith.constant 3 : index
    %c0_80 = arith.constant 0 : index
    %c0_81 = arith.constant 0 : index
    %134 = vector.load %arg8[%c3, %c0_80, %c0_81] : memref<4x8x1xf32, #tpu.memory_space<vmem>>, vector<1x8x1xf32>
    %135 = vector.shape_cast %134 : vector<1x8x1xf32> to vector<8x1xf32>
    %cst_82 = arith.constant dense<0xFF800000> : vector<8xf32>
    %136 = vector.multi_reduction <maximumf>, %133, %cst_82 [1] : vector<8x8xf32> to vector<8xf32>
    %137 = vector.shape_cast %136 : vector<8xf32> to vector<8x1xf32>
    %138 = arith.maximumf %135, %137 : vector<8x1xf32>
    %139 = arith.subf %135, %138 : vector<8x1xf32>
    %140 = math.exp %139 : vector<8x1xf32>
    %141 = vector.broadcast %138 : vector<8x1xf32> to vector<8x8xf32>
    %142 = arith.subf %133, %141 : vector<8x8xf32>
    %143 = math.exp %142 : vector<8x8xf32>
    %c3_83 = arith.constant 3 : index
    %c0_84 = arith.constant 0 : index
    %c0_85 = arith.constant 0 : index
    %144 = vector.load %arg9[%c3_83, %c0_84, %c0_85] : memref<4x8x1xf32, #tpu.memory_space<vmem>>, vector<1x8x1xf32>
    %145 = vector.shape_cast %144 : vector<1x8x1xf32> to vector<8x1xf32>
    %146 = arith.mulf %140, %145 : vector<8x1xf32>
    %cst_86 = arith.constant dense<0.000000e+00> : vector<8xf32>
    %147 = vector.multi_reduction <add>, %143, %cst_86 [1] : vector<8x8xf32> to vector<8xf32>
    %148 = vector.shape_cast %147 : vector<8xf32> to vector<8x1xf32>
    %149 = arith.addf %146, %148 : vector<8x1xf32>
    %c3_87 = arith.constant 3 : index
    %c0_88 = arith.constant 0 : index
    %c0_89 = arith.constant 0 : index
    %150 = vector.load %arg9[%c3_87, %c0_88, %c0_89] : memref<4x8x1xf32, #tpu.memory_space<vmem>>, vector<1x8x1xf32>
    %151 = vector.shape_cast %150 : vector<1x8x1xf32> to vector<8x1xf32>
    %152 = vector.shape_cast %149 : vector<8x1xf32> to vector<1x8x1xf32>
    tpu.vector_store %arg9[%c3_87, %c0_88, %c0_89], %152 {strides = array<i32>} : memref<4x8x1xf32, #tpu.memory_space<vmem>>, vector<1x8x1xf32>,
    %c3_90 = arith.constant 3 : index
    %c0_91 = arith.constant 0 : index
    %c0_92 = arith.constant 0 : index
    %153 = vector.load %arg10[%c3_90, %c0_91, %c0_92] : memref<4x8x8xf32, #tpu.memory_space<vmem>>, vector<1x8x8xf32>
    %154 = vector.shape_cast %153 : vector<1x8x8xf32> to vector<8x8xf32>
    %155 = vector.broadcast %140 : vector<8x1xf32> to vector<8x8xf32>
    %156 = arith.mulf %155, %154 : vector<8x8xf32>
    %157 = arith.truncf %143 : vector<8x8xf32> to vector<8x8xbf16>
    %158 = vector.extract_strided_slice %14 {offsets = [0, 24], sizes = [8, 8], strides = [1, 1]} : vector<8x32xbf16> to vector<8x8xbf16>
    %cst_93 = arith.constant dense<0.000000e+00> : vector<8x8xf32>
    %159 = tpu.matmul %157, %158, %cst_93 {dimension_numbers = #tpu.dot_dimension_numbers<[1], [0], [0], [1], [0, 0, 1, 1], [], []>} : vector<8x8xbf16>, vector<8x8xbf16>, vector<8x8xf32> -> vector<8x8xf32>
    %160 = arith.addf %156, %159 : vector<8x8xf32>
    %c3_94 = arith.constant 3 : index
    %c0_95 = arith.constant 0 : index
    %c0_96 = arith.constant 0 : index
    %161 = vector.load %arg10[%c3_94, %c0_95, %c0_96] : memref<4x8x8xf32, #tpu.memory_space<vmem>>, vector<1x8x8xf32>
    %162 = vector.shape_cast %161 : vector<1x8x8xf32> to vector<8x8xf32>
    %163 = vector.shape_cast %160 : vector<8x8xf32> to vector<1x8x8xf32>
    tpu.vector_store %arg10[%c3_94, %c0_95, %c0_96], %163 {strides = array<i32>} : memref<4x8x8xf32, #tpu.memory_space<vmem>>, vector<1x8x8xf32>,
    %c3_97 = arith.constant 3 : index
    %c0_98 = arith.constant 0 : index
    %c0_99 = arith.constant 0 : index
    %164 = vector.load %arg8[%c3_97, %c0_98, %c0_99] : memref<4x8x1xf32, #tpu.memory_space<vmem>>, vector<1x8x1xf32>
    %165 = vector.shape_cast %164 : vector<1x8x1xf32> to vector<8x1xf32>
    %166 = vector.shape_cast %138 : vector<8x1xf32> to vector<1x8x1xf32>
    tpu.vector_store %arg8[%c3_97, %c0_98, %c0_99], %166 {strides = array<i32>} : memref<4x8x1xf32, #tpu.memory_space<vmem>>, vector<1x8x1xf32>,
    %c0_i32_100 = arith.constant 0 : i32
    %167 = arith.cmpi eq, %arg2, %c0_i32_100 : i32
    %168 = arith.extui %167 : i1 to i32
    %c0_i32_101 = arith.constant 0 : i32
    %169 = arith.cmpi ne, %168, %c0_i32_101 : i32
    scf.if %169 {
      %c0_102 = arith.constant 0 : index
      %c0_103 = arith.constant 0 : index
      %c0_104 = arith.constant 0 : index
      %170 = vector.load %arg10[%c0_102, %c0_103, %c0_104] : memref<4x8x8xf32, #tpu.memory_space<vmem>>, vector<1x8x8xf32>
      %171 = vector.shape_cast %170 : vector<1x8x8xf32> to vector<8x8xf32>
      %c0_105 = arith.constant 0 : index
      %c0_106 = arith.constant 0 : index
      %c0_107 = arith.constant 0 : index
      %172 = vector.load %arg9[%c0_105, %c0_106, %c0_107] : memref<4x8x1xf32, #tpu.memory_space<vmem>>, vector<1x8x1xf32>
      %173 = vector.shape_cast %172 : vector<1x8x1xf32> to vector<8x1xf32>
      %174 = tpu.reciprocal %173 {approx = true} : vector<8x1xf32> -> vector<8x1xf32>
      %175 = vector.broadcast %174 : vector<8x1xf32> to vector<8x8xf32>
      %176 = arith.mulf %171, %175 : vector<8x8xf32>
      %177 = arith.truncf %176 : vector<8x8xf32> to vector<8x8xbf16>
      %c0_108 = arith.constant 0 : index
      %c0_109 = arith.constant 0 : index
      %c0_110 = arith.constant 0 : index
      %178 = vector.load %arg7[%c0_108, %c0_109, %c0_110] : memref<1x8x32xbf16, #tpu.memory_space<vmem>>, vector<1x8x8xbf16>
      %179 = vector.shape_cast %178 : vector<1x8x8xbf16> to vector<8x8xbf16>
      %180 = vector.shape_cast %177 : vector<8x8xbf16> to vector<1x8x8xbf16>
      tpu.vector_store %arg7[%c0_108, %c0_109, %c0_110], %180 {strides = array<i32>} : memref<1x8x32xbf16, #tpu.memory_space<vmem>>, vector<1x8x8xbf16>,
      %c1_111 = arith.constant 1 : index
      %c0_112 = arith.constant 0 : index
      %c0_113 = arith.constant 0 : index
      %181 = vector.load %arg10[%c1_111, %c0_112, %c0_113] : memref<4x8x8xf32, #tpu.memory_space<vmem>>, vector<1x8x8xf32>
      %182 = vector.shape_cast %181 : vector<1x8x8xf32> to vector<8x8xf32>
      %c1_114 = arith.constant 1 : index
      %c0_115 = arith.constant 0 : index
      %c0_116 = arith.constant 0 : index
      %183 = vector.load %arg9[%c1_114, %c0_115, %c0_116] : memref<4x8x1xf32, #tpu.memory_space<vmem>>, vector<1x8x1xf32>
      %184 = vector.shape_cast %183 : vector<1x8x1xf32> to vector<8x1xf32>
      %185 = tpu.reciprocal %184 {approx = true} : vector<8x1xf32> -> vector<8x1xf32>
      %186 = vector.broadcast %185 : vector<8x1xf32> to vector<8x8xf32>
      %187 = arith.mulf %182, %186 : vector<8x8xf32>
      %188 = arith.truncf %187 : vector<8x8xf32> to vector<8x8xbf16>
      %c0_117 = arith.constant 0 : index
      %c0_118 = arith.constant 0 : index
      %c8 = arith.constant 8 : index
      %189 = vector.load %arg7[%c0_117, %c0_118, %c8] : memref<1x8x32xbf16, #tpu.memory_space<vmem>>, vector<1x8x8xbf16>
      %190 = vector.shape_cast %189 : vector<1x8x8xbf16> to vector<8x8xbf16>
      %191 = vector.shape_cast %188 : vector<8x8xbf16> to vector<1x8x8xbf16>
      tpu.vector_store %arg7[%c0_117, %c0_118, %c8], %191 {strides = array<i32>} : memref<1x8x32xbf16, #tpu.memory_space<vmem>>, vector<1x8x8xbf16>,
      %c2_119 = arith.constant 2 : index
      %c0_120 = arith.constant 0 : index
      %c0_121 = arith.constant 0 : index
      %192 = vector.load %arg10[%c2_119, %c0_120, %c0_121] : memref<4x8x8xf32, #tpu.memory_space<vmem>>, vector<1x8x8xf32>
      %193 = vector.shape_cast %192 : vector<1x8x8xf32> to vector<8x8xf32>
      %c2_122 = arith.constant 2 : index
      %c0_123 = arith.constant 0 : index
      %c0_124 = arith.constant 0 : index
      %194 = vector.load %arg9[%c2_122, %c0_123, %c0_124] : memref<4x8x1xf32, #tpu.memory_space<vmem>>, vector<1x8x1xf32>
      %195 = vector.shape_cast %194 : vector<1x8x1xf32> to vector<8x1xf32>
      %196 = tpu.reciprocal %195 {approx = true} : vector<8x1xf32> -> vector<8x1xf32>
      %197 = vector.broadcast %196 : vector<8x1xf32> to vector<8x8xf32>
      %198 = arith.mulf %193, %197 : vector<8x8xf32>
      %199 = arith.truncf %198 : vector<8x8xf32> to vector<8x8xbf16>
      %c0_125 = arith.constant 0 : index
      %c0_126 = arith.constant 0 : index
      %c16 = arith.constant 16 : index
      %200 = vector.load %arg7[%c0_125, %c0_126, %c16] : memref<1x8x32xbf16, #tpu.memory_space<vmem>>, vector<1x8x8xbf16>
      %201 = vector.shape_cast %200 : vector<1x8x8xbf16> to vector<8x8xbf16>
      %202 = vector.shape_cast %199 : vector<8x8xbf16> to vector<1x8x8xbf16>
      tpu.vector_store %arg7[%c0_125, %c0_126, %c16], %202 {strides = array<i32>} : memref<1x8x32xbf16, #tpu.memory_space<vmem>>, vector<1x8x8xbf16>,
      %c3_127 = arith.constant 3 : index
      %c0_128 = arith.constant 0 : index
      %c0_129 = arith.constant 0 : index
      %203 = vector.load %arg10[%c3_127, %c0_128, %c0_129] : memref<4x8x8xf32, #tpu.memory_space<vmem>>, vector<1x8x8xf32>
      %204 = vector.shape_cast %203 : vector<1x8x8xf32> to vector<8x8xf32>
      %c3_130 = arith.constant 3 : index
      %c0_131 = arith.constant 0 : index
      %c0_132 = arith.constant 0 : index
      %205 = vector.load %arg9[%c3_130, %c0_131, %c0_132] : memref<4x8x1xf32, #tpu.memory_space<vmem>>, vector<1x8x1xf32>
      %206 = vector.shape_cast %205 : vector<1x8x1xf32> to vector<8x1xf32>
      %207 = tpu.reciprocal %206 {approx = true} : vector<8x1xf32> -> vector<8x1xf32>
      %208 = vector.broadcast %207 : vector<8x1xf32> to vector<8x8xf32>
      %209 = arith.mulf %204, %208 : vector<8x8xf32>
      %210 = arith.truncf %209 : vector<8x8xf32> to vector<8x8xbf16>
      %c0_133 = arith.constant 0 : index
      %c0_134 = arith.constant 0 : index
      %c24 = arith.constant 24 : index
      %211 = vector.load %arg7[%c0_133, %c0_134, %c24] : memref<1x8x32xbf16, #tpu.memory_space<vmem>>, vector<1x8x8xbf16>
      %212 = vector.shape_cast %211 : vector<1x8x8xbf16> to vector<8x8xbf16>
      %213 = vector.shape_cast %210 : vector<8x8xbf16> to vector<1x8x8xbf16>
      tpu.vector_store %arg7[%c0_133, %c0_134, %c24], %213 {strides = array<i32>} : memref<1x8x32xbf16, #tpu.memory_space<vmem>>, vector<1x8x8xbf16>,
    } else {
    }
    return
  }
  func.func @transform_0(%arg0: i32, %arg1: i32, %arg2: i32) -> (i32, i32, i32, i32) {
    %c0_i32 = arith.constant 0 : i32
    %c0_i32_0 = arith.constant 0 : i32
    %c0_i32_1 = arith.constant 0 : i32
    return %c0_i32, %arg0, %arg1, %c0_i32_0 : i32, i32, i32, i32
  }
  func.func @transform_1(%arg0: i32, %arg1: i32, %arg2: i32) -> (i32, i32, i32, i32) {
    %c1_i32 = arith.constant 1 : i32
    %c0_i32 = arith.constant 0 : i32
    %c0_i32_0 = arith.constant 0 : i32
    return %c1_i32, %arg0, %arg2, %c0_i32 : i32, i32, i32, i32
  }
  func.func @transform_2(%arg0: i32, %arg1: i32, %arg2: i32) -> (i32, i32, i32, i32) {
    %c2_i32 = arith.constant 2 : i32
    %c0_i32 = arith.constant 0 : i32
    %c0_i32_0 = arith.constant 0 : i32
    return %c2_i32, %arg0, %arg2, %c0_i32 : i32, i32, i32, i32
  }
  func.func @transform_3(%arg0: i32, %arg1: i32, %arg2: i32) -> (i32, i32, i32) {
    %c0_i32 = arith.constant 0 : i32
    %c0_i32_0 = arith.constant 0 : i32
    return %arg0, %c0_i32, %arg2 : i32, i32, i32
  }
  func.func @transform_4(%arg0: i32, %arg1: i32, %arg2: i32) -> (i32, i32, i32) {
    %c0_i32 = arith.constant 0 : i32
    %c0_i32_0 = arith.constant 0 : i32
    return %arg0, %arg1, %c0_i32 : i32, i32, i32
  }
}

module attributes {stable_mosaic.version = 11 : i64} {
  func.func @_dense_kernel(%arg0: i32, %arg1: i32, %arg2: i32, %arg3: memref<16x32xbf16, #tpu.memory_space<vmem>>, %arg4: memref<32x64xbf16, #tpu.memory_space<vmem>>, %arg5: memref<1x64xf32, #tpu.memory_space<vmem>>, %arg6: memref<16x64xbf16, #tpu.memory_space<vmem>>, %arg7: memref<16x64xf32, #tpu.memory_space<vmem>>) attributes {dimension_semantics = [#tpu.dimension_semantics<parallel>, #tpu.dimension_semantics<parallel>, #tpu.dimension_semantics<arbitrary>], iteration_bounds = array<i64: 1, 1, 1>, scalar_prefetch = 0 : i64, scratch_operands = 1 : i64, tpu.core_type = #tpu.core_type<tc>, window_params = [{transform_indices = @transform_0, window_bounds = array<i64: 16, 32>}, {transform_indices = @transform_1, window_bounds = array<i64: 32, 64>}, {transform_indices = @transform_2, window_bounds = array<i64: 1, 64>}, {transform_indices = @transform_3, window_bounds = array<i64: 16, 64>}]} {
    %c0_i32 = arith.constant 0 : i32
    %0 = arith.cmpi eq, %arg2, %c0_i32 : i32
    %1 = arith.extui %0 : i1 to i32
    %c0_i32_0 = arith.constant 0 : i32
    %2 = arith.cmpi ne, %1, %c0_i32_0 : i32
    scf.if %2 {
      %cst_10 = arith.constant 0.000000e+00 : f32
      %12 = vector.broadcast %cst_10 : f32 to vector<16x64xf32>
      %c0_11 = arith.constant 0 : index
      %c0_12 = arith.constant 0 : index
      %13 = vector.load %arg7[%c0_11, %c0_12] : memref<16x64xf32, #tpu.memory_space<vmem>>, vector<16x64xf32>
      tpu.vector_store %arg7[%c0_11, %c0_12], %12 {strides = array<i32>} : memref<16x64xf32, #tpu.memory_space<vmem>>, vector<16x64xf32>,
    } else {
    }
    %c0 = arith.constant 0 : index
    %c0_1 = arith.constant 0 : index
    %3 = vector.load %arg7[%c0, %c0_1] : memref<16x64xf32, #tpu.memory_space<vmem>>, vector<16x64xf32>
    %c0_2 = arith.constant 0 : index
    %c0_3 = arith.constant 0 : index
    %4 = vector.load %arg3[%c0_2, %c0_3] : memref<16x32xbf16, #tpu.memory_space<vmem>>, vector<16x32xbf16>
    %c0_4 = arith.constant 0 : index
    %c0_5 = arith.constant 0 : index
    %5 = vector.load %arg4[%c0_4, %c0_5] : memref<32x64xbf16, #tpu.memory_space<vmem>>, vector<32x64xbf16>
    %cst = arith.constant dense<0.000000e+00> : vector<16x64xf32>
    %6 = tpu.matmul %4, %5, %cst {dimension_numbers = #tpu.dot_dimension_numbers<[1], [0], [0], [1], [0, 0, 1, 1], [], []>} : vector<16x32xbf16>, vector<32x64xbf16>, vector<16x64xf32> -> vector<16x64xf32>
    %7 = arith.addf %3, %6 : vector<16x64xf32>
    %c0_6 = arith.constant 0 : index
    %c0_7 = arith.constant 0 : index
    %8 = vector.load %arg7[%c0_6, %c0_7] : memref<16x64xf32, #tpu.memory_space<vmem>>, vector<16x64xf32>
    tpu.vector_store %arg7[%c0_6, %c0_7], %7 {strides = array<i32>} : memref<16x64xf32, #tpu.memory_space<vmem>>, vector<16x64xf32>,
    %c0_i32_8 = arith.constant 0 : i32
    %9 = arith.cmpi eq, %arg2, %c0_i32_8 : i32
    %10 = arith.extui %9 : i1 to i32
    %c0_i32_9 = arith.constant 0 : i32
    %11 = arith.cmpi ne, %10, %c0_i32_9 : i32
    scf.if %11 {
      %c0_10 = arith.constant 0 : index
      %c0_11 = arith.constant 0 : index
      %12 = vector.load %arg7[%c0_10, %c0_11] : memref<16x64xf32, #tpu.memory_space<vmem>>, vector<16x64xf32>
      %c0_12 = arith.constant 0 : index
      %c0_13 = arith.constant 0 : index
      %13 = vector.load %arg5[%c0_12, %c0_13] : memref<1x64xf32, #tpu.memory_space<vmem>>, vector<1x64xf32>
      %14 = vector.broadcast %13 : vector<1x64xf32> to vector<16x64xf32>
      %15 = arith.addf %12, %14 : vector<16x64xf32>
      %16 = arith.mulf %15, %15 : vector<16x64xf32>
      %17 = arith.mulf %15, %16 : vector<16x64xf32>
      %cst_14 = arith.constant 4.471500e-02 : f32
      %18 = vector.broadcast %cst_14 : f32 to vector<16x64xf32>
      %19 = arith.mulf %18, %17 : vector<16x64xf32>
      %20 = arith.addf %15, %19 : vector<16x64xf32>
      %cst_15 = arith.constant 0.797884583 : f32
      %21 = vector.broadcast %cst_15 : f32 to vector<16x64xf32>
      %22 = arith.mulf %21, %20 : vector<16x64xf32>
      %23 = math.tanh %22 : vector<16x64xf32>
      %cst_16 = arith.constant 1.000000e+00 : f32
      %24 = vector.broadcast %cst_16 : f32 to vector<16x64xf32>
      %25 = arith.addf %24, %23 : vector<16x64xf32>
      %cst_17 = arith.constant 5.000000e-01 : f32
      %26 = vector.broadcast %cst_17 : f32 to vector<16x64xf32>
      %27 = arith.mulf %26, %25 : vector<16x64xf32>
      %28 = arith.mulf %15, %27 : vector<16x64xf32>
      %29 = arith.truncf %28 : vector<16x64xf32> to vector<16x64xbf16>
      %c0_18 = arith.constant 0 : index
      %c0_19 = arith.constant 0 : index
      %30 = vector.load %arg6[%c0_18, %c0_19] : memref<16x64xbf16, #tpu.memory_space<vmem>>, vector<16x64xbf16>
      tpu.vector_store %arg6[%c0_18, %c0_19], %29 {strides = array<i32>} : memref<16x64xbf16, #tpu.memory_space<vmem>>, vector<16x64xbf16>,
    } else {
    }
    return
  }
  func.func @transform_0(%arg0: i32, %arg1: i32, %arg2: i32) -> (i32, i32) {
    %c0_i32 = arith.constant 0 : i32
    return %arg0, %arg2 : i32, i32
  }
  func.func @transform_1(%arg0: i32, %arg1: i32, %arg2: i32) -> (i32, i32) {
    %c0_i32 = arith.constant 0 : i32
    return %arg2, %arg1 : i32, i32
  }
  func.func @transform_2(%arg0: i32, %arg1: i32, %arg2: i32) -> (i32, i32) {
    %c0_i32 = arith.constant 0 : i32
    %c0_i32_0 = arith.constant 0 : i32
    return %c0_i32, %arg1 : i32, i32
  }
  func.func @transform_3(%arg0: i32, %arg1: i32, %arg2: i32) -> (i32, i32) {
    %c0_i32 = arith.constant 0 : i32
    return %arg0, %arg1 : i32, i32
  }
}

module attributes {stable_mosaic.version = 11 : i64} {
  func.func @_dense_res_ln_kernel(%arg0: i32, %arg1: i32, %arg2: memref<2x32xbf16, #tpu.memory_space<vmem>>, %arg3: memref<32x32xbf16, #tpu.memory_space<vmem>>, %arg4: memref<1x32xf32, #tpu.memory_space<vmem>>, %arg5: memref<2x32xbf16, #tpu.memory_space<vmem>>, %arg6: memref<1x32xf32, #tpu.memory_space<vmem>>, %arg7: memref<1x32xf32, #tpu.memory_space<vmem>>, %arg8: memref<2x32xbf16, #tpu.memory_space<vmem>>, %arg9: memref<2x32xf32, #tpu.memory_space<vmem>>) attributes {dimension_semantics = [#tpu.dimension_semantics<parallel>, #tpu.dimension_semantics<arbitrary>], iteration_bounds = array<i64: 1, 1>, scalar_prefetch = 0 : i64, scratch_operands = 1 : i64, tpu.core_type = #tpu.core_type<tc>, window_params = [{transform_indices = @transform_0, window_bounds = array<i64: 2, 32>}, {transform_indices = @transform_1, window_bounds = array<i64: 32, 32>}, {pipeline_mode = #tpu.pipeline_mode<synchronous>, transform_indices = @transform_2, window_bounds = array<i64: 1, 32>}, {transform_indices = @transform_3, window_bounds = array<i64: 2, 32>}, {pipeline_mode = #tpu.pipeline_mode<synchronous>, transform_indices = @transform_4, window_bounds = array<i64: 1, 32>}, {pipeline_mode = #tpu.pipeline_mode<synchronous>, transform_indices = @transform_5, window_bounds = array<i64: 1, 32>}, {transform_indices = @transform_6, window_bounds = array<i64: 2, 32>}]} {
    %c0_i32 = arith.constant 0 : i32
    %0 = arith.cmpi eq, %arg1, %c0_i32 : i32
    %1 = arith.extui %0 : i1 to i32
    %c0_i32_0 = arith.constant 0 : i32
    %2 = arith.cmpi ne, %1, %c0_i32_0 : i32
    scf.if %2 {
      %cst_10 = arith.constant 0.000000e+00 : f32
      %12 = vector.broadcast %cst_10 : f32 to vector<2x32xf32>
      %c0_11 = arith.constant 0 : index
      %c0_12 = arith.constant 0 : index
      %13 = vector.load %arg9[%c0_11, %c0_12] : memref<2x32xf32, #tpu.memory_space<vmem>>, vector<2x32xf32>
      tpu.vector_store %arg9[%c0_11, %c0_12], %12 {strides = array<i32>} : memref<2x32xf32, #tpu.memory_space<vmem>>, vector<2x32xf32>,
    } else {
    }
    %c0 = arith.constant 0 : index
    %c0_1 = arith.constant 0 : index
    %3 = vector.load %arg9[%c0, %c0_1] : memref<2x32xf32, #tpu.memory_space<vmem>>, vector<2x32xf32>
    %c0_2 = arith.constant 0 : index
    %c0_3 = arith.constant 0 : index
    %4 = vector.load %arg2[%c0_2, %c0_3] : memref<2x32xbf16, #tpu.memory_space<vmem>>, vector<2x32xbf16>
    %c0_4 = arith.constant 0 : index
    %c0_5 = arith.constant 0 : index
    %5 = vector.load %arg3[%c0_4, %c0_5] : memref<32x32xbf16, #tpu.memory_space<vmem>>, vector<32x32xbf16>
    %cst = arith.constant dense<0.000000e+00> : vector<2x32xf32>
    %6 = tpu.matmul %4, %5, %cst {dimension_numbers = #tpu.dot_dimension_numbers<[1], [0], [0], [1], [0, 0, 1, 1], [], []>} : vector<2x32xbf16>, vector<32x32xbf16>, vector<2x32xf32> -> vector<2x32xf32>
    %7 = arith.addf %3, %6 : vector<2x32xf32>
    %c0_6 = arith.constant 0 : index
    %c0_7 = arith.constant 0 : index
    %8 = vector.load %arg9[%c0_6, %c0_7] : memref<2x32xf32, #tpu.memory_space<vmem>>, vector<2x32xf32>
    tpu.vector_store %arg9[%c0_6, %c0_7], %7 {strides = array<i32>} : memref<2x32xf32, #tpu.memory_space<vmem>>, vector<2x32xf32>,
    %c0_i32_8 = arith.constant 0 : i32
    %9 = arith.cmpi eq, %arg1, %c0_i32_8 : i32
    %10 = arith.extui %9 : i1 to i32
    %c0_i32_9 = arith.constant 0 : i32
    %11 = arith.cmpi ne, %10, %c0_i32_9 : i32
    scf.if %11 {
      %c0_10 = arith.constant 0 : index
      %c0_11 = arith.constant 0 : index
      %12 = vector.load %arg9[%c0_10, %c0_11] : memref<2x32xf32, #tpu.memory_space<vmem>>, vector<2x32xf32>
      %c0_12 = arith.constant 0 : index
      %c0_13 = arith.constant 0 : index
      %13 = vector.load %arg4[%c0_12, %c0_13] : memref<1x32xf32, #tpu.memory_space<vmem>>, vector<1x32xf32>
      %14 = vector.broadcast %13 : vector<1x32xf32> to vector<2x32xf32>
      %15 = arith.addf %12, %14 : vector<2x32xf32>
      %c0_14 = arith.constant 0 : index
      %c0_15 = arith.constant 0 : index
      %16 = vector.load %arg5[%c0_14, %c0_15] : memref<2x32xbf16, #tpu.memory_space<vmem>>, vector<2x32xbf16>
      %17 = arith.extf %16 : vector<2x32xbf16> to vector<2x32xf32>
      %18 = arith.addf %15, %17 : vector<2x32xf32>
      %cst_16 = arith.constant dense<0.000000e+00> : vector<2xf32>
      %19 = vector.multi_reduction <add>, %18, %cst_16 [1] : vector<2x32xf32> to vector<2xf32>
      %20 = vector.shape_cast %19 : vector<2xf32> to vector<2x1xf32>
      %cst_17 = arith.constant 3.200000e+01 : f32
      %21 = vector.broadcast %cst_17 : f32 to vector<2x1xf32>
      %22 = arith.divf %20, %21 : vector<2x1xf32>
      %23 = vector.broadcast %22 : vector<2x1xf32> to vector<2x32xf32>
      %24 = arith.subf %18, %23 : vector<2x32xf32>
      %25 = arith.mulf %24, %24 : vector<2x32xf32>
      %cst_18 = arith.constant dense<0.000000e+00> : vector<2xf32>
      %26 = vector.multi_reduction <add>, %25, %cst_18 [1] : vector<2x32xf32> to vector<2xf32>
      %27 = vector.shape_cast %26 : vector<2xf32> to vector<2x1xf32>
      %cst_19 = arith.constant 3.200000e+01 : f32
      %28 = vector.broadcast %cst_19 : f32 to vector<2x1xf32>
      %29 = arith.divf %27, %28 : vector<2x1xf32>
      %30 = vector.broadcast %22 : vector<2x1xf32> to vector<2x32xf32>
      %31 = arith.subf %18, %30 : vector<2x32xf32>
      %cst_20 = arith.constant 9.99999996E-13 : f32
      %32 = vector.broadcast %cst_20 : f32 to vector<2x1xf32>
      %33 = arith.addf %29, %32 : vector<2x1xf32>
      %34 = math.rsqrt %33 : vector<2x1xf32>
      %35 = vector.broadcast %34 : vector<2x1xf32> to vector<2x32xf32>
      %36 = arith.mulf %31, %35 : vector<2x32xf32>
      %c0_21 = arith.constant 0 : index
      %c0_22 = arith.constant 0 : index
      %37 = vector.load %arg6[%c0_21, %c0_22] : memref<1x32xf32, #tpu.memory_space<vmem>>, vector<1x32xf32>
      %38 = vector.broadcast %37 : vector<1x32xf32> to vector<2x32xf32>
      %39 = arith.mulf %36, %38 : vector<2x32xf32>
      %c0_23 = arith.constant 0 : index
      %c0_24 = arith.constant 0 : index
      %40 = vector.load %arg7[%c0_23, %c0_24] : memref<1x32xf32, #tpu.memory_space<vmem>>, vector<1x32xf32>
      %41 = vector.broadcast %40 : vector<1x32xf32> to vector<2x32xf32>
      %42 = arith.addf %39, %41 : vector<2x32xf32>
      %43 = arith.truncf %42 : vector<2x32xf32> to vector<2x32xbf16>
      %c0_25 = arith.constant 0 : index
      %c0_26 = arith.constant 0 : index
      %44 = vector.load %arg8[%c0_25, %c0_26] : memref<2x32xbf16, #tpu.memory_space<vmem>>, vector<2x32xbf16>
      tpu.vector_store %arg8[%c0_25, %c0_26], %43 {strides = array<i32>} : memref<2x32xbf16, #tpu.memory_space<vmem>>, vector<2x32xbf16>,
    } else {
    }
    return
  }
  func.func @transform_0(%arg0: i32, %arg1: i32) -> (i32, i32) {
    %c0_i32 = arith.constant 0 : i32
    return %arg0, %arg1 : i32, i32
  }
  func.func @transform_1(%arg0: i32, %arg1: i32) -> (i32, i32) {
    %c0_i32 = arith.constant 0 : i32
    %c0_i32_0 = arith.constant 0 : i32
    return %arg1, %c0_i32 : i32, i32
  }
  func.func @transform_2(%arg0: i32, %arg1: i32) -> (i32, i32) {
    %c0_i32 = arith.constant 0 : i32
    %c0_i32_0 = arith.constant 0 : i32
    %c0_i32_1 = arith.constant 0 : i32
    return %c0_i32, %c0_i32_0 : i32, i32
  }
  func.func @transform_3(%arg0: i32, %arg1: i32) -> (i32, i32) {
    %c0_i32 = arith.constant 0 : i32
    %c0_i32_0 = arith.constant 0 : i32
    return %arg0, %c0_i32 : i32, i32
  }
  func.func @transform_4(%arg0: i32, %arg1: i32) -> (i32, i32) {
    %c0_i32 = arith.constant 0 : i32
    %c0_i32_0 = arith.constant 0 : i32
    %c0_i32_1 = arith.constant 0 : i32
    return %c0_i32, %c0_i32_0 : i32, i32
  }
  func.func @transform_5(%arg0: i32, %arg1: i32) -> (i32, i32) {
    %c0_i32 = arith.constant 0 : i32
    %c0_i32_0 = arith.constant 0 : i32
    %c0_i32_1 = arith.constant 0 : i32
    return %c0_i32, %c0_i32_0 : i32, i32
  }
  func.func @transform_6(%arg0: i32, %arg1: i32) -> (i32, i32) {
    %c0_i32 = arith.constant 0 : i32
    %c0_i32_0 = arith.constant 0 : i32
    return %arg0, %c0_i32 : i32, i32
  }
}

module attributes {stable_mosaic.version = 11 : i64} {
  func.func @_dense_res_ln_kernel(%arg0: i32, %arg1: i32, %arg2: memref<16x64xbf16, #tpu.memory_space<vmem>>, %arg3: memref<64x32xbf16, #tpu.memory_space<vmem>>, %arg4: memref<1x32xf32, #tpu.memory_space<vmem>>, %arg5: memref<16x32xbf16, #tpu.memory_space<vmem>>, %arg6: memref<1x32xf32, #tpu.memory_space<vmem>>, %arg7: memref<1x32xf32, #tpu.memory_space<vmem>>, %arg8: memref<16x32xbf16, #tpu.memory_space<vmem>>, %arg9: memref<16x32xf32, #tpu.memory_space<vmem>>) attributes {dimension_semantics = [#tpu.dimension_semantics<parallel>, #tpu.dimension_semantics<arbitrary>], iteration_bounds = array<i64: 1, 1>, scalar_prefetch = 0 : i64, scratch_operands = 1 : i64, tpu.core_type = #tpu.core_type<tc>, window_params = [{transform_indices = @transform_0, window_bounds = array<i64: 16, 64>}, {transform_indices = @transform_1, window_bounds = array<i64: 64, 32>}, {pipeline_mode = #tpu.pipeline_mode<synchronous>, transform_indices = @transform_2, window_bounds = array<i64: 1, 32>}, {transform_indices = @transform_3, window_bounds = array<i64: 16, 32>}, {pipeline_mode = #tpu.pipeline_mode<synchronous>, transform_indices = @transform_4, window_bounds = array<i64: 1, 32>}, {pipeline_mode = #tpu.pipeline_mode<synchronous>, transform_indices = @transform_5, window_bounds = array<i64: 1, 32>}, {transform_indices = @transform_6, window_bounds = array<i64: 16, 32>}]} {
    %c0_i32 = arith.constant 0 : i32
    %0 = arith.cmpi eq, %arg1, %c0_i32 : i32
    %1 = arith.extui %0 : i1 to i32
    %c0_i32_0 = arith.constant 0 : i32
    %2 = arith.cmpi ne, %1, %c0_i32_0 : i32
    scf.if %2 {
      %cst_10 = arith.constant 0.000000e+00 : f32
      %12 = vector.broadcast %cst_10 : f32 to vector<16x32xf32>
      %c0_11 = arith.constant 0 : index
      %c0_12 = arith.constant 0 : index
      %13 = vector.load %arg9[%c0_11, %c0_12] : memref<16x32xf32, #tpu.memory_space<vmem>>, vector<16x32xf32>
      tpu.vector_store %arg9[%c0_11, %c0_12], %12 {strides = array<i32>} : memref<16x32xf32, #tpu.memory_space<vmem>>, vector<16x32xf32>,
    } else {
    }
    %c0 = arith.constant 0 : index
    %c0_1 = arith.constant 0 : index
    %3 = vector.load %arg9[%c0, %c0_1] : memref<16x32xf32, #tpu.memory_space<vmem>>, vector<16x32xf32>
    %c0_2 = arith.constant 0 : index
    %c0_3 = arith.constant 0 : index
    %4 = vector.load %arg2[%c0_2, %c0_3] : memref<16x64xbf16, #tpu.memory_space<vmem>>, vector<16x64xbf16>
    %c0_4 = arith.constant 0 : index
    %c0_5 = arith.constant 0 : index
    %5 = vector.load %arg3[%c0_4, %c0_5] : memref<64x32xbf16, #tpu.memory_space<vmem>>, vector<64x32xbf16>
    %cst = arith.constant dense<0.000000e+00> : vector<16x32xf32>
    %6 = tpu.matmul %4, %5, %cst {dimension_numbers = #tpu.dot_dimension_numbers<[1], [0], [0], [1], [0, 0, 1, 1], [], []>} : vector<16x64xbf16>, vector<64x32xbf16>, vector<16x32xf32> -> vector<16x32xf32>
    %7 = arith.addf %3, %6 : vector<16x32xf32>
    %c0_6 = arith.constant 0 : index
    %c0_7 = arith.constant 0 : index
    %8 = vector.load %arg9[%c0_6, %c0_7] : memref<16x32xf32, #tpu.memory_space<vmem>>, vector<16x32xf32>
    tpu.vector_store %arg9[%c0_6, %c0_7], %7 {strides = array<i32>} : memref<16x32xf32, #tpu.memory_space<vmem>>, vector<16x32xf32>,
    %c0_i32_8 = arith.constant 0 : i32
    %9 = arith.cmpi eq, %arg1, %c0_i32_8 : i32
    %10 = arith.extui %9 : i1 to i32
    %c0_i32_9 = arith.constant 0 : i32
    %11 = arith.cmpi ne, %10, %c0_i32_9 : i32
    scf.if %11 {
      %c0_10 = arith.constant 0 : index
      %c0_11 = arith.constant 0 : index
      %12 = vector.load %arg9[%c0_10, %c0_11] : memref<16x32xf32, #tpu.memory_space<vmem>>, vector<16x32xf32>
      %c0_12 = arith.constant 0 : index
      %c0_13 = arith.constant 0 : index
      %13 = vector.load %arg4[%c0_12, %c0_13] : memref<1x32xf32, #tpu.memory_space<vmem>>, vector<1x32xf32>
      %14 = vector.broadcast %13 : vector<1x32xf32> to vector<16x32xf32>
      %15 = arith.addf %12, %14 : vector<16x32xf32>
      %c0_14 = arith.constant 0 : index
      %c0_15 = arith.constant 0 : index
      %16 = vector.load %arg5[%c0_14, %c0_15] : memref<16x32xbf16, #tpu.memory_space<vmem>>, vector<16x32xbf16>
      %17 = arith.extf %16 : vector<16x32xbf16> to vector<16x32xf32>
      %18 = arith.addf %15, %17 : vector<16x32xf32>
      %cst_16 = arith.constant dense<0.000000e+00> : vector<16xf32>
      %19 = vector.multi_reduction <add>, %18, %cst_16 [1] : vector<16x32xf32> to vector<16xf32>
      %20 = vector.shape_cast %19 : vector<16xf32> to vector<16x1xf32>
      %cst_17 = arith.constant 3.200000e+01 : f32
      %21 = vector.broadcast %cst_17 : f32 to vector<16x1xf32>
      %22 = arith.divf %20, %21 : vector<16x1xf32>
      %23 = vector.broadcast %22 : vector<16x1xf32> to vector<16x32xf32>
      %24 = arith.subf %18, %23 : vector<16x32xf32>
      %25 = arith.mulf %24, %24 : vector<16x32xf32>
      %cst_18 = arith.constant dense<0.000000e+00> : vector<16xf32>
      %26 = vector.multi_reduction <add>, %25, %cst_18 [1] : vector<16x32xf32> to vector<16xf32>
      %27 = vector.shape_cast %26 : vector<16xf32> to vector<16x1xf32>
      %cst_19 = arith.constant 3.200000e+01 : f32
      %28 = vector.broadcast %cst_19 : f32 to vector<16x1xf32>
      %29 = arith.divf %27, %28 : vector<16x1xf32>
      %30 = vector.broadcast %22 : vector<16x1xf32> to vector<16x32xf32>
      %31 = arith.subf %18, %30 : vector<16x32xf32>
      %cst_20 = arith.constant 9.99999996E-13 : f32
      %32 = vector.broadcast %cst_20 : f32 to vector<16x1xf32>
      %33 = arith.addf %29, %32 : vector<16x1xf32>
      %34 = math.rsqrt %33 : vector<16x1xf32>
      %35 = vector.broadcast %34 : vector<16x1xf32> to vector<16x32xf32>
      %36 = arith.mulf %31, %35 : vector<16x32xf32>
      %c0_21 = arith.constant 0 : index
      %c0_22 = arith.constant 0 : index
      %37 = vector.load %arg6[%c0_21, %c0_22] : memref<1x32xf32, #tpu.memory_space<vmem>>, vector<1x32xf32>
      %38 = vector.broadcast %37 : vector<1x32xf32> to vector<16x32xf32>
      %39 = arith.mulf %36, %38 : vector<16x32xf32>
      %c0_23 = arith.constant 0 : index
      %c0_24 = arith.constant 0 : index
      %40 = vector.load %arg7[%c0_23, %c0_24] : memref<1x32xf32, #tpu.memory_space<vmem>>, vector<1x32xf32>
      %41 = vector.broadcast %40 : vector<1x32xf32> to vector<16x32xf32>
      %42 = arith.addf %39, %41 : vector<16x32xf32>
      %43 = arith.truncf %42 : vector<16x32xf32> to vector<16x32xbf16>
      %c0_25 = arith.constant 0 : index
      %c0_26 = arith.constant 0 : index
      %44 = vector.load %arg8[%c0_25, %c0_26] : memref<16x32xbf16, #tpu.memory_space<vmem>>, vector<16x32xbf16>
      tpu.vector_store %arg8[%c0_25, %c0_26], %43 {strides = array<i32>} : memref<16x32xbf16, #tpu.memory_space<vmem>>, vector<16x32xbf16>,
    } else {
    }
    return
  }
  func.func @transform_0(%arg0: i32, %arg1: i32) -> (i32, i32) {
    %c0_i32 = arith.constant 0 : i32
    return %arg0, %arg1 : i32, i32
  }
  func.func @transform_1(%arg0: i32, %arg1: i32) -> (i32, i32) {
    %c0_i32 = arith.constant 0 : i32
    %c0_i32_0 = arith.constant 0 : i32
    return %arg1, %c0_i32 : i32, i32
  }
  func.func @transform_2(%arg0: i32, %arg1: i32) -> (i32, i32) {
    %c0_i32 = arith.constant 0 : i32
    %c0_i32_0 = arith.constant 0 : i32
    %c0_i32_1 = arith.constant 0 : i32
    return %c0_i32, %c0_i32_0 : i32, i32
  }
  func.func @transform_3(%arg0: i32, %arg1: i32) -> (i32, i32) {
    %c0_i32 = arith.constant 0 : i32
    %c0_i32_0 = arith.constant 0 : i32
    return %arg0, %c0_i32 : i32, i32
  }
  func.func @transform_4(%arg0: i32, %arg1: i32) -> (i32, i32) {
    %c0_i32 = arith.constant 0 : i32
    %c0_i32_0 = arith.constant 0 : i32
    %c0_i32_1 = arith.constant 0 : i32
    return %c0_i32, %c0_i32_0 : i32, i32
  }
  func.func @transform_5(%arg0: i32, %arg1: i32) -> (i32, i32) {
    %c0_i32 = arith.constant 0 : i32
    %c0_i32_0 = arith.constant 0 : i32
    %c0_i32_1 = arith.constant 0 : i32
    return %c0_i32, %c0_i32_0 : i32, i32
  }
  func.func @transform_6(%arg0: i32, %arg1: i32) -> (i32, i32) {
    %c0_i32 = arith.constant 0 : i32
    %c0_i32_0 = arith.constant 0 : i32
    return %arg0, %c0_i32 : i32, i32
  }
}

module attributes {stable_mosaic.version = 11 : i64} {
  func.func @_dense_kernel(%arg0: i32, %arg1: i32, %arg2: i32, %arg3: memref<2x32xbf16, #tpu.memory_space<vmem>>, %arg4: memref<32x64xbf16, #tpu.memory_space<vmem>>, %arg5: memref<1x64xf32, #tpu.memory_space<vmem>>, %arg6: memref<2x64xbf16, #tpu.memory_space<vmem>>, %arg7: memref<2x64xf32, #tpu.memory_space<vmem>>) attributes {dimension_semantics = [#tpu.dimension_semantics<parallel>, #tpu.dimension_semantics<parallel>, #tpu.dimension_semantics<arbitrary>], iteration_bounds = array<i64: 1, 1, 1>, scalar_prefetch = 0 : i64, scratch_operands = 1 : i64, tpu.core_type = #tpu.core_type<tc>, window_params = [{transform_indices = @transform_0, window_bounds = array<i64: 2, 32>}, {transform_indices = @transform_1, window_bounds = array<i64: 32, 64>}, {transform_indices = @transform_2, window_bounds = array<i64: 1, 64>}, {transform_indices = @transform_3, window_bounds = array<i64: 2, 64>}]} {
    %c0_i32 = arith.constant 0 : i32
    %0 = arith.cmpi eq, %arg2, %c0_i32 : i32
    %1 = arith.extui %0 : i1 to i32
    %c0_i32_0 = arith.constant 0 : i32
    %2 = arith.cmpi ne, %1, %c0_i32_0 : i32
    scf.if %2 {
      %cst_10 = arith.constant 0.000000e+00 : f32
      %12 = vector.broadcast %cst_10 : f32 to vector<2x64xf32>
      %c0_11 = arith.constant 0 : index
      %c0_12 = arith.constant 0 : index
      %13 = vector.load %arg7[%c0_11, %c0_12] : memref<2x64xf32, #tpu.memory_space<vmem>>, vector<2x64xf32>
      tpu.vector_store %arg7[%c0_11, %c0_12], %12 {strides = array<i32>} : memref<2x64xf32, #tpu.memory_space<vmem>>, vector<2x64xf32>,
    } else {
    }
    %c0 = arith.constant 0 : index
    %c0_1 = arith.constant 0 : index
    %3 = vector.load %arg7[%c0, %c0_1] : memref<2x64xf32, #tpu.memory_space<vmem>>, vector<2x64xf32>
    %c0_2 = arith.constant 0 : index
    %c0_3 = arith.constant 0 : index
    %4 = vector.load %arg3[%c0_2, %c0_3] : memref<2x32xbf16, #tpu.memory_space<vmem>>, vector<2x32xbf16>
    %c0_4 = arith.constant 0 : index
    %c0_5 = arith.constant 0 : index
    %5 = vector.load %arg4[%c0_4, %c0_5] : memref<32x64xbf16, #tpu.memory_space<vmem>>, vector<32x64xbf16>
    %cst = arith.constant dense<0.000000e+00> : vector<2x64xf32>
    %6 = tpu.matmul %4, %5, %cst {dimension_numbers = #tpu.dot_dimension_numbers<[1], [0], [0], [1], [0, 0, 1, 1], [], []>} : vector<2x32xbf16>, vector<32x64xbf16>, vector<2x64xf32> -> vector<2x64xf32>
    %7 = arith.addf %3, %6 : vector<2x64xf32>
    %c0_6 = arith.constant 0 : index
    %c0_7 = arith.constant 0 : index
    %8 = vector.load %arg7[%c0_6, %c0_7] : memref<2x64xf32, #tpu.memory_space<vmem>>, vector<2x64xf32>
    tpu.vector_store %arg7[%c0_6, %c0_7], %7 {strides = array<i32>} : memref<2x64xf32, #tpu.memory_space<vmem>>, vector<2x64xf32>,
    %c0_i32_8 = arith.constant 0 : i32
    %9 = arith.cmpi eq, %arg2, %c0_i32_8 : i32
    %10 = arith.extui %9 : i1 to i32
    %c0_i32_9 = arith.constant 0 : i32
    %11 = arith.cmpi ne, %10, %c0_i32_9 : i32
    scf.if %11 {
      %c0_10 = arith.constant 0 : index
      %c0_11 = arith.constant 0 : index
      %12 = vector.load %arg7[%c0_10, %c0_11] : memref<2x64xf32, #tpu.memory_space<vmem>>, vector<2x64xf32>
      %c0_12 = arith.constant 0 : index
      %c0_13 = arith.constant 0 : index
      %13 = vector.load %arg5[%c0_12, %c0_13] : memref<1x64xf32, #tpu.memory_space<vmem>>, vector<1x64xf32>
      %14 = vector.broadcast %13 : vector<1x64xf32> to vector<2x64xf32>
      %15 = arith.addf %12, %14 : vector<2x64xf32>
      %16 = arith.mulf %15, %15 : vector<2x64xf32>
      %17 = arith.mulf %15, %16 : vector<2x64xf32>
      %cst_14 = arith.constant 4.471500e-02 : f32
      %18 = vector.broadcast %cst_14 : f32 to vector<2x64xf32>
      %19 = arith.mulf %18, %17 : vector<2x64xf32>
      %20 = arith.addf %15, %19 : vector<2x64xf32>
      %cst_15 = arith.constant 0.797884583 : f32
      %21 = vector.broadcast %cst_15 : f32 to vector<2x64xf32>
      %22 = arith.mulf %21, %20 : vector<2x64xf32>
      %23 = math.tanh %22 : vector<2x64xf32>
      %cst_16 = arith.constant 1.000000e+00 : f32
      %24 = vector.broadcast %cst_16 : f32 to vector<2x64xf32>
      %25 = arith.addf %24, %23 : vector<2x64xf32>
      %cst_17 = arith.constant 5.000000e-01 : f32
      %26 = vector.broadcast %cst_17 : f32 to vector<2x64xf32>
      %27 = arith.mulf %26, %25 : vector<2x64xf32>
      %28 = arith.mulf %15, %27 : vector<2x64xf32>
      %29 = arith.truncf %28 : vector<2x64xf32> to vector<2x64xbf16>
      %c0_18 = arith.constant 0 : index
      %c0_19 = arith.constant 0 : index
      %30 = vector.load %arg6[%c0_18, %c0_19] : memref<2x64xbf16, #tpu.memory_space<vmem>>, vector<2x64xbf16>
      tpu.vector_store %arg6[%c0_18, %c0_19], %29 {strides = array<i32>} : memref<2x64xbf16, #tpu.memory_space<vmem>>, vector<2x64xbf16>,
    } else {
    }
    return
  }
  func.func @transform_0(%arg0: i32, %arg1: i32, %arg2: i32) -> (i32, i32) {
    %c0_i32 = arith.constant 0 : i32
    return %arg0, %arg2 : i32, i32
  }
  func.func @transform_1(%arg0: i32, %arg1: i32, %arg2: i32) -> (i32, i32) {
    %c0_i32 = arith.constant 0 : i32
    return %arg2, %arg1 : i32, i32
  }
  func.func @transform_2(%arg0: i32, %arg1: i32, %arg2: i32) -> (i32, i32) {
    %c0_i32 = arith.constant 0 : i32
    %c0_i32_0 = arith.constant 0 : i32
    return %c0_i32, %arg1 : i32, i32
  }
  func.func @transform_3(%arg0: i32, %arg1: i32, %arg2: i32) -> (i32, i32) {
    %c0_i32 = arith.constant 0 : i32
    return %arg0, %arg1 : i32, i32
  }
}

module attributes {stable_mosaic.version = 11 : i64} {
  func.func @_dense_res_ln_kernel(%arg0: i32, %arg1: i32, %arg2: memref<2x64xbf16, #tpu.memory_space<vmem>>, %arg3: memref<64x32xbf16, #tpu.memory_space<vmem>>, %arg4: memref<1x32xf32, #tpu.memory_space<vmem>>, %arg5: memref<2x32xbf16, #tpu.memory_space<vmem>>, %arg6: memref<1x32xf32, #tpu.memory_space<vmem>>, %arg7: memref<1x32xf32, #tpu.memory_space<vmem>>, %arg8: memref<2x32xbf16, #tpu.memory_space<vmem>>, %arg9: memref<2x32xf32, #tpu.memory_space<vmem>>) attributes {dimension_semantics = [#tpu.dimension_semantics<parallel>, #tpu.dimension_semantics<arbitrary>], iteration_bounds = array<i64: 1, 1>, scalar_prefetch = 0 : i64, scratch_operands = 1 : i64, tpu.core_type = #tpu.core_type<tc>, window_params = [{transform_indices = @transform_0, window_bounds = array<i64: 2, 64>}, {transform_indices = @transform_1, window_bounds = array<i64: 64, 32>}, {pipeline_mode = #tpu.pipeline_mode<synchronous>, transform_indices = @transform_2, window_bounds = array<i64: 1, 32>}, {transform_indices = @transform_3, window_bounds = array<i64: 2, 32>}, {pipeline_mode = #tpu.pipeline_mode<synchronous>, transform_indices = @transform_4, window_bounds = array<i64: 1, 32>}, {pipeline_mode = #tpu.pipeline_mode<synchronous>, transform_indices = @transform_5, window_bounds = array<i64: 1, 32>}, {transform_indices = @transform_6, window_bounds = array<i64: 2, 32>}]} {
    %c0_i32 = arith.constant 0 : i32
    %0 = arith.cmpi eq, %arg1, %c0_i32 : i32
    %1 = arith.extui %0 : i1 to i32
    %c0_i32_0 = arith.constant 0 : i32
    %2 = arith.cmpi ne, %1, %c0_i32_0 : i32
    scf.if %2 {
      %cst_10 = arith.constant 0.000000e+00 : f32
      %12 = vector.broadcast %cst_10 : f32 to vector<2x32xf32>
      %c0_11 = arith.constant 0 : index
      %c0_12 = arith.constant 0 : index
      %13 = vector.load %arg9[%c0_11, %c0_12] : memref<2x32xf32, #tpu.memory_space<vmem>>, vector<2x32xf32>
      tpu.vector_store %arg9[%c0_11, %c0_12], %12 {strides = array<i32>} : memref<2x32xf32, #tpu.memory_space<vmem>>, vector<2x32xf32>,
    } else {
    }
    %c0 = arith.constant 0 : index
    %c0_1 = arith.constant 0 : index
    %3 = vector.load %arg9[%c0, %c0_1] : memref<2x32xf32, #tpu.memory_space<vmem>>, vector<2x32xf32>
    %c0_2 = arith.constant 0 : index
    %c0_3 = arith.constant 0 : index
    %4 = vector.load %arg2[%c0_2, %c0_3] : memref<2x64xbf16, #tpu.memory_space<vmem>>, vector<2x64xbf16>
    %c0_4 = arith.constant 0 : index
    %c0_5 = arith.constant 0 : index
    %5 = vector.load %arg3[%c0_4, %c0_5] : memref<64x32xbf16, #tpu.memory_space<vmem>>, vector<64x32xbf16>
    %cst = arith.constant dense<0.000000e+00> : vector<2x32xf32>
    %6 = tpu.matmul %4, %5, %cst {dimension_numbers = #tpu.dot_dimension_numbers<[1], [0], [0], [1], [0, 0, 1, 1], [], []>} : vector<2x64xbf16>, vector<64x32xbf16>, vector<2x32xf32> -> vector<2x32xf32>
    %7 = arith.addf %3, %6 : vector<2x32xf32>
    %c0_6 = arith.constant 0 : index
    %c0_7 = arith.constant 0 : index
    %8 = vector.load %arg9[%c0_6, %c0_7] : memref<2x32xf32, #tpu.memory_space<vmem>>, vector<2x32xf32>
    tpu.vector_store %arg9[%c0_6, %c0_7], %7 {strides = array<i32>} : memref<2x32xf32, #tpu.memory_space<vmem>>, vector<2x32xf32>,
    %c0_i32_8 = arith.constant 0 : i32
    %9 = arith.cmpi eq, %arg1, %c0_i32_8 : i32
    %10 = arith.extui %9 : i1 to i32
    %c0_i32_9 = arith.constant 0 : i32
    %11 = arith.cmpi ne, %10, %c0_i32_9 : i32
    scf.if %11 {
      %c0_10 = arith.constant 0 : index
      %c0_11 = arith.constant 0 : index
      %12 = vector.load %arg9[%c0_10, %c0_11] : memref<2x32xf32, #tpu.memory_space<vmem>>, vector<2x32xf32>
      %c0_12 = arith.constant 0 : index
      %c0_13 = arith.constant 0 : index
      %13 = vector.load %arg4[%c0_12, %c0_13] : memref<1x32xf32, #tpu.memory_space<vmem>>, vector<1x32xf32>
      %14 = vector.broadcast %13 : vector<1x32xf32> to vector<2x32xf32>
      %15 = arith.addf %12, %14 : vector<2x32xf32>
      %c0_14 = arith.constant 0 : index
      %c0_15 = arith.constant 0 : index
      %16 = vector.load %arg5[%c0_14, %c0_15] : memref<2x32xbf16, #tpu.memory_space<vmem>>, vector<2x32xbf16>
      %17 = arith.extf %16 : vector<2x32xbf16> to vector<2x32xf32>
      %18 = arith.addf %15, %17 : vector<2x32xf32>
      %cst_16 = arith.constant dense<0.000000e+00> : vector<2xf32>
      %19 = vector.multi_reduction <add>, %18, %cst_16 [1] : vector<2x32xf32> to vector<2xf32>
      %20 = vector.shape_cast %19 : vector<2xf32> to vector<2x1xf32>
      %cst_17 = arith.constant 3.200000e+01 : f32
      %21 = vector.broadcast %cst_17 : f32 to vector<2x1xf32>
      %22 = arith.divf %20, %21 : vector<2x1xf32>
      %23 = vector.broadcast %22 : vector<2x1xf32> to vector<2x32xf32>
      %24 = arith.subf %18, %23 : vector<2x32xf32>
      %25 = arith.mulf %24, %24 : vector<2x32xf32>
      %cst_18 = arith.constant dense<0.000000e+00> : vector<2xf32>
      %26 = vector.multi_reduction <add>, %25, %cst_18 [1] : vector<2x32xf32> to vector<2xf32>
      %27 = vector.shape_cast %26 : vector<2xf32> to vector<2x1xf32>
      %cst_19 = arith.constant 3.200000e+01 : f32
      %28 = vector.broadcast %cst_19 : f32 to vector<2x1xf32>
      %29 = arith.divf %27, %28 : vector<2x1xf32>
      %30 = vector.broadcast %22 : vector<2x1xf32> to vector<2x32xf32>
      %31 = arith.subf %18, %30 : vector<2x32xf32>
      %cst_20 = arith.constant 9.99999996E-13 : f32
      %32 = vector.broadcast %cst_20 : f32 to vector<2x1xf32>
      %33 = arith.addf %29, %32 : vector<2x1xf32>
      %34 = math.rsqrt %33 : vector<2x1xf32>
      %35 = vector.broadcast %34 : vector<2x1xf32> to vector<2x32xf32>
      %36 = arith.mulf %31, %35 : vector<2x32xf32>
      %c0_21 = arith.constant 0 : index
      %c0_22 = arith.constant 0 : index
      %37 = vector.load %arg6[%c0_21, %c0_22] : memref<1x32xf32, #tpu.memory_space<vmem>>, vector<1x32xf32>
      %38 = vector.broadcast %37 : vector<1x32xf32> to vector<2x32xf32>
      %39 = arith.mulf %36, %38 : vector<2x32xf32>
      %c0_23 = arith.constant 0 : index
      %c0_24 = arith.constant 0 : index
      %40 = vector.load %arg7[%c0_23, %c0_24] : memref<1x32xf32, #tpu.memory_space<vmem>>, vector<1x32xf32>
      %41 = vector.broadcast %40 : vector<1x32xf32> to vector<2x32xf32>
      %42 = arith.addf %39, %41 : vector<2x32xf32>
      %43 = arith.truncf %42 : vector<2x32xf32> to vector<2x32xbf16>
      %c0_25 = arith.constant 0 : index
      %c0_26 = arith.constant 0 : index
      %44 = vector.load %arg8[%c0_25, %c0_26] : memref<2x32xbf16, #tpu.memory_space<vmem>>, vector<2x32xbf16>
      tpu.vector_store %arg8[%c0_25, %c0_26], %43 {strides = array<i32>} : memref<2x32xbf16, #tpu.memory_space<vmem>>, vector<2x32xbf16>,
    } else {
    }
    return
  }
  func.func @transform_0(%arg0: i32, %arg1: i32) -> (i32, i32) {
    %c0_i32 = arith.constant 0 : i32
    return %arg0, %arg1 : i32, i32
  }
  func.func @transform_1(%arg0: i32, %arg1: i32) -> (i32, i32) {
    %c0_i32 = arith.constant 0 : i32
    %c0_i32_0 = arith.constant 0 : i32
    return %arg1, %c0_i32 : i32, i32
  }
  func.func @transform_2(%arg0: i32, %arg1: i32) -> (i32, i32) {
    %c0_i32 = arith.constant 0 : i32
    %c0_i32_0 = arith.constant 0 : i32
    %c0_i32_1 = arith.constant 0 : i32
    return %c0_i32, %c0_i32_0 : i32, i32
  }
  func.func @transform_3(%arg0: i32, %arg1: i32) -> (i32, i32) {
    %c0_i32 = arith.constant 0 : i32
    %c0_i32_0 = arith.constant 0 : i32
    return %arg0, %c0_i32 : i32, i32
  }
  func.func @transform_4(%arg0: i32, %arg1: i32) -> (i32, i32) {
    %c0_i32 = arith.constant 0 : i32
    %c0_i32_0 = arith.constant 0 : i32
    %c0_i32_1 = arith.constant 0 : i32
    return %c0_i32, %c0_i32_0 : i32, i32
  }
  func.func @transform_5(%arg0: i32, %arg1: i32) -> (i32, i32) {
    %c0_i32 = arith.constant 0 : i32
    %c0_i32_0 = arith.constant 0 : i32
    %c0_i32_1 = arith.constant 0 : i32
    return %c0_i32, %c0_i32_0 : i32, i32
  }
  func.func @transform_6(%arg0: i32, %arg1: i32) -> (i32, i32) {
    %c0_i32 = arith.constant 0 : i32
    %c0_i32_0 = arith.constant 0 : i32
    return %arg0, %c0_i32 : i32, i32
  }
}

module attributes {stable_mosaic.version = 11 : i64} {
  func.func @_cls_score_kernel(%arg0: i32, %arg1: memref<2x32xbf16, #tpu.memory_space<vmem>>, %arg2: memref<1x32xbf16, #tpu.memory_space<vmem>>, %arg3: memref<1x1xf32, #tpu.memory_space<vmem>>, %arg4: memref<2x1xf32, #tpu.memory_space<vmem>>) attributes {dimension_semantics = [#tpu.dimension_semantics<arbitrary>], iteration_bounds = array<i64: 1>, scalar_prefetch = 0 : i64, scratch_operands = 0 : i64, tpu.core_type = #tpu.core_type<tc>, window_params = [{pipeline_mode = #tpu.pipeline_mode<synchronous>, transform_indices = @transform_0, window_bounds = array<i64: 2, 32>}, {pipeline_mode = #tpu.pipeline_mode<synchronous>, transform_indices = @transform_1, window_bounds = array<i64: 1, 32>}, {pipeline_mode = #tpu.pipeline_mode<synchronous>, transform_indices = @transform_2, window_bounds = array<i64: 1, 1>}, {pipeline_mode = #tpu.pipeline_mode<synchronous>, transform_indices = @transform_3, window_bounds = array<i64: 2, 1>}]} {
    %c0 = arith.constant 0 : index
    %c0_0 = arith.constant 0 : index
    %0 = vector.load %arg1[%c0, %c0_0] : memref<2x32xbf16, #tpu.memory_space<vmem>>, vector<2x32xbf16>
    %1 = arith.extf %0 : vector<2x32xbf16> to vector<2x32xf32>
    %c0_1 = arith.constant 0 : index
    %c0_2 = arith.constant 0 : index
    %2 = vector.load %arg2[%c0_1, %c0_2] : memref<1x32xbf16, #tpu.memory_space<vmem>>, vector<1x32xbf16>
    %3 = arith.extf %2 : vector<1x32xbf16> to vector<1x32xf32>
    %4 = vector.broadcast %3 : vector<1x32xf32> to vector<2x32xf32>
    %5 = arith.mulf %1, %4 : vector<2x32xf32>
    %cst = arith.constant dense<0.000000e+00> : vector<2xf32>
    %6 = vector.multi_reduction <add>, %5, %cst [1] : vector<2x32xf32> to vector<2xf32>
    %7 = vector.shape_cast %6 : vector<2xf32> to vector<2x1xf32>
    %c0_3 = arith.constant 0 : index
    %c0_4 = arith.constant 0 : index
    %8 = vector.load %arg3[%c0_3, %c0_4] : memref<1x1xf32, #tpu.memory_space<vmem>>, vector<1x1xf32>
    %9 = vector.broadcast %8 : vector<1x1xf32> to vector<2x1xf32>
    %10 = arith.addf %7, %9 : vector<2x1xf32>
    %c0_5 = arith.constant 0 : index
    %c0_6 = arith.constant 0 : index
    %11 = vector.load %arg4[%c0_5, %c0_6] : memref<2x1xf32, #tpu.memory_space<vmem>>, vector<2x1xf32>
    tpu.vector_store %arg4[%c0_5, %c0_6], %10 {strides = array<i32>} : memref<2x1xf32, #tpu.memory_space<vmem>>, vector<2x1xf32>,
    return
  }
  func.func @transform_0(%arg0: i32) -> (i32, i32) {
    %c0_i32 = arith.constant 0 : i32
    %c0_i32_0 = arith.constant 0 : i32
    %c0_i32_1 = arith.constant 0 : i32
    return %c0_i32, %c0_i32_0 : i32, i32
  }
  func.func @transform_1(%arg0: i32) -> (i32, i32) {
    %c0_i32 = arith.constant 0 : i32
    %c0_i32_0 = arith.constant 0 : i32
    %c0_i32_1 = arith.constant 0 : i32
    return %c0_i32, %c0_i32_0 : i32, i32
  }
  func.func @transform_2(%arg0: i32) -> (i32, i32) {
    %c0_i32 = arith.constant 0 : i32
    %c0_i32_0 = arith.constant 0 : i32
    %c0_i32_1 = arith.constant 0 : i32
    return %c0_i32, %c0_i32_0 : i32, i32
  }
  func.func @transform_3(%arg0: i32) -> (i32, i32) {
    %c0_i32 = arith.constant 0 : i32
    %c0_i32_0 = arith.constant 0 : i32
    %c0_i32_1 = arith.constant 0 : i32
    return %c0_i32, %c0_i32_0 : i32, i32
  }
}

</mosaic_0001>

<bundles_post_ra>
// kernel: cross_encoder_forward.12
= control target key start
LH: loop header
LB: loop body
LE: loop exit
PB: predicated region body
PF: predicated region fallthrough
CT: control target
= control target key end

     0   :  { %vm16_vm0 = vcmask 261120   ;;  %vm70_vm1 = vcmask 257024   ;;  %s129_s0 = inlined_call_operand.vmem [shape: f32[16,32], index: 0, kind: input, shape index: {}]   ;;  %s130_s1 = inlined_call_operand.vmem [shape: f32[1,32], index: 1, kind: input, shape index: {}]   ;;  %s131_s2 = inlined_call_operand.vmem [shape: f32[1,32], index: 2, kind: input, shape index: {}]   ;;  %s132_s3 = inlined_call_operand.vmem [shape: bf16[16,32], index: 3, kind: output, shape index: {}]  }
   0x1   :  { %v14_v0 = vld [vmem:[%s129_s0] sm:$0xff]  ;;  %v15_v1 = vld [vmem:[%s129_s0 + $0x8] sm:$0xff] }
   0x2   :  { %v17_v2 = vsel %vm16_vm0, %v14_v0, 0.0  ;;  %v20_v3 = vsel %vm16_vm0, %v15_v1, 0.0  ;;  %v77_v21 = vld [vmem:[%s130_s1] ss:$0 sm:$0xff] }
   0x3   :  { %18 = vadd.xlane.f32.xlu0 %v17_v2  ;;  %v78_v23 = vld [vmem:[%s131_s2] ss:$0 sm:$0xff] }
   0x7   :  { %21 = vadd.xlane.f32.xlu0 %v20_v3 }
  0x8c   :  { %v19_v4 = vpop.xlane.xlu0 %18 }
  0x8d   :  { %v24_v5 = vmul.f32 0.03125, %v19_v4 }
  0x8f   :  { %v26_v6 = vsub.f32 %v14_v0, %v24_v5 }
  0x90   :  { %v22_v7 = vpop.xlane.xlu0 %21 }
  0x91   :  { %v25_v8 = vmul.f32 0.03125, %v22_v7  ;;  %v28_v9 = vmul.f32 %v26_v6, %v26_v6 }
  0x93   :  { %v27_v10 = vsub.f32 %v15_v1, %v25_v8  ;;  %v30_v11 = vsel %vm16_vm0, %v28_v9, 0.0 }
  0x94   :  { %31 = vadd.xlane.f32.xlu1 %v30_v11 }
  0x95   :  { %v29_v12 = vmul.f32 %v27_v10, %v27_v10 }
  0x97   :  { %v33_v13 = vsel %vm16_vm0, %v29_v12, 0.0 }
  0x98   :  { %34 = vadd.xlane.f32.xlu1 %v33_v13 }
 0x11d   :  { %v32_v14 = vpop.xlane.xlu1 %31 }
 0x11e   :  { %v36_v15 = vmul.f32 0.03125, %v32_v14 }
 0x120   :  { %v38_v16 = vadd.f32 1e-12, %v36_v15 }
 0x121   :  { %v35_v17 = vpop.xlane.xlu1 %34 }
 0x122   :  { %83 = vrsqrt.f32 %v38_v16  ;;  %v37_v18 = vmul.f32 0.03125, %v35_v17 }
 0x124   :  { %v39_v19 = vadd.f32 1e-12, %v37_v18 }
 0x126   :  { %85 = vrsqrt.f32 %v39_v19 }
 0x12f   :  { %v84_v20 = vpop.eup %83 }
 0x130   :  { %v42_v22 = vmul.f32 %v84_v20, %v26_v6 }
 0x132   :  { %v51_v24 = vmul.f32 %v77_v21, %v42_v22 }
 0x133   :  { %v86_v25 = vpop.eup %85 }
 0x134   :  { %v60_v26 = vadd.f32 %v78_v23, %v51_v24  ;;  %v43_v27 = vmul.f32 %v86_v25, %v27_v10 }
 0x136   :  { %v81_v28 = vpack.c.bf16 %v60_v26, %v60_v26  ;;  %v52_v29 = vmul.f32 %v77_v21, %v43_v27 }
 0x138   :  { %71 = vst.msk [vmem:[%s132_s3] sm:$0xf] %vm70_vm1, %v81_v28  ;;  %v61_v30 = vadd.f32 %v78_v23, %v52_v29 }
 0x13a   :  { %v82_v31 = vpack.c.bf16 %v61_v30, %v61_v30 }
 0x13c   :  { %72 = vst.msk [vmem:[%s132_s3 + $0x4] sm:$0xf] %vm70_vm1, %v82_v31 }

// kernel: cross_encoder_forward.15
= control target key start
LH: loop header
LB: loop body
LE: loop exit
PB: predicated region body
PF: predicated region fallthrough
CT: control target
= control target key end

     0   :  { %vm28_vm0 = vcmask 261120   ;;  %v220_v0 = vmov 0.0   ;;  %vm221_vm1 = vmmov 0   ;;  %vm178_vm2 = vcmask 257024   ;;  %s293_s1 = inlined_call_operand.vmem [shape: bf16[32,32], index: 1, kind: input, shape index: {}]   ;;  %s294_s0 = inlined_call_operand.vmem [shape: bf16[16,32], index: 0, kind: input, shape index: {}]   ;;  %s295_s3 = inlined_call_operand.vmem [shape: bf16[16,32], index: 3, kind: input, shape index: {}]   ;;  %s296_s2 = inlined_call_operand.vmem [shape: f32[1,32], index: 2, kind: input, shape index: {}]   ;;  %s297_s4 = inlined_call_operand.vmem [shape: f32[1,32], index: 4, kind: input, shape index: {}]   ;;  %s298_s5 = inlined_call_operand.vmem [shape: f32[1,32], index: 5, kind: input, shape index: {}]   ;;  %s299_s6 = inlined_call_operand.vmem [shape: bf16[16,32], index: 6, kind: output, shape index: {}]  }
   0x1   :  { %203 = vmatprep.subr.bf16.mxu0 %v220_v0  ;;  %v213_v1 = vld [vmem:[%s293_s1 + $0x8] sm:$0xff]   ;;  %207 = vmatprep.mubr.msk.bf16.mxu0 %vm221_vm1, %v220_v0  ;;  %29 = vst.msk [vmem:[#allocation2] sm:$0xff] %vm28_vm0, %v220_v0  ;;  %30 = vst.msk [vmem:[#allocation2 + $0x8] sm:$0xff] %vm28_vm0, %v220_v0  ;;  %v214_v2 = vld [vmem:[%s293_s1] sm:$0xff]  }
   0x2   :  { %204 = vmatpush3.bf16.msra.mxu0 %v213_v1  ;;  %v215_v3 = vld [vmem:[%s294_s0] sm:$0xff]  }
   0x3   :  { %205 = vmatprep.subr.bf16.mxu0 %v220_v0  ;;  %v197_v12 = vld [vmem:[%s295_s3] sm:$0xff]  }
   0x4   :  { %v189_v13 = vld [vmem:[%s296_s2] ss:$0 sm:$0xff]  ;;  %v198_v14 = vunpack.c.l.bf16 %v197_v12  ;;  %v199_v18 = vunpack.c.h.bf16 %v197_v12 }
   0x5   :  { %v190_v41 = vld [vmem:[%s297_s4] ss:$0 sm:$0xff] }
   0x6   :  { %206 = vmatpush3.bf16.msra.mxu0 %v214_v2  ;;  %v191_v43 = vld [vmem:[%s298_s5] ss:$0 sm:$0xff] }
   0x8   :  { %v31_v4 = vld [vmem:[#allocation2] sm:$0xff]  ;;  %v32_v8 = vld [vmem:[#allocation2 + $0x8] sm:$0xff] }
   0x9   :  { %208 = vmatmul.mubr.msk.bf16.vlgmr.msra.gmra.mxu0 %vm28_vm0, %v215_v3 }
  0xc9   :  { %v94_v5 = vpop.f32.mrf.mxu0 }
  0xca   :  { %v101_v6 = vadd.f32 %v94_v5, %v31_v4 }
  0xcb   :  { %v209_v7 = vpop.f32.mrf.mxu0 }
  0xcc   :  { %103 = vst.msk [vmem:[#allocation2] sm:$0xff] %vm28_vm0, %v101_v6 }
  0xcd   :  { %v97_v9 = vpop.f32.mrf.mxu0 }
  0xce   :  { %v102_v10 = vadd.f32 %v97_v9, %v32_v8 }
  0xcf   :  { %v210_v11 = vpop.f32.mrf.mxu0 }
  0xd0   :  { %104 = vst.msk [vmem:[#allocation2 + $0x8] sm:$0xff] %vm28_vm0, %v102_v10 }
  0xd3   :  { %v108_v15 = vld [vmem:[#allocation2] sm:$0xff] }
  0xd4   :  { %v117_v16 = vadd.f32 %v189_v13, %v108_v15 }
  0xd6   :  { %v123_v17 = vadd.f32 %v198_v14, %v117_v16 }
  0xd7   :  { %v109_v19 = vld [vmem:[#allocation2 + $0x8] sm:$0xff] }
  0xd8   :  { %v125_v20 = vsel %vm28_vm0, %v123_v17, 0.0  ;;  %v118_v21 = vadd.f32 %v189_v13, %v109_v19 }
  0xd9   :  { %126 = vadd.xlane.f32.xlu0 %v125_v20 }
  0xda   :  { %v124_v22 = vadd.f32 %v199_v18, %v118_v21 }
  0xdc   :  { %v128_v23 = vsel %vm28_vm0, %v124_v22, 0.0 }
  0xdd   :  { %129 = vadd.xlane.f32.xlu0 %v128_v23 }
 0x162   :  { %v127_v24 = vpop.xlane.xlu0 %126 }
 0x163   :  { %v132_v25 = vmul.f32 0.03125, %v127_v24 }
 0x165   :  { %v134_v26 = vsub.f32 %v123_v17, %v132_v25 }
 0x166   :  { %v130_v27 = vpop.xlane.xlu0 %129 }
 0x167   :  { %v133_v28 = vmul.f32 0.03125, %v130_v27  ;;  %v136_v29 = vmul.f32 %v134_v26, %v134_v26 }
 0x169   :  { %v135_v30 = vsub.f32 %v124_v22, %v133_v28  ;;  %v138_v31 = vsel %vm28_vm0, %v136_v29, 0.0 }
 0x16a   :  { %139 = vadd.xlane.f32.xlu1 %v138_v31 }
 0x16b   :  { %v137_v32 = vmul.f32 %v135_v30, %v135_v30 }
 0x16d   :  { %v141_v33 = vsel %vm28_vm0, %v137_v32, 0.0 }
 0x16e   :  { %142 = vadd.xlane.f32.xlu1 %v141_v33 }
 0x1f3   :  { %v140_v34 = vpop.xlane.xlu1 %139 }
 0x1f4   :  { %v144_v35 = vmul.f32 0.03125, %v140_v34 }
 0x1f6   :  { %v146_v36 = vadd.f32 1e-12, %v144_v35 }
 0x1f7   :  { %v143_v37 = vpop.xlane.xlu1 %142 }
 0x1f8   :  { %216 = vrsqrt.f32 %v146_v36  ;;  %v145_v38 = vmul.f32 0.03125, %v143_v37 }
 0x1fa   :  { %v147_v39 = vadd.f32 1e-12, %v145_v38 }
 0x1fc   :  { %218 = vrsqrt.f32 %v147_v39 }
 0x205   :  { %v217_v40 = vpop.eup %216 }
 0x206   :  { %v150_v42 = vmul.f32 %v217_v40, %v134_v26 }
 0x208   :  { %v159_v44 = vmul.f32 %v190_v41, %v150_v42 }
 0x209   :  { %v219_v45 = vpop.eup %218 }
 0x20a   :  { %v168_v46 = vadd.f32 %v191_v43, %v159_v44  ;;  %v151_v47 = vmul.f32 %v219_v45, %v135_v30 }
 0x20c   :  { %v194_v48 = vpack.c.bf16 %v168_v46, %v168_v46  ;;  %v160_v49 = vmul.f32 %v190_v41, %v151_v47 }
 0x20e   :  { %179 = vst.msk [vmem:[%s299_s6] sm:$0xf] %vm178_vm2, %v194_v48  ;;  %v169_v50 = vadd.f32 %v191_v43, %v160_v49 }
 0x210   :  { %v195_v51 = vpack.c.bf16 %v169_v50, %v169_v50 }
 0x212   :  { %180 = vst.msk [vmem:[%s299_s6 + $0x4] sm:$0xf] %vm178_vm2, %v195_v51 }

// kernel: cross_encoder_forward.13
= control target key start
LH: loop header
LB: loop body
LE: loop exit
PB: predicated region body
PF: predicated region fallthrough
CT: control target
= control target key end

     0   :  { %vm19_vm0 = vcmask 261120   ;;  %v386_v0 = vmov 0.0   ;;  %vm387_vm1 = vmmov 0   ;;  %vm252_vm2 = vcmask 257024   ;;  %s480_s1 = inlined_call_operand.vmem [shape: bf16[3,32,32], index: 1, kind: input, shape index: {}]   ;;  %s481_s0 = inlined_call_operand.vmem [shape: bf16[16,32], index: 0, kind: input, shape index: {}]   ;;  %s482_s2 = inlined_call_operand.vmem [shape: f32[3,1,32], index: 2, kind: input, shape index: {}]   ;;  %s483_s3 = inlined_call_operand.vmem [shape: bf16[3,16,32], index: 3, kind: output, shape index: {}]  }
   0x1   :  { %353 = vmatprep.subr.bf16.mxu0 %v386_v0  ;;  %v379_v1 = vld [vmem:[%s480_s1 + $0x8] sm:$0xff]   ;;  %361 = vmatprep.subr.bf16.mxu1 %v386_v0  ;;  %20 = vst.msk [vmem:[#allocation2] sm:$0xff] %vm19_vm0, %v386_v0  ;;  %21 = vst.msk [vmem:[#allocation2 + $0x8] sm:$0xff] %vm19_vm0, %v386_v0  ;;  %v380_v2 = vld [vmem:[%s480_s1 + $0x18] sm:$0xff]  }
   0x2   :  { %22 = vst.msk [vmem:[#allocation2 + $0x10] sm:$0xff] %vm19_vm0, %v386_v0  ;;  %23 = vst.msk [vmem:[#allocation2 + $0x18] sm:$0xff] %vm19_vm0, %v386_v0  ;;  %357 = vmatprep.mubr.msk.bf16.mxu0 %vm387_vm1, %v386_v0  ;;  %365 = vmatprep.mubr.msk.bf16.mxu1 %vm387_vm1, %v386_v0  ;;  %v381_v3 = vld [vmem:[%s480_s1] sm:$0xff]   ;;  %v383_v4 = vld [vmem:[%s480_s1 + $0x10] sm:$0xff]  }
   0x3   :  { %24 = vst.msk [vmem:[#allocation2 + $0x20] sm:$0xff] %vm19_vm0, %v386_v0  ;;  %25 = vst.msk [vmem:[#allocation2 + $0x28] sm:$0xff] %vm19_vm0, %v386_v0  ;;  %354 = vmatpush3.bf16.msra.mxu0 %v379_v1  ;;  %362 = vmatpush3.bf16.msra.mxu1 %v380_v2  ;;  %v382_v5 = vld [vmem:[%s481_s0] sm:$0xff]   ;;  %v384_v6 = vld [vmem:[%s480_s1 + $0x28] sm:$0xff]  }
   0x4   :  { %355 = vmatprep.subr.bf16.mxu0 %v386_v0  ;;  %363 = vmatprep.subr.bf16.mxu1 %v386_v0  ;;  %v385_v7 = vld [vmem:[%s480_s1 + $0x20] sm:$0xff]  }
   0x5   :  { %v323_v25 = vld [vmem:[%s482_s2] ss:$0 sm:$0xff]  ;;  %v327_v27 = vld [vmem:[%s482_s2 + $0x1] ss:$0 sm:$0xff]  ;;  %v333_v44 = vld [vmem:[%s482_s2 + $0x2] ss:$0 sm:$0xff] }
   0x7   :  { %356 = vmatpush3.bf16.msra.mxu0 %v381_v3  ;;  %364 = vmatpush3.bf16.msra.mxu1 %v383_v4 }
   0x8   :  { %369 = vmatprep.subr.bf16.mxu0 %v386_v0  ;;  %v28_v8 = vld [vmem:[#allocation2] sm:$0xff]  ;;  %v29_v15 = vld [vmem:[#allocation2 + $0x8] sm:$0xff] }
   0x9   :  { %v101_v9 = vld [vmem:[#allocation2 + $0x10] sm:$0xff]  ;;  %v102_v17 = vld [vmem:[#allocation2 + $0x18] sm:$0xff] }
   0xa   :  { %358 = vmatmul.mubr.msk.bf16.vlgmr.msra.gmra.mxu0 %vm19_vm0, %v382_v5  ;;  %366 = vmatmul.mubr.msk.bf16.vlgmr.msra.gmra.mxu1 %vm19_vm0, %v382_v5  ;;  %v166_v23 = vld [vmem:[#allocation2 + $0x20] sm:$0xff]  ;;  %v167_v31 = vld [vmem:[#allocation2 + $0x28] sm:$0xff] }
   0xb   :  { %370 = vmatpush3.bf16.msra.mxu0 %v384_v6  ;;  %373 = vmatprep.mubr.msk.bf16.mxu0 %vm387_vm1, %v386_v0 }
   0xc   :  { %371 = vmatprep.subr.bf16.mxu0 %v386_v0 }
   0xf   :  { %372 = vmatpush3.bf16.msra.mxu0 %v385_v7 }
  0x12   :  { %374 = vmatmul.mubr.msk.bf16.vlgmr.msra.gmra.mxu0 %vm19_vm0, %v382_v5 }
  0xca   :  { %v89_v10 = vpop.f32.mrf.mxu0  ;;  %v154_v12 = vpop.f32.mrf.mxu1 }
  0xcb   :  { %v96_v11 = vadd.f32 %v89_v10, %v28_v8  ;;  %v161_v14 = vadd.f32 %v154_v12, %v101_v9 }
  0xcc   :  { %v359_v13 = vpop.f32.mrf.mxu0  ;;  %v367_v16 = vpop.f32.mrf.mxu1 }
  0xcd   :  { %98 = vst.msk [vmem:[#allocation2] sm:$0xff] %vm19_vm0, %v96_v11  ;;  %163 = vst.msk [vmem:[#allocation2 + $0x10] sm:$0xff] %vm19_vm0, %v161_v14 }
  0xce   :  { %v92_v18 = vpop.f32.mrf.mxu0  ;;  %v157_v20 = vpop.f32.mrf.mxu1 }
  0xcf   :  { %v97_v19 = vadd.f32 %v92_v18, %v29_v15  ;;  %v162_v22 = vadd.f32 %v157_v20, %v102_v17 }
  0xd0   :  { %v360_v21 = vpop.f32.mrf.mxu0  ;;  %v368_v24 = vpop.f32.mrf.mxu1 }
  0xd1   :  { %99 = vst.msk [vmem:[#allocation2 + $0x8] sm:$0xff] %vm19_vm0, %v97_v19  ;;  %164 = vst.msk [vmem:[#allocation2 + $0x18] sm:$0xff] %vm19_vm0, %v162_v22 }
  0xd2   :  { %v219_v26 = vpop.f32.mrf.mxu0 }
  0xd3   :  { %v226_v28 = vadd.f32 %v219_v26, %v166_v23 }
  0xd4   :  { %v233_v29 = vld [vmem:[#allocation2] sm:$0xff]  ;;  %v375_v30 = vpop.f32.mrf.mxu0  ;;  %v255_v33 = vld [vmem:[#allocation2 + $0x10] sm:$0xff] }
  0xd5   :  { %v242_v32 = vadd.f32 %v323_v25, %v233_v29  ;;  %228 = vst.msk [vmem:[#allocation2 + $0x20] sm:$0xff] %vm19_vm0, %v226_v28  ;;  %v265_v34 = vadd.f32 %v327_v27, %v255_v33 }
  0xd6   :  { %v222_v35 = vpop.f32.mrf.mxu0 }
  0xd7   :  { %v338_v36 = vpack.c.bf16 %v242_v32, %v242_v32  ;;  %v227_v37 = vadd.f32 %v222_v35, %v167_v31  ;;  %v340_v38 = vpack.c.bf16 %v265_v34, %v265_v34 }
  0xd8   :  { %v234_v39 = vld [vmem:[#allocation2 + $0x8] sm:$0xff]  ;;  %v376_v40 = vpop.f32.mrf.mxu0  ;;  %v256_v42 = vld [vmem:[#allocation2 + $0x18] sm:$0xff] }
  0xd9   :  { %253 = vst.msk [vmem:[%s483_s3] sm:$0xf] %vm252_vm2, %v338_v36  ;;  %v243_v41 = vadd.f32 %v323_v25, %v234_v39  ;;  %330 = vst.msk [vmem:[%s483_s3 + $0x8] sm:$0xf] %vm252_vm2, %v340_v38  ;;  %v266_v43 = vadd.f32 %v327_v27, %v256_v42 }
  0xda   :  { %229 = vst.msk [vmem:[#allocation2 + $0x28] sm:$0xff] %vm19_vm0, %v227_v37 }
  0xdb   :  { %v339_v45 = vpack.c.bf16 %v243_v41, %v243_v41  ;;  %v341_v46 = vpack.c.bf16 %v266_v43, %v266_v43 }
  0xdc   :  { %v278_v47 = vld [vmem:[#allocation2 + $0x20] sm:$0xff] }
  0xdd   :  { %254 = vst.msk [vmem:[%s483_s3 + $0x4] sm:$0xf] %vm252_vm2, %v339_v45  ;;  %v288_v48 = vadd.f32 %v333_v44, %v278_v47  ;;  %331 = vst.msk [vmem:[%s483_s3 + $0xc] sm:$0xf] %vm252_vm2, %v341_v46 }
  0xdf   :  { %v342_v49 = vpack.c.bf16 %v288_v48, %v288_v48 }
  0xe1   :  { %v279_v50 = vld [vmem:[#allocation2 + $0x28] sm:$0xff]  ;;  %336 = vst.msk [vmem:[%s483_s3 + $0x10] sm:$0xf] %vm252_vm2, %v342_v49 }
  0xe2   :  { %v289_v51 = vadd.f32 %v333_v44, %v279_v50 }
  0xe4   :  { %v343_v52 = vpack.c.bf16 %v289_v51, %v289_v51 }
  0xe6   :  { %337 = vst.msk [vmem:[%s483_s3 + $0x14] sm:$0xf] %vm252_vm2, %v343_v52 }

// kernel: cross_encoder_forward.14
= control target key start
LH: loop header
LB: loop body
LE: loop exit
PB: predicated region body
PF: predicated region fallthrough
CT: control target
= control target key end

     0   :  { %s1300_s15 = smov 0   ;;  %s1302_s16 = smov 0   ;;  %s1483_s0 = inlined_call_operand.vmem [shape: bf16[3,2,8,32], index: 0, kind: input, shape index: {}, may-alias: {0,1,2}]   ;;  %s1484_s1 = inlined_call_operand.vmem [shape: bf16[3,2,8,32], index: 1, kind: input, shape index: {}, may-alias: {0,1,2}]   ;;  %s1485_s2 = inlined_call_operand.vmem [shape: bf16[3,2,8,32], index: 2, kind: input, shape index: {}, may-alias: {0,1,2}]   ;;  %s1486_s3 = inlined_call_operand.vmem [shape: f32[2,1,8], index: 3, kind: input, shape index: {}]   ;;  %s1487_s4 = inlined_call_operand.vmem [shape: bf16[2,8,32], index: 4, kind: output, shape index: {}]  }
   0x1   :  { %s1304_s17 = smov 0  }
   0x2 LB: > { %s33_s18 = sadd.s32 1, %s1259_s16  ;;  %p1089_p0 = scmp.ge.s32.totalorder %s1263_s17, 1  ;;  %s1263_s17 = sphi %s1304_s17, %s14_s17   ;;  %s1259_s16 = sphi %s1302_s16, %s1489_s16   ;;  %s1255_s15 = sphi %s1300_s15, %s1488_s15  }
   0x3   : > { %p35_p1 = scmp.ge.s32.totalorder %s33_s18, 2  ;;  %p230_p2 = scmp.lt.s32.totalorder %s1263_s17, 3 }
   0x5   : > { %s1491_s18 = smov (%p35_p1, %s33_s18), 0  ;;  %p231_p3 = pnand %p1089_p0, %p230_p2 }
   0x6   : > { %p282_p4 = scmp.lt.s32.totalorder (!%p231_p3), %s1255_s15, 1  ;;  %s1269_s29 = smov (!%p231_p3), 120  }
   0x7   : > { %234 = sbr.rel (%p231_p3) target bundleno = 1413 (0x585), region = 36  ;;  %s1270_s30 = smov (!%p231_p3), 112  }
   0x8   : > { %s1271_s5 = smov (!%p231_p3), 104   ;;  %s1272_s12 = smov (!%p231_p3), 8  }
   0x9   : > { %s1273_s13 = smov (!%p231_p3), 16   ;;  %s1274_s14 = smov (!%p231_p3), 24  }
   0xc   : > { %vm332_vm0 = vcmask 64512   ;;  %v1265_v0 = vmov 0.0   ;;  %vm1266_vm1 = vmmov 0   ;;  %s1493_s15 = smov (!%p282_p4, %s1255_s15), 1  ;;  %vm323_vm2 = vcmask 7168  }
   0xd   : > { %1131 = vmatprep.subr.bf16.mxu0 %v1265_v0  ;;  %333 = vst.msk [vmem:[#allocation4] sm:$0xff] %vm332_vm0, %v1265_v0  ;;  %334 = vst.msk [vmem:[#allocation4 + $0x8] sm:$0xff] %vm332_vm0, %v1265_v0  ;;  %1133 = vmatprep.mubr.msk.bf16.mxu0 %vm1266_vm1, %v1265_v0  ;;  %s1332_s19 = sshll.u32 %s1493_s15, 2  ;;  %v1267_v7 = vmov -1e+30   ;;  %s310_s28 = scalar_lea.vmem %s1486_s3, %s1493_s15  ;;  %v1268_v15 = vmov 0  }
   0xe   : > { %335 = vst.msk [vmem:[#allocation4 + $0x10] sm:$0xff] %vm332_vm0, %v1265_v0  ;;  %336 = vst.msk [vmem:[#allocation4 + $0x18] sm:$0xff] %vm332_vm0, %v1265_v0  ;;  %1137 = vmatprep.subr.bf16.mxu1 %v1265_v0  ;;  %1139 = vmatprep.mubr.msk.bf16.mxu1 %vm1266_vm1, %v1265_v0  ;;  %s1019_s22 = scalar_lea.vmem %s1484_s1, %s1332_s19  ;;  %s288_s25 = scalar_lea.vmem %s1483_s0, %s1332_s19  ;;  %v1362_v8 = vld [vmem:[%s310_s28] ss:$0 sm:$0xff]  ;;  %vm432_vm3 = vcmask 1043456   ;;  %vm904_vm4 = vcmask 60416  }
   0xf   : > { %v1094_v1 = vld [vmem:[%s1019_s22 + $0x8] sm:$0xf]  ;;  %v338_v2 = vld [vmem:[%s288_s25] sm:$0xf]  ;;  %324 = vst.msk [vmem:[#allocation2] sm:$0xff] %vm323_vm2, %v1267_v7  ;;  %325 = vst.msk [vmem:[#allocation2 + $0x8] sm:$0xff] %vm323_vm2, %v1267_v7  ;;  %1213 = vset.pattern.permute.xlu0 %v1268_v15  ;;  %1214 = vset.pattern.permute.xlu1 %v1268_v15  ;;  %s1023_s8 = scalar_lea.vmem %s1485_s2, %s1332_s19  ;;  %s1467_s11 = scalar_lea.vmem %s1487_s4, %s1332_s19 }
  0x10   : > { %v355_v3 = vsel %vm332_vm0, %v1094_v1, 0  ;;  %v339_v4 = vunpack.c.l.bf16 %v338_v2  ;;  %326 = vst.msk [vmem:[#allocation2 + $0x10] sm:$0xff] %vm323_vm2, %v1267_v7  ;;  %327 = vst.msk [vmem:[#allocation2 + $0x18] sm:$0xff] %vm323_vm2, %v1267_v7  ;;  %v1099_v16 = vcombine.low %v1094_v1, %v1094_v1  ;;  %v1386_v21 = vld [vmem:[%s1023_s8 + $0x10] sm:$0xf]  ;;  %vm922_vm5 = vcmask 126016  }
  0x11   : > { %1132 = vmatpush3.bf16.xpose.msra.mxu0 %v355_v3  ;;  %328 = vst.msk [vmem:[#allocation3] sm:$0xff] %vm323_vm2, %v1265_v0  ;;  %329 = vst.msk [vmem:[#allocation3 + $0x8] sm:$0xff] %vm323_vm2, %v1265_v0  ;;  %v434_v22 = vsel %vm432_vm3, %v1386_v21, 0  ;;  %v1101_v7 = vcombine.low %v1386_v21, %v1386_v21  ;;  %vm940_vm6 = vcmask 191616   ;;  %vm958_vm7 = vcmask 257216  }
  0x12   : > { %v340_v5 = vmul.f32 0.35355338, %v339_v4  ;;  %1149 = vmatprep.subr.bf16.mxu0 %v1265_v0  ;;  %330 = vst.msk [vmem:[#allocation3 + $0x10] sm:$0xff] %vm323_vm2, %v1265_v0  ;;  %331 = vst.msk [vmem:[#allocation3 + $0x18] sm:$0xff] %vm323_vm2, %v1265_v0  ;;  %485 = vrot.lane.b32.xlu1 %v1099_v16, %s1269_s29 }
  0x13   : > { %1138 = vmatpush3.bf16.msra.mxu1 %v434_v22 }
  0x14   : > { %v341_v6 = vpack.c.bf16 %v340_v5, %v340_v5  ;;  %1143 = vmatprep.subr.bf16.mxu1 %v1265_v0 }
  0x16   : > { %480 = vrot.lane.b32.xlu1 %v341_v6, %s1269_s29  ;;  %v1372_v17 = vld [vmem:[#allocation2] sm:$0xff]  ;;  %v534_v59 = vld [vmem:[#allocation2 + $0x8] sm:$0xff] }
  0x17   : > { %v1419_v63 = vld [vmem:[#allocation2 + $0x10] sm:$0xff]  ;;  %v807_v4 = vld [vmem:[#allocation2 + $0x18] sm:$0xff] }
  0x18   : > { %1134 = vmatmul.mubr.msk.bf16.vlgmr.msra.gmra.mxu0 %vm332_vm0, %v341_v6 }
  0x19   : > { %1151 = vmatprep.mubr.msk.bf16.mxu0 %vm1266_vm1, %v1265_v0 }
  0x1a   : > { %623 = vrot.lane.b32.xlu1 %v1099_v16, %s1270_s30 }
  0x1e   : > { %621 = vrot.lane.b32.xlu1 %v341_v6, %s1270_s30 }
  0x22   : > { %758 = vrot.lane.b32.xlu1 %v1099_v16, %s1271_s5 }
  0x26   : > { %756 = vrot.lane.b32.xlu1 %v341_v6, %s1271_s5 }
  0x84   : > { %v486_v26 = vpop.permute.xlu1 %485 }
  0x85   : > { %v491_v29 = vsel %vm332_vm0, %v486_v26, 0 }
  0x88   : > { %v481_v27 = vpop.permute.xlu1 %480 }
  0x8c   : > { %v624_v31 = vpop.permute.xlu1 %623 }
  0x8d   : > { %v629_v33 = vsel %vm332_vm0, %v624_v31, 0 }
  0x90   : > { %v622_v32 = vpop.permute.xlu1 %621 }
  0x94   : > { %v759_v34 = vpop.permute.xlu1 %758 }
  0x95   : > { %v764_v35 = vsel %vm332_vm0, %v759_v34, 0 }
  0x98   : > { %v757_v36 = vpop.permute.xlu1 %756 }
  0xd8   : > { %v391_v9 = vpop.f32.mrf.mxu0 }
  0xd9   : > { %v392_v10 = vadd.f32 %v1362_v8, %v391_v9 }
  0xda   : > { %v1135_v11 = vpop.f32.mrf.mxu0 }
  0xdb   : > { %v398_v12 = vsel %vm332_vm0, %v392_v10, -inf }
  0xdc   : > { %399 = vmax.xlane.f32.xlu0 %v398_v12  ;;  %v394_v13 = vpop.f32.mrf.mxu0 }
  0xde   : > { %v1136_v14 = vpop.f32.mrf.mxu0 }
 0x165   : > { %v400_v18 = vpop.xlane.xlu0 %399 }
 0x166   : > { %v1375_v19 = vmax.f32 %v1372_v17, %v400_v18 }
 0x168   : > { %v402_v20 = vsub.f32 %v1372_v17, %v1375_v19  ;;  %478 = vst.msk [vmem:[#allocation2] sm:$0xff] %vm323_vm2, %v1375_v19  ;;  %407 = vperm.xlu0 %1213, %v1375_v19  }
 0x1e3   : > { %v408_v23 = vpop.permute.xlu0 %407 }
 0x1e4   : > { %v410_v24 = vsub.f32 %v392_v10, %v408_v23 }
 0x1e6   : > { %v411_v25 = vmul.f32 1.442695, %v410_v24 }
 0x1e8   : > { %1217 = vpow2.f32 %v411_v25 }
 0x1f5   : > { %v1391_v28 = vpop.eup %1217 }
 0x1f6   : > { %v428_v30 = vpack.c.bf16 %v1391_v28, %v1391_v28  ;;  %v415_v9 = vsel %vm332_vm0, %v1391_v28, 0.0 }
 0x1f8   : > { %1140 = vmatmul.mubr.msk.bf16.vlgmr.msra.gmra.mxu1 %vm332_vm0, %v428_v30 }
 0x1f9   : > { %1144 = vmatpush3.bf16.xpose.msra.mxu1 %v491_v29  ;;  %1145 = vmatprep.mubr.msk.bf16.mxu1 %vm1266_vm1, %v1265_v0 }
 0x1fa   : > { %1155 = vmatprep.subr.bf16.mxu1 %v1265_v0 }
 0x200   : > { %1146 = vmatmul.mubr.msk.bf16.vlgmr.msra.gmra.mxu1 %vm332_vm0, %v481_v27 }
 0x201   : > { %1156 = vmatpush3.bf16.xpose.msra.mxu1 %v629_v33  ;;  %1157 = vmatprep.mubr.msk.bf16.mxu1 %vm1266_vm1, %v1265_v0 }
 0x202   : > { %1167 = vmatprep.subr.bf16.mxu1 %v1265_v0 }
 0x208   : > { %1158 = vmatmul.mubr.msk.bf16.vlgmr.msra.gmra.mxu1 %vm332_vm0, %v622_v32 }
 0x209   : > { %1168 = vmatpush3.bf16.xpose.msra.mxu1 %v764_v35  ;;  %1169 = vmatprep.mubr.msk.bf16.mxu1 %vm1266_vm1, %v1265_v0 }
 0x210   : > { %1170 = vmatmul.mubr.msk.bf16.vlgmr.msra.gmra.mxu1 %vm332_vm0, %v757_v36 }
 0x2b8   : > { %v1410_v37 = vpop.f32.mrf.mxu1 }
 0x2ba   : > { %v1141_v38 = vpop.f32.mrf.mxu1 }
 0x2bc   : > { %v473_v39 = vpop.f32.mrf.mxu1 }
 0x2be   : > { %v1142_v40 = vpop.f32.mrf.mxu1 }
 0x2bf   : > { %v403_v40 = vmul.f32 1.442695, %v402_v20  ;;  %v551_v20 = vld [vmem:[#allocation3 + $0x8] sm:$0xff] }
 0x2c0   : > { %v527_v41 = vpop.f32.mrf.mxu1 }
 0x2c1   : > { %v528_v42 = vadd.f32 %v1362_v8, %v527_v41 }
 0x2c2   : > { %v1147_v43 = vpop.f32.mrf.mxu1 }
 0x2c3   : > { %v535_v44 = vsel %vm332_vm0, %v528_v42, -inf }
 0x2c4   : > { %536 = vmax.xlane.f32.xlu1 %v535_v44  ;;  %v530_v45 = vpop.f32.mrf.mxu1 }
 0x2c5   : > { %v413_v45 = vld [vmem:[#allocation3] sm:$0xff] }
 0x2c6   : > { %v1148_v46 = vpop.f32.mrf.mxu1 }
 0x2c8   : > { %v665_v47 = vpop.f32.mrf.mxu1 }
 0x2c9   : > { %v666_v48 = vadd.f32 %v1362_v8, %v665_v47 }
 0x2ca   : > { %v1159_v49 = vpop.f32.mrf.mxu1 }
 0x2cb   : > { %v673_v50 = vsel %vm332_vm0, %v666_v48, -inf }
 0x2cc   : > { %674 = vmax.xlane.f32.xlu0 %v673_v50  ;;  %v668_v51 = vpop.f32.mrf.mxu1 }
 0x2ce   : > { %v1160_v52 = vpop.f32.mrf.mxu1 }
 0x2cf   : > { %v689_v52 = vld [vmem:[#allocation3 + $0x10] sm:$0xff] }
 0x2d0   : > { %v800_v53 = vpop.f32.mrf.mxu1 }
 0x2d1   : > { %v801_v54 = vadd.f32 %v1362_v8, %v800_v53 }
 0x2d2   : > { %v1171_v55 = vpop.f32.mrf.mxu1 }
 0x2d3   : > { %v808_v56 = vsel %vm332_vm0, %v801_v54, -inf }
 0x2d4   : > { %809 = vmax.xlane.f32.xlu1 %v808_v56  ;;  %v803_v57 = vpop.f32.mrf.mxu1 }
 0x2d5   : > { %v824_v57 = vld [vmem:[#allocation3 + $0x18] sm:$0xff] }
 0x2d6   : > { %v1172_v58 = vpop.f32.mrf.mxu1 }
 0x34d   : > { %v537_v60 = vpop.xlane.xlu1 %536 }
 0x34e   : > { %v538_v61 = vmax.f32 %v534_v59, %v537_v60 }
 0x350   : > { %v539_v62 = vsub.f32 %v534_v59, %v538_v61  ;;  %620 = vst.msk [vmem:[#allocation2 + $0x8] sm:$0xff] %vm323_vm2, %v538_v61  ;;  %544 = vperm.xlu1 %1214, %v538_v61  }
 0x352   : > { %v540_v30 = vmul.f32 1.442695, %v539_v62  ;;  %v421_v62 = vld [vmem:[#allocation4] sm:$0xff] }
 0x355   : > { %v675_v1 = vpop.xlane.xlu0 %674 }
 0x356   : > { %v1422_v2 = vmax.f32 %v1419_v63, %v675_v1 }
 0x358   : > { %v677_v3 = vsub.f32 %v1419_v63, %v1422_v2  ;;  %755 = vst.msk [vmem:[#allocation2 + $0x10] sm:$0xff] %vm323_vm2, %v1422_v2  ;;  %682 = vperm.xlu0 %1213, %v1422_v2  }
 0x35d   : > { %v810_v5 = vpop.xlane.xlu1 %809 }
 0x35e   : > { %v811_v6 = vmax.f32 %v807_v4, %v810_v5 }
 0x360   : > { %v812_v8 = vsub.f32 %v807_v4, %v811_v6  ;;  %890 = vst.msk [vmem:[#allocation2 + $0x18] sm:$0xff] %vm323_vm2, %v811_v6  ;;  %817 = vperm.xlu1 %1214, %v811_v6  }
 0x362   : > { %v813_v33 = vmul.f32 1.442695, %v812_v8 }
 0x364   : > { %570 = vrot.lane.b32.xlu1 %v1101_v7, %s1269_s29 }
 0x368   : > { %705 = vrot.lane.b32.xlu1 %v1101_v7, %s1270_s30 }
 0x36c   : > { %840 = vrot.lane.b32.xlu1 %v1101_v7, %s1271_s5  ;;  %v559_v7 = vld [vmem:[#allocation4 + $0x8] sm:$0xff] }
 0x390   : > { %416 = vadd.xlane.f32.xlu1 %v415_v9 }
 0x3cb   : > { %v545_v10 = vpop.permute.xlu1 %544 }
 0x3cc   : > { %v547_v11 = vsub.f32 %v528_v42, %v545_v10  ;;  %v678_v42 = vmul.f32 1.442695, %v677_v3 }
 0x3ce   : > { %v548_v12 = vmul.f32 1.442695, %v547_v11 }
 0x3d0   : > { %1219 = vpow2.f32 %v548_v12 }
 0x3d3   : > { %v683_v13 = vpop.permute.xlu0 %682 }
 0x3d4   : > { %v685_v14 = vsub.f32 %v666_v48, %v683_v13  ;;  %v697_v13 = vld [vmem:[#allocation4 + $0x10] sm:$0xff] }
 0x3d6   : > { %v686_v15 = vmul.f32 1.442695, %v685_v14 }
 0x3d8   : > { %1221 = vpow2.f32 %v686_v15 }
 0x3db   : > { %v818_v16 = vpop.permute.xlu1 %817 }
 0x3dc   : > { %v820_v18 = vsub.f32 %v801_v54, %v818_v16 }
 0x3dd   : > { %v1220_v21 = vpop.eup %1219 }
 0x3de   : > { %v821_v22 = vmul.f32 1.442695, %v820_v18  ;;  %v553_v23 = vsel %vm332_vm0, %v1220_v21, 0.0  ;;  %v566_v26 = vpack.c.bf16 %v1220_v21, %v1220_v21 }
 0x3df   : > { %554 = vadd.xlane.f32.xlu0 %v553_v23  ;;  %v571_v24 = vpop.permute.xlu1 %570 }
 0x3e0   : > { %1223 = vpow2.f32 %v821_v22  ;;  %v576_v25 = vsel %vm432_vm3, %v571_v24, 0 }
 0x3e1   : > { %1150 = vmatpush3.bf16.msra.mxu0 %v576_v25  ;;  %1225 = vpow2.f32 %v540_v30 }
 0x3e2   : > { %1161 = vmatprep.subr.bf16.mxu0 %v1265_v0  ;;  %1227 = vpow2.f32 %v813_v33 }
 0x3e3   : > { %v706_v27 = vpop.permute.xlu1 %705  ;;  %1229 = vpow2.f32 %v403_v40 }
 0x3e4   : > { %1152 = vmatmul.mubr.msk.bf16.vlgmr.msra.gmra.mxu0 %vm332_vm0, %v566_v26  ;;  %v711_v28 = vsel %vm432_vm3, %v706_v27, 0  ;;  %1231 = vpow2.f32 %v678_v42  ;;  %v832_v27 = vld [vmem:[#allocation4 + $0x18] sm:$0xff] }
 0x3e5   : > { %v1222_v29 = vpop.eup %1221  ;;  %1162 = vmatpush3.bf16.msra.mxu0 %v711_v28  ;;  %1163 = vmatprep.mubr.msk.bf16.mxu0 %vm1266_vm1, %v1265_v0 }
 0x3e6   : > { %v691_v31 = vsel %vm332_vm0, %v1222_v29, 0.0  ;;  %1173 = vmatprep.subr.bf16.mxu0 %v1265_v0  ;;  %v704_v34 = vpack.c.bf16 %v1222_v29, %v1222_v29 }
 0x3e7   : > { %692 = vadd.xlane.f32.xlu1 %v691_v31  ;;  %v841_v32 = vpop.permute.xlu1 %840 }
 0x3e8   : > { %v846_v35 = vsel %vm432_vm3, %v841_v32, 0 }
 0x3ec   : > { %1164 = vmatmul.mubr.msk.bf16.vlgmr.msra.gmra.mxu0 %vm332_vm0, %v704_v34 }
 0x3ed   : > { %v1224_v36 = vpop.eup %1223  ;;  %1174 = vmatpush3.bf16.msra.mxu0 %v846_v35  ;;  %1175 = vmatprep.mubr.msk.bf16.mxu0 %vm1266_vm1, %v1265_v0 }
 0x3ee   : > { %v826_v38 = vsel %vm332_vm0, %v1224_v36, 0.0  ;;  %v839_v39 = vpack.c.bf16 %v1224_v36, %v1224_v36  ;;  %v1226_v41 = vpop.eup %1225 }
 0x3ef   : > { %827 = vadd.xlane.f32.xlu0 %v826_v38  ;;  %v1228_v43 = vpop.eup %1227  ;;  %v552_v49 = vmul.f32 %v1226_v41, %v551_v20 }
 0x3f0   : > { %v1230_v44 = vpop.eup %1229  ;;  %v825_v58 = vmul.f32 %v1228_v43, %v824_v57 }
 0x3f1   : > { %v1232_v0 = vpop.eup %1231  ;;  %v414_v46 = vmul.f32 %v1230_v44, %v413_v45 }
 0x3f2   : > { %v690_v53 = vmul.f32 %v1232_v0, %v689_v52 }
 0x3f4   : > { %1176 = vmatmul.mubr.msk.bf16.vlgmr.msra.gmra.mxu0 %vm332_vm0, %v839_v39 }
 0x3f8   : > { %562 = vperm.xlu1 %1214, %v1226_v41  }
 0x3fc   : > { %835 = vperm.xlu1 %1214, %v1228_v43  }
 0x405   : > { %424 = vperm.xlu0 %1213, %v1230_v44  }
 0x409   : > { %700 = vperm.xlu0 %1213, %v1232_v0  }
 0x419   : > { %v417_v47 = vpop.xlane.xlu1 %416 }
 0x41a   : > { %v418_v48 = vadd.f32 %v417_v47, %v414_v46 }
 0x41c   : > { %420 = vst.msk [vmem:[#allocation3] sm:$0xff] %vm323_vm2, %v418_v48 }
 0x423   : > { %v895_v17 = vld [vmem:[#allocation3] sm:$0xff] }
 0x424   : > { %1233 = vrcp.f32 %v895_v17 }
 0x431   : > { %v1234_v19 = vpop.eup %1233 }
 0x432   : > { %899 = vperm.xlu1 %1214, %v1234_v19  }
 0x468   : > { %v555_v50 = vpop.xlane.xlu0 %554 }
 0x469   : > { %v556_v51 = vadd.f32 %v555_v50, %v552_v49 }
 0x46b   : > { %557 = vst.msk [vmem:[#allocation3 + $0x8] sm:$0xff] %vm323_vm2, %v556_v51 }
 0x470   : > { %v693_v54 = vpop.xlane.xlu1 %692 }
 0x471   : > { %v694_v55 = vadd.f32 %v693_v54, %v690_v53 }
 0x472   : > { %v907_v56 = vld [vmem:[#allocation3 + $0x8] sm:$0xff] }
 0x473   : > { %695 = vst.msk [vmem:[#allocation3 + $0x10] sm:$0xff] %vm323_vm2, %v694_v55  ;;  %1235 = vrcp.f32 %v907_v56 }
 0x474   : > { %v563_v8 = vpop.permute.xlu1 %562 }
 0x475   : > { %v565_v9 = vmul.f32 %v563_v8, %v559_v7 }
 0x478   : > { %v828_v59 = vpop.xlane.xlu0 %827 }
 0x479   : > { %v829_v60 = vadd.f32 %v828_v59, %v825_v58 }
 0x47a   : > { %v925_v61 = vld [vmem:[#allocation3 + $0x10] sm:$0xff] }
 0x47b   : > { %830 = vst.msk [vmem:[#allocation3 + $0x18] sm:$0xff] %vm323_vm2, %v829_v60  ;;  %1237 = vrcp.f32 %v925_v61 }
 0x480   : > { %v1236_v63 = vpop.eup %1235  ;;  %v425_v1 = vpop.permute.xlu0 %424 }
 0x481   : > { %v427_v2 = vmul.f32 %v425_v1, %v421_v62  ;;  %911 = vperm.xlu0 %1213, %v1236_v63  }
 0x482   : > { %v943_v3 = vld [vmem:[#allocation3 + $0x18] sm:$0xff] }
 0x483   : > { %v476_v4 = vadd.f32 %v1410_v37, %v427_v2  ;;  %1239 = vrcp.f32 %v943_v3  ;;  %v836_v37 = vpop.permute.xlu1 %835 }
 0x484   : > { %v701_v14 = vpop.permute.xlu0 %700  ;;  %v838_v31 = vmul.f32 %v836_v37, %v832_v27 }
 0x485   : > { %477 = vst.msk [vmem:[#allocation4] sm:$0xff] %vm332_vm0, %v476_v4  ;;  %v703_v18 = vmul.f32 %v701_v14, %v697_v13 }
 0x488   : > { %v1238_v5 = vpop.eup %1237 }
 0x489   : > { %929 = vperm.xlu0 %1213, %v1238_v5  }
 0x48c   : > { %v894_v23 = vld [vmem:[#allocation4] sm:$0xff] }
 0x490   : > { %v1240_v6 = vpop.eup %1239 }
 0x491   : > { %947 = vperm.xlu0 %1213, %v1240_v6  }
 0x4a4   : > { %v612_v10 = vpop.f32.mrf.mxu0 }
 0x4a5   : > { %v618_v11 = vadd.f32 %v612_v10, %v565_v9 }
 0x4a6   : > { %v1153_v12 = vpop.f32.mrf.mxu0 }
 0x4a7   : > { %619 = vst.msk [vmem:[#allocation4 + $0x8] sm:$0xff] %vm332_vm0, %v618_v11 }
 0x4a8   : > { %v615_v15 = vpop.f32.mrf.mxu0 }
 0x4aa   : > { %v1154_v16 = vpop.f32.mrf.mxu0 }
 0x4ac   : > { %v747_v21 = vpop.f32.mrf.mxu0 }
 0x4ad   : > { %v753_v22 = vadd.f32 %v747_v21, %v703_v18  ;;  %v900_v24 = vpop.permute.xlu1 %899 }
 0x4ae   : > { %v902_v25 = vmul.f32 %v900_v24, %v894_v23  ;;  %v1165_v26 = vpop.f32.mrf.mxu0  ;;  %v906_v39 = vld [vmem:[#allocation4 + $0x8] sm:$0xff] }
 0x4af   : > { %754 = vst.msk [vmem:[#allocation4 + $0x10] sm:$0xff] %vm332_vm0, %v753_v22 }
 0x4b0   : > { %v903_v28 = vpack.c.bf16 %v902_v25, %v902_v25  ;;  %v750_v29 = vpop.f32.mrf.mxu0 }
 0x4b2   : > { %905 = vst.msk [vmem:[%s1467_s11] sm:$0xf] %vm904_vm4, %v903_v28  ;;  %v1166_v30 = vpop.f32.mrf.mxu0 }
 0x4b4   : > { %v882_v32 = vpop.f32.mrf.mxu0 }
 0x4b5   : > { %v888_v33 = vadd.f32 %v882_v32, %v838_v31 }
 0x4b6   : > { %v1177_v34 = vpop.f32.mrf.mxu0  ;;  %v924_v43 = vld [vmem:[#allocation4 + $0x10] sm:$0xff] }
 0x4b7   : > { %889 = vst.msk [vmem:[#allocation4 + $0x18] sm:$0xff] %vm332_vm0, %v888_v33 }
 0x4b8   : > { %v885_v35 = vpop.f32.mrf.mxu0 }
 0x4ba   : > { %v1178_v36 = vpop.f32.mrf.mxu0 }
 0x4be   : > { %v942_v46 = vld [vmem:[#allocation4 + $0x18] sm:$0xff] }
 0x4fc   : > { %v912_v38 = vpop.permute.xlu0 %911 }
 0x4fd   : > { %v914_v40 = vmul.f32 %v912_v38, %v906_v39 }
 0x4ff   : > { %v1112_v41 = vpack.c.bf16 %v914_v40, %v914_v40 }
 0x501   : > { %919 = vrot.lane.b32.xlu1 %v1112_v41, %s1272_s12 }
 0x504   : > { %v930_v42 = vpop.permute.xlu0 %929 }
 0x505   : > { %v932_v44 = vmul.f32 %v930_v42, %v924_v43 }
 0x507   : > { %v1113_v0 = vpack.c.bf16 %v932_v44, %v932_v44 }
 0x509   : > { %937 = vrot.lane.b32.xlu1 %v1113_v0, %s1273_s13 }
 0x50c   : > { %v948_v45 = vpop.permute.xlu0 %947 }
 0x50d   : > { %v950_v47 = vmul.f32 %v948_v45, %v942_v46 }
 0x50f   : > { %v1114_v48 = vpack.c.bf16 %v950_v47, %v950_v47 }
 0x511   : > { %955 = vrot.lane.b32.xlu1 %v1114_v48, %s1274_s14 }
 0x573   : > { %v920_v17 = vpop.permute.xlu1 %919 }
 0x574   : > { %923 = vst.msk [vmem:[%s1467_s11] sm:$0xf] %vm922_vm5, %v920_v17 }
 0x57b   : > { %v938_v19 = vpop.permute.xlu1 %937 }
 0x57c   : > { %941 = vst.msk [vmem:[%s1467_s11] sm:$0xf] %vm940_vm6, %v938_v19 }
 0x583   : > { %v956_v20 = vpop.permute.xlu1 %955 }
 0x584   : > { %959 = vst.msk [vmem:[%s1467_s11] sm:$0xf] %vm958_vm7, %v956_v20 }
 0x585 PF: > { %s14_s17 = sadd.s32 1, %s1263_s17   ;;  %s1488_s15 = smov %s1259_s16 }
 0x586   : > { %p11_p5 = scmp.ge.s32.totalorder %s14_s17, 4   ;;  %s1489_s16 = smov %s1491_s18 }
 0x588   :  { %13 = sbr.rel (!%p11_p5) target bundleno = 2 (0x2), region = 92 }

// kernel: cross_encoder_forward.16
= control target key start
LH: loop header
LB: loop body
LE: loop exit
PB: predicated region body
PF: predicated region fallthrough
CT: control target
= control target key end

     0   :  { %vm19_vm0 = vcmask 523264   ;;  %v173_v0 = vmov 0.0   ;;  %vm174_vm1 = vmmov 0   ;;  %vm47_vm2 = vcmask 261120   ;;  %s217_s1 = inlined_call_operand.vmem [shape: bf16[32,64], index: 1, kind: input, shape index: {}]   ;;  %s218_s0 = inlined_call_operand.vmem [shape: bf16[16,32], index: 0, kind: input, shape index: {}]   ;;  %s219_s2 = inlined_call_operand.vmem [shape: f32[1,64], index: 2, kind: input, shape index: {}]   ;;  %s220_s3 = inlined_call_operand.vmem [shape: bf16[16,64], index: 3, kind: output, shape index: {}]  }
   0x1   :  { %156 = vmatprep.subr.bf16.mxu0 %v173_v0  ;;  %v166_v1 = vld [vmem:[%s217_s1 + $0x8] sm:$0xff]   ;;  %160 = vmatprep.mubr.msk.bf16.mxu0 %vm174_vm1, %v173_v0  ;;  %20 = vst.msk [vmem:[#allocation2] sm:$0xff] %vm19_vm0, %v173_v0  ;;  %21 = vst.msk [vmem:[#allocation2 + $0x8] sm:$0xff] %vm19_vm0, %v173_v0  ;;  %v167_v2 = vld [vmem:[%s217_s1] sm:$0xff]   ;;  %vm137_vm3 = vcmask 519168  }
   0x2   :  { %157 = vmatpush3.bf16.msra.mxu0 %v166_v1  ;;  %v168_v3 = vld [vmem:[%s218_s0] sm:$0xff]  }
   0x3   :  { %158 = vmatprep.subr.bf16.mxu0 %v173_v0  ;;  %v148_v12 = vld [vmem:[%s219_s2] ss:$0 sm:$0xff] }
   0x6   :  { %159 = vmatpush3.bf16.msra.mxu0 %v167_v2 }
   0x8   :  { %v22_v4 = vld [vmem:[#allocation2] sm:$0xff]  ;;  %v23_v8 = vld [vmem:[#allocation2 + $0x8] sm:$0xff] }
   0x9   :  { %161 = vmatmul.mubr.msk.bf16.vlgmr.msra.gmra.mxu0 %vm47_vm2, %v168_v3 }
  0xc9   :  { %v85_v5 = vpop.f32.mrf.mxu0 }
  0xca   :  { %v92_v6 = vadd.f32 %v85_v5, %v22_v4 }
  0xcb   :  { %v162_v7 = vpop.f32.mrf.mxu0 }
  0xcc   :  { %95 = vst.msk [vmem:[#allocation2] sm:$0xff] %vm19_vm0, %v92_v6 }
  0xcd   :  { %v88_v9 = vpop.f32.mrf.mxu0 }
  0xce   :  { %v93_v10 = vadd.f32 %v88_v9, %v23_v8 }
  0xcf   :  { %v163_v11 = vpop.f32.mrf.mxu0 }
  0xd0   :  { %96 = vst.msk [vmem:[#allocation2 + $0x8] sm:$0xff] %vm19_vm0, %v93_v10 }
  0xd3   :  { %v100_v13 = vld [vmem:[#allocation2] sm:$0xff] }
  0xd4   :  { %v109_v14 = vadd.f32 %v148_v12, %v100_v13 }
  0xd6   :  { %v111_v15 = vmul.f32 %v109_v14, %v109_v14 }
  0xd7   :  { %v101_v16 = vld [vmem:[#allocation2 + $0x8] sm:$0xff] }
  0xd8   :  { %v113_v17 = vmul.f32 %v111_v15, %v109_v14  ;;  %v110_v18 = vadd.f32 %v148_v12, %v101_v16 }
  0xda   :  { %v115_v19 = vmul.f32 0.044715, %v113_v17  ;;  %v112_v20 = vmul.f32 %v110_v18, %v110_v18 }
  0xdc   :  { %v117_v21 = vadd.f32 %v115_v19, %v109_v14  ;;  %v114_v22 = vmul.f32 %v112_v20, %v110_v18 }
  0xde   :  { %v119_v23 = vmul.f32 0.7978846, %v117_v21  ;;  %v116_v24 = vmul.f32 0.044715, %v114_v22 }
  0xe0   :  { %169 = vtanh.f32 %v119_v23  ;;  %v118_v25 = vadd.f32 %v116_v24, %v110_v18 }
  0xe2   :  { %v120_v26 = vmul.f32 0.7978846, %v118_v25 }
  0xe4   :  { %171 = vtanh.f32 %v120_v26 }
  0xed   :  { %v170_v27 = vpop.eup %169 }
  0xee   :  { %v123_v28 = vadd.f32 1.0, %v170_v27 }
  0xf0   :  { %v125_v29 = vmul.f32 0.5, %v123_v28 }
  0xf1   :  { %v172_v30 = vpop.eup %171 }
  0xf2   :  { %v127_v31 = vmul.f32 %v125_v29, %v109_v14  ;;  %v124_v32 = vadd.f32 1.0, %v172_v30 }
  0xf4   :  { %v151_v33 = vpack.c.bf16 %v127_v31, %v127_v31  ;;  %v126_v34 = vmul.f32 0.5, %v124_v32 }
  0xf6   :  { %138 = vst.msk [vmem:[%s220_s3] sm:$0xf] %vm137_vm3, %v151_v33  ;;  %v128_v35 = vmul.f32 %v126_v34, %v110_v18 }
  0xf8   :  { %v152_v36 = vpack.c.bf16 %v128_v35, %v128_v35 }
  0xfa   :  { %139 = vst.msk [vmem:[%s220_s3 + $0x4] sm:$0xf] %vm137_vm3, %v152_v36 }

// kernel: cross_encoder_forward.20
= control target key start
LH: loop header
LB: loop body
LE: loop exit
PB: predicated region body
PF: predicated region fallthrough
CT: control target
= control target key end

     0   :  { %vm28_vm0 = vcmask 254976   ;;  %v170_v0 = vmov 0.0   ;;  %vm171_vm1 = vmmov 0   ;;  %vm48_vm2 = vcmask 261120   ;;  %s235_s1 = inlined_call_operand.vmem [shape: bf16[32,32], index: 1, kind: input, shape index: {}]   ;;  %s236_s0 = inlined_call_operand.vmem [shape: bf16[2,32], index: 0, kind: input, shape index: {}]   ;;  %s237_s3 = inlined_call_operand.vmem [shape: bf16[2,32], index: 3, kind: input, shape index: {}]   ;;  %s238_s2 = inlined_call_operand.vmem [shape: f32[1,32], index: 2, kind: input, shape index: {}]   ;;  %s239_s4 = inlined_call_operand.vmem [shape: f32[1,32], index: 4, kind: input, shape index: {}]   ;;  %s240_s5 = inlined_call_operand.vmem [shape: f32[1,32], index: 5, kind: input, shape index: {}]   ;;  %s241_s6 = inlined_call_operand.vmem [shape: bf16[2,32], index: 6, kind: output, shape index: {}]  }
   0x1   :  { %156 = vmatprep.subr.bf16.mxu0 %v170_v0  ;;  %v166_v1 = vld [vmem:[%s235_s1 + $0x8] sm:$0xff]   ;;  %160 = vmatprep.mubr.msk.bf16.mxu0 %vm171_vm1, %v170_v0  ;;  %29 = vst.msk [vmem:[#allocation2] sm:$0x3] %vm28_vm0, %v170_v0  ;;  %v167_v2 = vld [vmem:[%s235_s1] sm:$0xff]   ;;  %vm141_vm3 = vcmask 253952  }
   0x2   :  { %157 = vmatpush3.bf16.msra.mxu0 %v166_v1  ;;  %v31_v3 = vld [vmem:[%s236_s0] sm:$0x1] }
   0x3   :  { %158 = vmatprep.subr.bf16.mxu0 %v170_v0  ;;  %v107_v10 = vld [vmem:[%s237_s3] sm:$0x1] }
   0x4   :  { %v150_v11 = vld [vmem:[%s238_s2] ss:$0 sm:$0xff]  ;;  %v108_v12 = vunpack.c.l.bf16 %v107_v10 }
   0x5   :  { %v151_v26 = vld [vmem:[%s239_s4] ss:$0 sm:$0xff] }
   0x6   :  { %159 = vmatpush3.bf16.msra.mxu0 %v167_v2  ;;  %v152_v28 = vld [vmem:[%s240_s5] ss:$0 sm:$0xff] }
   0x8   :  { %v30_v4 = vld [vmem:[#allocation2] sm:$0x3] }
   0x9   :  { %161 = vmatmul.mubr.msk.bf16.vlgmr.msra.gmra.mxu0 %vm48_vm2, %v31_v3 }
  0xc9   :  { %v86_v5 = vpop.f32.mrf.mxu0 }
  0xca   :  { %v92_v6 = vadd.f32 %v86_v5, %v30_v4 }
  0xcb   :  { %v162_v7 = vpop.f32.mrf.mxu0 }
  0xcc   :  { %94 = vst.msk [vmem:[#allocation2] sm:$0x3] %vm28_vm0, %v92_v6 }
  0xcd   :  { %v89_v8 = vpop.f32.mrf.mxu0 }
  0xcf   :  { %v163_v9 = vpop.f32.mrf.mxu0 }
  0xd3   :  { %v98_v13 = vld [vmem:[#allocation2] sm:$0x3] }
  0xd4   :  { %v106_v14 = vadd.f32 %v150_v11, %v98_v13 }
  0xd6   :  { %v109_v15 = vadd.f32 %v108_v12, %v106_v14 }
  0xd8   :  { %v110_v16 = vsel %vm28_vm0, %v109_v15, 0.0 }
  0xd9   :  { %111 = vadd.xlane.f32.xlu0 %v110_v16 }
 0x162   :  { %v112_v17 = vpop.xlane.xlu0 %111 }
 0x163   :  { %v114_v18 = vmul.f32 0.03125, %v112_v17 }
 0x165   :  { %v115_v19 = vsub.f32 %v109_v15, %v114_v18 }
 0x167   :  { %v116_v20 = vmul.f32 %v115_v19, %v115_v19 }
 0x169   :  { %v117_v21 = vsel %vm28_vm0, %v116_v20, 0.0 }
 0x16a   :  { %118 = vadd.xlane.f32.xlu0 %v117_v21 }
 0x1f3   :  { %v119_v22 = vpop.xlane.xlu0 %118 }
 0x1f4   :  { %v120_v23 = vmul.f32 0.03125, %v119_v22 }
 0x1f6   :  { %v121_v24 = vadd.f32 1e-12, %v120_v23 }
 0x1f8   :  { %168 = vrsqrt.f32 %v121_v24 }
 0x205   :  { %v169_v25 = vpop.eup %168 }
 0x206   :  { %v123_v27 = vmul.f32 %v169_v25, %v115_v19 }
 0x208   :  { %v131_v29 = vmul.f32 %v151_v26, %v123_v27 }
 0x20a   :  { %v139_v30 = vadd.f32 %v152_v28, %v131_v29 }
 0x20c   :  { %v140_v31 = vpack.c.bf16 %v139_v30, %v139_v30 }
 0x20e   :  { %142 = vst.msk [vmem:[%s241_s6] sm:$0x1] %vm141_vm3, %v140_v31 }

// kernel: cross_encoder_forward.17
= control target key start
LH: loop header
LB: loop body
LE: loop exit
PB: predicated region body
PF: predicated region fallthrough
CT: control target
= control target key end

     0   :  { %vm28_vm0 = vcmask 261120   ;;  %v247_v0 = vmov 0.0   ;;  %vm248_vm1 = vmmov 0   ;;  %vm72_vm2 = vcmask 523264   ;;  %s325_s1 = inlined_call_operand.vmem [shape: bf16[64,32], index: 1, kind: input, shape index: {}]   ;;  %s326_s0 = inlined_call_operand.vmem [shape: bf16[16,64], index: 0, kind: input, shape index: {}]   ;;  %s327_s3 = inlined_call_operand.vmem [shape: bf16[16,32], index: 3, kind: input, shape index: {}]   ;;  %s328_s2 = inlined_call_operand.vmem [shape: f32[1,32], index: 2, kind: input, shape index: {}]   ;;  %s329_s4 = inlined_call_operand.vmem [shape: f32[1,32], index: 4, kind: input, shape index: {}]   ;;  %s330_s5 = inlined_call_operand.vmem [shape: f32[1,32], index: 5, kind: input, shape index: {}]   ;;  %s331_s6 = inlined_call_operand.vmem [shape: bf16[16,32], index: 6, kind: output, shape index: {}]  }
   0x1   :  { %224 = vmatprep.subr.bf16.mxu0 %v247_v0  ;;  %v238_v1 = vld [vmem:[%s325_s1 + $0x18] sm:$0xff]   ;;  %232 = vmatprep.mubr.msk.bf16.mxu0 %vm248_vm1, %v247_v0  ;;  %29 = vst.msk [vmem:[#allocation2] sm:$0xff] %vm28_vm0, %v247_v0  ;;  %30 = vst.msk [vmem:[#allocation2 + $0x8] sm:$0xff] %vm28_vm0, %v247_v0  ;;  %v239_v2 = vld [vmem:[%s325_s1 + $0x10] sm:$0xff]   ;;  %vm195_vm3 = vcmask 257024  }
   0x2   :  { %225 = vmatpush3.bf16.msra.mxu0 %v238_v1  ;;  %v240_v3 = vld [vmem:[%s325_s1 + $0x8] sm:$0xff]   ;;  %v241_v4 = vld [vmem:[%s325_s1] sm:$0xff]  }
   0x3   :  { %226 = vmatprep.subr.bf16.mxu0 %v247_v0  ;;  %v242_v5 = vld [vmem:[%s326_s0] sm:$0xff]  }
   0x4   :  { %v216_v14 = vld [vmem:[%s327_s3] sm:$0xff]  }
   0x5   :  { %v208_v15 = vld [vmem:[%s328_s2] ss:$0 sm:$0xff]  ;;  %v217_v16 = vunpack.c.l.bf16 %v216_v14  ;;  %v218_v20 = vunpack.c.h.bf16 %v216_v14 }
   0x6   :  { %227 = vmatpush3.bf16.msra.mxu0 %v239_v2  ;;  %v209_v43 = vld [vmem:[%s329_s4] ss:$0 sm:$0xff] }
   0x7   :  { %228 = vmatprep.subr.bf16.mxu0 %v247_v0  ;;  %v210_v45 = vld [vmem:[%s330_s5] ss:$0 sm:$0xff] }
   0x8   :  { %v31_v6 = vld [vmem:[#allocation2] sm:$0xff]  ;;  %v32_v10 = vld [vmem:[#allocation2 + $0x8] sm:$0xff] }
   0xa   :  { %229 = vmatpush3.bf16.msra.mxu0 %v240_v3 }
   0xb   :  { %230 = vmatprep.subr.bf16.mxu0 %v247_v0 }
   0xe   :  { %231 = vmatpush3.bf16.msra.mxu0 %v241_v4 }
  0x11   :  { %233 = vmatmul.mubr.msk.bf16.vlgmr.msra.gmra.mxu0 %vm72_vm2, %v242_v5 }
  0xd1   :  { %v110_v7 = vpop.f32.mrf.mxu0 }
  0xd2   :  { %v117_v8 = vadd.f32 %v110_v7, %v31_v6 }
  0xd3   :  { %v234_v9 = vpop.f32.mrf.mxu0 }
  0xd4   :  { %120 = vst.msk [vmem:[#allocation2] sm:$0xff] %vm28_vm0, %v117_v8 }
  0xd5   :  { %v113_v11 = vpop.f32.mrf.mxu0 }
  0xd6   :  { %v118_v12 = vadd.f32 %v113_v11, %v32_v10 }
  0xd7   :  { %v235_v13 = vpop.f32.mrf.mxu0 }
  0xd8   :  { %121 = vst.msk [vmem:[#allocation2 + $0x8] sm:$0xff] %vm28_vm0, %v118_v12 }
  0xdb   :  { %v125_v17 = vld [vmem:[#allocation2] sm:$0xff] }
  0xdc   :  { %v134_v18 = vadd.f32 %v208_v15, %v125_v17 }
  0xde   :  { %v140_v19 = vadd.f32 %v217_v16, %v134_v18 }
  0xdf   :  { %v126_v21 = vld [vmem:[#allocation2 + $0x8] sm:$0xff] }
  0xe0   :  { %v142_v22 = vsel %vm28_vm0, %v140_v19, 0.0  ;;  %v135_v23 = vadd.f32 %v208_v15, %v126_v21 }
  0xe1   :  { %143 = vadd.xlane.f32.xlu0 %v142_v22 }
  0xe2   :  { %v141_v24 = vadd.f32 %v218_v20, %v135_v23 }
  0xe4   :  { %v145_v25 = vsel %vm28_vm0, %v141_v24, 0.0 }
  0xe5   :  { %146 = vadd.xlane.f32.xlu0 %v145_v25 }
 0x16a   :  { %v144_v26 = vpop.xlane.xlu0 %143 }
 0x16b   :  { %v149_v27 = vmul.f32 0.03125, %v144_v26 }
 0x16d   :  { %v151_v28 = vsub.f32 %v140_v19, %v149_v27 }
 0x16e   :  { %v147_v29 = vpop.xlane.xlu0 %146 }
 0x16f   :  { %v150_v30 = vmul.f32 0.03125, %v147_v29  ;;  %v153_v31 = vmul.f32 %v151_v28, %v151_v28 }
 0x171   :  { %v152_v32 = vsub.f32 %v141_v24, %v150_v30  ;;  %v155_v33 = vsel %vm28_vm0, %v153_v31, 0.0 }
 0x172   :  { %156 = vadd.xlane.f32.xlu1 %v155_v33 }
 0x173   :  { %v154_v34 = vmul.f32 %v152_v32, %v152_v32 }
 0x175   :  { %v158_v35 = vsel %vm28_vm0, %v154_v34, 0.0 }
 0x176   :  { %159 = vadd.xlane.f32.xlu1 %v158_v35 }
 0x1fb   :  { %v157_v36 = vpop.xlane.xlu1 %156 }
 0x1fc   :  { %v161_v37 = vmul.f32 0.03125, %v157_v36 }
 0x1fe   :  { %v163_v38 = vadd.f32 1e-12, %v161_v37 }
 0x1ff   :  { %v160_v39 = vpop.xlane.xlu1 %159 }
 0x200   :  { %243 = vrsqrt.f32 %v163_v38  ;;  %v162_v40 = vmul.f32 0.03125, %v160_v39 }
 0x202   :  { %v164_v41 = vadd.f32 1e-12, %v162_v40 }
 0x204   :  { %245 = vrsqrt.f32 %v164_v41 }
 0x20d   :  { %v244_v42 = vpop.eup %243 }
 0x20e   :  { %v167_v44 = vmul.f32 %v244_v42, %v151_v28 }
 0x210   :  { %v176_v46 = vmul.f32 %v209_v43, %v167_v44 }
 0x211   :  { %v246_v47 = vpop.eup %245 }
 0x212   :  { %v185_v48 = vadd.f32 %v210_v45, %v176_v46  ;;  %v168_v49 = vmul.f32 %v246_v47, %v152_v32 }
 0x214   :  { %v213_v50 = vpack.c.bf16 %v185_v48, %v185_v48  ;;  %v177_v51 = vmul.f32 %v209_v43, %v168_v49 }
 0x216   :  { %196 = vst.msk [vmem:[%s331_s6] sm:$0xf] %vm195_vm3, %v213_v50  ;;  %v186_v52 = vadd.f32 %v210_v45, %v177_v51 }
 0x218   :  { %v214_v53 = vpack.c.bf16 %v186_v52, %v186_v52 }
 0x21a   :  { %197 = vst.msk [vmem:[%s331_s6 + $0x4] sm:$0xf] %vm195_vm3, %v214_v53 }

// kernel: cross_encoder_forward.23
= control target key start
LH: loop header
LB: loop body
LE: loop exit
PB: predicated region body
PF: predicated region fallthrough
CT: control target
= control target key end

     0   :  { %v20_v0 = vlaneseq  ;;  %vm25_vm0 = vcmask 254976   ;;  %vm37_vm1 = vcmask 1024   ;;  %s76_s0 = inlined_call_operand.vmem [shape: bf16[2,32], index: 0, kind: input, shape index: {}]   ;;  %s77_s1 = inlined_call_operand.vmem [shape: bf16[1,32], index: 1, kind: input, shape index: {}]   ;;  %s78_s2 = inlined_call_operand.<no memory space> [shape: f32[1,1], index: 2, kind: input, shape index: {}]   ;;  %s79_s3 = inlined_call_operand.vmem [shape: f32[2,1], index: 3, kind: output, shape index: {}]  }
   0x1   :  { %v16_v1 = vld [vmem:[%s76_s0] sm:$0x1]  ;;  %v8_v3 = vstv %s78_s2 }
   0x2   :  { %v18_v2 = vld [vmem:[%s77_s1] sm:$0x1]  ;;  %v21_v5 = vshrl.u32 %v20_v0, 7  ;;  %9 = vst [vmem:[#allocation2] sm:$0x1] %v8_v3  ;;  %v17_v6 = vunpack.c.l.bf16 %v16_v1 }
   0x3   :  { %v19_v4 = vunpack.c.l.bf16 %v18_v2 }
   0x4   :  { %v22_v7 = vsub.s32 0, %v21_v5 }
   0x6   :  { %v23_v8 = vrot.slane %v19_v4, %v22_v7 }
   0x8   :  { %v24_v9 = vmul.f32 %v23_v8, %v17_v6 }
   0x9   :  { %v43_v11 = vld [vmem:[#allocation2] ss:$0 sm:$0xff] }
   0xa   :  { %v26_v10 = vsel %vm25_vm0, %v24_v9, 0.0 }
   0xb   :  { %27 = vadd.xlane.f32.xlu0 %v26_v10 }
  0x94   :  { %v28_v12 = vpop.xlane.xlu0 %27 }
  0x95   :  { %v36_v13 = vadd.f32 %v43_v11, %v28_v12 }
  0x97   :  { %38 = vst.msk [vmem:[%s79_s3] sm:$0x3] %vm37_vm1, %v36_v13 }

// kernel: cross_encoder_forward.21
= control target key start
LH: loop header
LB: loop body
LE: loop exit
PB: predicated region body
PF: predicated region fallthrough
CT: control target
= control target key end

     0   :  { %vm19_vm0 = vcmask 517120   ;;  %v135_v0 = vmov 0.0   ;;  %vm136_vm1 = vmmov 0   ;;  %vm39_vm2 = vcmask 261120   ;;  %s174_s1 = inlined_call_operand.vmem [shape: bf16[32,64], index: 1, kind: input, shape index: {}]   ;;  %s175_s0 = inlined_call_operand.vmem [shape: bf16[2,32], index: 0, kind: input, shape index: {}]   ;;  %s176_s2 = inlined_call_operand.vmem [shape: f32[1,64], index: 2, kind: input, shape index: {}]   ;;  %s177_s3 = inlined_call_operand.vmem [shape: bf16[2,64], index: 3, kind: output, shape index: {}]  }
   0x1   :  { %20 = vst.msk [vmem:[#allocation2] sm:$0x3] %vm19_vm0, %v135_v0  ;;  %121 = vmatprep.subr.bf16.mxu0 %v135_v0  ;;  %v131_v1 = vld [vmem:[%s174_s1 + $0x8] sm:$0xff]   ;;  %125 = vmatprep.mubr.msk.bf16.mxu0 %vm136_vm1, %v135_v0  ;;  %v132_v2 = vld [vmem:[%s174_s1] sm:$0xff]   ;;  %vm108_vm3 = vcmask 516096  }
   0x2   :  { %122 = vmatpush3.bf16.msra.mxu0 %v131_v1  ;;  %v22_v3 = vld [vmem:[%s175_s0] sm:$0x1] }
   0x3   :  { %123 = vmatprep.subr.bf16.mxu0 %v135_v0  ;;  %v117_v10 = vld [vmem:[%s176_s2] ss:$0 sm:$0xff] }
   0x6   :  { %124 = vmatpush3.bf16.msra.mxu0 %v132_v2 }
   0x8   :  { %v21_v4 = vld [vmem:[#allocation2] sm:$0x3] }
   0x9   :  { %126 = vmatmul.mubr.msk.bf16.vlgmr.msra.gmra.mxu0 %vm39_vm2, %v22_v3 }
  0xc9   :  { %v77_v5 = vpop.f32.mrf.mxu0 }
  0xca   :  { %v83_v6 = vadd.f32 %v77_v5, %v21_v4 }
  0xcb   :  { %v127_v7 = vpop.f32.mrf.mxu0 }
  0xcc   :  { %85 = vst.msk [vmem:[#allocation2] sm:$0x3] %vm19_vm0, %v83_v6 }
  0xcd   :  { %v80_v8 = vpop.f32.mrf.mxu0 }
  0xcf   :  { %v128_v9 = vpop.f32.mrf.mxu0 }
  0xd3   :  { %v89_v11 = vld [vmem:[#allocation2] sm:$0x3] }
  0xd4   :  { %v97_v12 = vadd.f32 %v117_v10, %v89_v11 }
  0xd6   :  { %v98_v13 = vmul.f32 %v97_v12, %v97_v12 }
  0xd8   :  { %v99_v14 = vmul.f32 %v98_v13, %v97_v12 }
  0xda   :  { %v100_v15 = vmul.f32 0.044715, %v99_v14 }
  0xdc   :  { %v101_v16 = vadd.f32 %v100_v15, %v97_v12 }
  0xde   :  { %v102_v17 = vmul.f32 0.7978846, %v101_v16 }
  0xe0   :  { %133 = vtanh.f32 %v102_v17 }
  0xed   :  { %v134_v18 = vpop.eup %133 }
  0xee   :  { %v104_v19 = vadd.f32 1.0, %v134_v18 }
  0xf0   :  { %v105_v20 = vmul.f32 0.5, %v104_v19 }
  0xf2   :  { %v106_v21 = vmul.f32 %v105_v20, %v97_v12 }
  0xf4   :  { %v107_v22 = vpack.c.bf16 %v106_v21, %v106_v21 }
  0xf6   :  { %109 = vst.msk [vmem:[%s177_s3] sm:$0x1] %vm108_vm3, %v107_v22 }

// kernel: cross_encoder_forward.22
= control target key start
LH: loop header
LB: loop body
LE: loop exit
PB: predicated region body
PF: predicated region fallthrough
CT: control target
= control target key end

     0   :  { %vm28_vm0 = vcmask 254976   ;;  %v196_v0 = vmov 0.0   ;;  %vm197_vm1 = vmmov 0   ;;  %vm64_vm2 = vcmask 523264   ;;  %s267_s1 = inlined_call_operand.vmem [shape: bf16[64,32], index: 1, kind: input, shape index: {}]   ;;  %s268_s0 = inlined_call_operand.vmem [shape: bf16[2,64], index: 0, kind: input, shape index: {}]   ;;  %s269_s3 = inlined_call_operand.vmem [shape: bf16[2,32], index: 3, kind: input, shape index: {}]   ;;  %s270_s2 = inlined_call_operand.vmem [shape: f32[1,32], index: 2, kind: input, shape index: {}]   ;;  %s271_s4 = inlined_call_operand.vmem [shape: f32[1,32], index: 4, kind: input, shape index: {}]   ;;  %s272_s5 = inlined_call_operand.vmem [shape: f32[1,32], index: 5, kind: input, shape index: {}]   ;;  %s273_s6 = inlined_call_operand.vmem [shape: bf16[2,32], index: 6, kind: output, shape index: {}]  }
   0x1   :  { %176 = vmatprep.subr.bf16.mxu0 %v196_v0  ;;  %v190_v1 = vld [vmem:[%s267_s1 + $0x18] sm:$0xff]   ;;  %184 = vmatprep.mubr.msk.bf16.mxu0 %vm197_vm1, %v196_v0  ;;  %29 = vst.msk [vmem:[#allocation2] sm:$0x3] %vm28_vm0, %v196_v0  ;;  %v191_v2 = vld [vmem:[%s267_s1 + $0x10] sm:$0xff]   ;;  %v192_v3 = vld [vmem:[%s267_s1 + $0x8] sm:$0xff]   ;;  %vm157_vm3 = vcmask 253952  }
   0x2   :  { %177 = vmatpush3.bf16.msra.mxu0 %v190_v1  ;;  %v193_v4 = vld [vmem:[%s267_s1] sm:$0xff]  }
   0x3   :  { %178 = vmatprep.subr.bf16.mxu0 %v196_v0  ;;  %v31_v5 = vld [vmem:[%s268_s0] sm:$0x1] }
   0x4   :  { %v123_v12 = vld [vmem:[%s269_s3] sm:$0x1] }
   0x5   :  { %v168_v13 = vld [vmem:[%s270_s2] ss:$0 sm:$0xff]  ;;  %v124_v14 = vunpack.c.l.bf16 %v123_v12 }
   0x6   :  { %179 = vmatpush3.bf16.msra.mxu0 %v191_v2  ;;  %v169_v28 = vld [vmem:[%s271_s4] ss:$0 sm:$0xff] }
   0x7   :  { %180 = vmatprep.subr.bf16.mxu0 %v196_v0  ;;  %v170_v30 = vld [vmem:[%s272_s5] ss:$0 sm:$0xff] }
   0x8   :  { %v30_v6 = vld [vmem:[#allocation2] sm:$0x3] }
   0xa   :  { %181 = vmatpush3.bf16.msra.mxu0 %v192_v3 }
   0xb   :  { %182 = vmatprep.subr.bf16.mxu0 %v196_v0 }
   0xe   :  { %183 = vmatpush3.bf16.msra.mxu0 %v193_v4 }
  0x11   :  { %185 = vmatmul.mubr.msk.bf16.vlgmr.msra.gmra.mxu0 %vm64_vm2, %v31_v5 }
  0xd1   :  { %v102_v7 = vpop.f32.mrf.mxu0 }
  0xd2   :  { %v108_v8 = vadd.f32 %v102_v7, %v30_v6 }
  0xd3   :  { %v186_v9 = vpop.f32.mrf.mxu0 }
  0xd4   :  { %110 = vst.msk [vmem:[#allocation2] sm:$0x3] %vm28_vm0, %v108_v8 }
  0xd5   :  { %v105_v10 = vpop.f32.mrf.mxu0 }
  0xd7   :  { %v187_v11 = vpop.f32.mrf.mxu0 }
  0xdb   :  { %v114_v15 = vld [vmem:[#allocation2] sm:$0x3] }
  0xdc   :  { %v122_v16 = vadd.f32 %v168_v13, %v114_v15 }
  0xde   :  { %v125_v17 = vadd.f32 %v124_v14, %v122_v16 }
  0xe0   :  { %v126_v18 = vsel %vm28_vm0, %v125_v17, 0.0 }
  0xe1   :  { %127 = vadd.xlane.f32.xlu0 %v126_v18 }
 0x16a   :  { %v128_v19 = vpop.xlane.xlu0 %127 }
 0x16b   :  { %v130_v20 = vmul.f32 0.03125, %v128_v19 }
 0x16d   :  { %v131_v21 = vsub.f32 %v125_v17, %v130_v20 }
 0x16f   :  { %v132_v22 = vmul.f32 %v131_v21, %v131_v21 }
 0x171   :  { %v133_v23 = vsel %vm28_vm0, %v132_v22, 0.0 }
 0x172   :  { %134 = vadd.xlane.f32.xlu0 %v133_v23 }
 0x1fb   :  { %v135_v24 = vpop.xlane.xlu0 %134 }
 0x1fc   :  { %v136_v25 = vmul.f32 0.03125, %v135_v24 }
 0x1fe   :  { %v137_v26 = vadd.f32 1e-12, %v136_v25 }
 0x200   :  { %194 = vrsqrt.f32 %v137_v26 }
 0x20d   :  { %v195_v27 = vpop.eup %194 }
 0x20e   :  { %v139_v29 = vmul.f32 %v195_v27, %v131_v21 }
 0x210   :  { %v147_v31 = vmul.f32 %v169_v28, %v139_v29 }
 0x212   :  { %v155_v32 = vadd.f32 %v170_v30, %v147_v31 }
 0x214   :  { %v156_v33 = vpack.c.bf16 %v155_v32, %v155_v32 }
 0x216   :  { %158 = vst.msk [vmem:[%s273_s6] sm:$0x1] %vm157_vm3, %v156_v33 }

</bundles_post_ra>
